<compile_context>
chip_gen: v5e
topology: v5e:2x2
jax: 0.10.0
libtpu: 0.0.40
codegen_flags: <defaults>
</compile_context>

<pallas_src>
import functools

import jax
import jax.numpy as jnp
from jax.experimental import pallas as pl
from jax.experimental.pallas import tpu as pltpu


def _round_up(x, m):
    return ((x + m - 1) // m) * m


def _conv3x3_kernel(x_cur_ref, x_halo_ref, w_ref, b_ref, o_ref, *, block_m, wp):
    """One grid step: `block_m` output pixels (rows of the padded-pixel matrix).

    x_cur_ref : (block_m, C_in)    rows [i*bm, (i+1)*bm) of the padded pixels
    x_halo_ref: (halo_pad, C_in)   first halo_pad rows of the *next* block
    w_ref     : (9, C_in, N_pad)   per-tap folded conv weights (lane-padded)
    b_ref     : (1, N_pad)         lane-padded bias (f32)
    o_ref     : (block_m, N_pad)
    """
    xblk = jnp.concatenate([x_cur_ref[...], x_halo_ref[...]], axis=0)
    acc = None
    for ky in range(3):
        for kx in range(3):
            t = ky * 3 + kx
            off = ky * wp + kx                      # static tap row offset
            contrib = jnp.dot(xblk[off:off + block_m, :], w_ref[t],
                              preferred_element_type=jnp.float32)
            acc = contrib if acc is None else acc + contrib
    o_ref[...] = (acc + b_ref[...]).astype(o_ref.dtype)


def retina_reg_head_forward(x_nchw, weight, bias, num_anchors, *,
                            block_m=1024, compute_dtype=jnp.bfloat16):
    """Forward of RetinaRegHead.

    x_nchw: (bs, C_in, H, W).  weight: (A*4, C_in, 3, 3).  bias: (A*4,).
    Returns (bs, H*W*A, 4), matching the PyTorch module.

    compute_dtype: dtype of the streamed activations / weights (MXU inputs);
    None keeps the input dtype.  Accumulation is always f32.
    """
    bs, c_in, h, w = x_nchw.shape
    c_out = weight.shape[0]
    assert c_out == num_anchors * 4
    out_dtype = x_nchw.dtype
    cdt = out_dtype if compute_dtype is None else compute_dtype

    hp, wp = h + 2, w + 2

    # NCHW -> NHWC, cast to compute dtype *before* padding so the HBM copy the
    # kernel streams is already narrow; zero-pad the 3x3 halo; flatten
    # (b, row, col) into one "padded pixel" axis.
    x_nhwc = jnp.transpose(x_nchw, (0, 2, 3, 1)).astype(cdt)
    x_pad = jnp.pad(x_nhwc, ((0, 0), (1, 1), (1, 1), (0, 0)))
    m_valid = bs * hp * wp
    x2 = x_pad.reshape(m_valid, c_in)

    # Tap (ky,kx) of flattened pixel p is at row p + ky*wp + kx, so a block of
    # block_m pixels needs `halo = 2*wp + 2` extra rows.  halo_pad is the
    # power-of-two fetch granule for the "next block" spec; block_m must be a
    # multiple of it so that spec's index_map stays block-aligned.
    halo = 2 * wp + 2
    halo_pad = max(8, pl.next_power_of_2(halo))
    bm = max(halo_pad, (block_m // halo_pad) * halo_pad)
    # v7x megacore: keep the 1-D parallel grid at >= 2 steps whenever possible.
    bm = min(bm, _round_up(pl.cdiv(m_valid, 2), halo_pad))
    n_blocks = pl.cdiv(m_valid, bm)
    m_pad = n_blocks * bm

    # Pad rows so both input BlockSpecs tile the array exactly; the padded
    # rows are zeros and only produce garbage outputs that are sliced off.
    x2 = jnp.pad(x2, ((0, m_pad + bm - m_valid), (0, 0)))

    # (C_out, C_in, 3, 3) -> (ky, kx, C_in, C_out) -> (9, C_in, C_out);
    # zero-pad C_out to a 128-lane multiple for unmasked full-lane stores.
    n_pad = _round_up(c_out, 128)
    w9 = jnp.transpose(weight, (2, 3, 1, 0)).reshape(9, c_in, c_out)
    w9 = jnp.pad(w9, ((0, 0), (0, 0), (0, n_pad - c_out))).astype(cdt)
    b2 = jnp.pad(bias, (0, n_pad - c_out)).reshape(1, n_pad).astype(jnp.float32)

    blocks_per_bm = bm // halo_pad
    kernel = functools.partial(_conv3x3_kernel, block_m=bm, wp=wp)

    out = pl.pallas_call(
        kernel,
        out_shape=jax.ShapeDtypeStruct((m_pad, n_pad), out_dtype),
        grid_spec=pltpu.PrefetchScalarGridSpec(
            num_scalar_prefetch=0,
            grid=(n_blocks,),
            in_specs=[
                pl.BlockSpec((bm, c_in), lambda i: (i, 0)),
                pl.BlockSpec((halo_pad, c_in),
                             lambda i: ((i + 1) * blocks_per_bm, 0)),
                pl.BlockSpec((9, c_in, n_pad), lambda i: (0, 0, 0)),  # resident
                pl.BlockSpec((1, n_pad), lambda i: (0, 0)),           # resident
            ],
            out_specs=pl.BlockSpec((bm, n_pad), lambda i: (i, 0)),
        ),
        compiler_params=pltpu.CompilerParams(
            dimension_semantics=("parallel",),
            vmem_limit_bytes=48 * 1024 * 1024,   # inside v7x's 64 MiB VMEM
        ),
    )(x2, x2, w9, b2)

    # Keep only real pixels / channels: (m_pad, N_pad) -> (bs, H, W, A*4).
    out = out[:m_valid, :c_out].reshape(bs, hp, wp, c_out)[:, :h, :w, :]
    # (bs, H, W, A*4) row-major == PyTorch permute(0,2,3,1) -> (bs, H*W*A, 4).
    return out.reshape(bs, h * w * num_anchors, 4)


def _reference_forward(x_nchw, weight, bias, num_anchors):
    """Pure-JAX reference of the PyTorch module for verification."""
    y = jax.lax.conv_general_dilated(
        x_nchw, weight,
        window_strides=(1, 1), padding=((1, 1), (1, 1)),
        dimension_numbers=("NCHW", "OIHW", "NCHW"),
    ) + bias[None, :, None, None]
    bs, _, h, w = y.shape
    return jnp.transpose(y, (0, 2, 3, 1)).reshape(bs, h * w * num_anchors, 4)


if __name__ == "__main__":
    # Small, module-consistent shapes.
    bs, c_in, h, w = 2, 16, 16, 16
    num_anchors = 9
    c_out = num_anchors * 4  # 36

    key = jax.random.PRNGKey(0)
    kx, kw = jax.random.split(key)

    x = jax.random.normal(kx, (bs, c_in, h, w), dtype=jnp.float32)
    # nn.init.normal_(weight, std=0.01); bias = 0
    weight = 0.01 * jax.random.normal(kw, (c_out, c_in, 3, 3), dtype=jnp.float32)
    bias = jnp.zeros((c_out,), dtype=jnp.float32)

    ref = _reference_forward(x, weight, bias, num_anchors)

    # f32 compute path: tight numerical check.
    out_f32 = jax.block_until_ready(
        retina_reg_head_forward(x, weight, bias, num_anchors, compute_dtype=None))
    assert out_f32.shape == (bs, h * w * num_anchors, 4), out_f32.shape
    assert jnp.allclose(out_f32, ref, atol=1e-4, rtol=1e-4), "f32 mismatch vs reference"

    # Default (bf16 streams, f32 accumulation) path: bf16-rounding tolerance.
    out_bf16 = jax.block_until_ready(
        retina_reg_head_forward(x, weight, bias, num_anchors))
    assert out_bf16.shape == (bs, h * w * num_anchors, 4), out_bf16.shape
    assert jnp.allclose(out_bf16, ref, atol=3e-2, rtol=3e-2), "bf16 mismatch vs reference"

    print("KERNEL_OK")
</pallas_src>

<mosaic_0001>
module attributes {stable_mosaic.version = 11 : i64} {
  func.func @_conv3x3_kernel(%arg0: i32, %arg1: memref<384x16xf32, #tpu.memory_space<vmem>>, %arg2: memref<64x16xf32, #tpu.memory_space<vmem>>, %arg3: memref<9x16x128xf32, #tpu.memory_space<vmem>>, %arg4: memref<1x128xf32, #tpu.memory_space<vmem>>, %arg5: memref<384x128xf32, #tpu.memory_space<vmem>>) attributes {dimension_semantics = [#tpu.dimension_semantics<parallel>], iteration_bounds = array<i64: 2>, scalar_prefetch = 0 : i64, scratch_operands = 0 : i64, tpu.core_type = #tpu.core_type<tc>, window_params = [{transform_indices = @transform_0, window_bounds = array<i64: 384, 16>}, {transform_indices = @transform_1, window_bounds = array<i64: 64, 16>}, {pipeline_mode = #tpu.pipeline_mode<synchronous>, transform_indices = @transform_2, window_bounds = array<i64: 9, 16, 128>}, {pipeline_mode = #tpu.pipeline_mode<synchronous>, transform_indices = @transform_3, window_bounds = array<i64: 1, 128>}, {transform_indices = @transform_4, window_bounds = array<i64: 384, 128>}]} {
    %c0 = arith.constant 0 : index
    %c0_0 = arith.constant 0 : index
    %0 = vector.load %arg1[%c0, %c0_0] : memref<384x16xf32, #tpu.memory_space<vmem>>, vector<384x16xf32>
    %c0_1 = arith.constant 0 : index
    %c0_2 = arith.constant 0 : index
    %1 = vector.load %arg2[%c0_1, %c0_2] : memref<64x16xf32, #tpu.memory_space<vmem>>, vector<64x16xf32>
    %2 = tpu.concatenate %0, %1 in 0 : vector<384x16xf32>, vector<64x16xf32> -> vector<448x16xf32>
    %3 = vector.extract_strided_slice %2 {offsets = [0, 0], sizes = [384, 16], strides = [1, 1]} : vector<448x16xf32> to vector<384x16xf32>
    %c0_3 = arith.constant 0 : index
    %c0_4 = arith.constant 0 : index
    %c0_5 = arith.constant 0 : index
    %4 = vector.load %arg3[%c0_3, %c0_4, %c0_5] : memref<9x16x128xf32, #tpu.memory_space<vmem>>, vector<1x16x128xf32>
    %5 = vector.shape_cast %4 : vector<1x16x128xf32> to vector<16x128xf32>
    %cst = arith.constant dense<0.000000e+00> : vector<384x128xf32>
    %6 = tpu.matmul %3, %5, %cst {dimension_numbers = #tpu.dot_dimension_numbers<[1], [0], [0], [1], [0, 0, 1, 1], [], []>} : vector<384x16xf32>, vector<16x128xf32>, vector<384x128xf32> -> vector<384x128xf32>
    %7 = vector.extract_strided_slice %2 {offsets = [1, 0], sizes = [384, 16], strides = [1, 1]} : vector<448x16xf32> to vector<384x16xf32>
    %c1 = arith.constant 1 : index
    %c0_6 = arith.constant 0 : index
    %c0_7 = arith.constant 0 : index
    %8 = vector.load %arg3[%c1, %c0_6, %c0_7] : memref<9x16x128xf32, #tpu.memory_space<vmem>>, vector<1x16x128xf32>
    %9 = vector.shape_cast %8 : vector<1x16x128xf32> to vector<16x128xf32>
    %cst_8 = arith.constant dense<0.000000e+00> : vector<384x128xf32>
    %10 = tpu.matmul %7, %9, %cst_8 {dimension_numbers = #tpu.dot_dimension_numbers<[1], [0], [0], [1], [0, 0, 1, 1], [], []>} : vector<384x16xf32>, vector<16x128xf32>, vector<384x128xf32> -> vector<384x128xf32>
    %11 = arith.addf %6, %10 : vector<384x128xf32>
    %12 = vector.extract_strided_slice %2 {offsets = [2, 0], sizes = [384, 16], strides = [1, 1]} : vector<448x16xf32> to vector<384x16xf32>
    %c2 = arith.constant 2 : index
    %c0_9 = arith.constant 0 : index
    %c0_10 = arith.constant 0 : index
    %13 = vector.load %arg3[%c2, %c0_9, %c0_10] : memref<9x16x128xf32, #tpu.memory_space<vmem>>, vector<1x16x128xf32>
    %14 = vector.shape_cast %13 : vector<1x16x128xf32> to vector<16x128xf32>
    %cst_11 = arith.constant dense<0.000000e+00> : vector<384x128xf32>
    %15 = tpu.matmul %12, %14, %cst_11 {dimension_numbers = #tpu.dot_dimension_numbers<[1], [0], [0], [1], [0, 0, 1, 1], [], []>} : vector<384x16xf32>, vector<16x128xf32>, vector<384x128xf32> -> vector<384x128xf32>
    %16 = arith.addf %11, %15 : vector<384x128xf32>
    %17 = vector.extract_strided_slice %2 {offsets = [18, 0], sizes = [384, 16], strides = [1, 1]} : vector<448x16xf32> to vector<384x16xf32>
    %c3 = arith.constant 3 : index
    %c0_12 = arith.constant 0 : index
    %c0_13 = arith.constant 0 : index
    %18 = vector.load %arg3[%c3, %c0_12, %c0_13] : memref<9x16x128xf32, #tpu.memory_space<vmem>>, vector<1x16x128xf32>
    %19 = vector.shape_cast %18 : vector<1x16x128xf32> to vector<16x128xf32>
    %cst_14 = arith.constant dense<0.000000e+00> : vector<384x128xf32>
    %20 = tpu.matmul %17, %19, %cst_14 {dimension_numbers = #tpu.dot_dimension_numbers<[1], [0], [0], [1], [0, 0, 1, 1], [], []>} : vector<384x16xf32>, vector<16x128xf32>, vector<384x128xf32> -> vector<384x128xf32>
    %21 = arith.addf %16, %20 : vector<384x128xf32>
    %22 = vector.extract_strided_slice %2 {offsets = [19, 0], sizes = [384, 16], strides = [1, 1]} : vector<448x16xf32> to vector<384x16xf32>
    %c4 = arith.constant 4 : index
    %c0_15 = arith.constant 0 : index
    %c0_16 = arith.constant 0 : index
    %23 = vector.load %arg3[%c4, %c0_15, %c0_16] : memref<9x16x128xf32, #tpu.memory_space<vmem>>, vector<1x16x128xf32>
    %24 = vector.shape_cast %23 : vector<1x16x128xf32> to vector<16x128xf32>
    %cst_17 = arith.constant dense<0.000000e+00> : vector<384x128xf32>
    %25 = tpu.matmul %22, %24, %cst_17 {dimension_numbers = #tpu.dot_dimension_numbers<[1], [0], [0], [1], [0, 0, 1, 1], [], []>} : vector<384x16xf32>, vector<16x128xf32>, vector<384x128xf32> -> vector<384x128xf32>
    %26 = arith.addf %21, %25 : vector<384x128xf32>
    %27 = vector.extract_strided_slice %2 {offsets = [20, 0], sizes = [384, 16], strides = [1, 1]} : vector<448x16xf32> to vector<384x16xf32>
    %c5 = arith.constant 5 : index
    %c0_18 = arith.constant 0 : index
    %c0_19 = arith.constant 0 : index
    %28 = vector.load %arg3[%c5, %c0_18, %c0_19] : memref<9x16x128xf32, #tpu.memory_space<vmem>>, vector<1x16x128xf32>
    %29 = vector.shape_cast %28 : vector<1x16x128xf32> to vector<16x128xf32>
    %cst_20 = arith.constant dense<0.000000e+00> : vector<384x128xf32>
    %30 = tpu.matmul %27, %29, %cst_20 {dimension_numbers = #tpu.dot_dimension_numbers<[1], [0], [0], [1], [0, 0, 1, 1], [], []>} : vector<384x16xf32>, vector<16x128xf32>, vector<384x128xf32> -> vector<384x128xf32>
    %31 = arith.addf %26, %30 : vector<384x128xf32>
    %32 = vector.extract_strided_slice %2 {offsets = [36, 0], sizes = [384, 16], strides = [1, 1]} : vector<448x16xf32> to vector<384x16xf32>
    %c6 = arith.constant 6 : index
    %c0_21 = arith.constant 0 : index
    %c0_22 = arith.constant 0 : index
    %33 = vector.load %arg3[%c6, %c0_21, %c0_22] : memref<9x16x128xf32, #tpu.memory_space<vmem>>, vector<1x16x128xf32>
    %34 = vector.shape_cast %33 : vector<1x16x128xf32> to vector<16x128xf32>
    %cst_23 = arith.constant dense<0.000000e+00> : vector<384x128xf32>
    %35 = tpu.matmul %32, %34, %cst_23 {dimension_numbers = #tpu.dot_dimension_numbers<[1], [0], [0], [1], [0, 0, 1, 1], [], []>} : vector<384x16xf32>, vector<16x128xf32>, vector<384x128xf32> -> vector<384x128xf32>
    %36 = arith.addf %31, %35 : vector<384x128xf32>
    %37 = vector.extract_strided_slice %2 {offsets = [37, 0], sizes = [384, 16], strides = [1, 1]} : vector<448x16xf32> to vector<384x16xf32>
    %c7 = arith.constant 7 : index
    %c0_24 = arith.constant 0 : index
    %c0_25 = arith.constant 0 : index
    %38 = vector.load %arg3[%c7, %c0_24, %c0_25] : memref<9x16x128xf32, #tpu.memory_space<vmem>>, vector<1x16x128xf32>
    %39 = vector.shape_cast %38 : vector<1x16x128xf32> to vector<16x128xf32>
    %cst_26 = arith.constant dense<0.000000e+00> : vector<384x128xf32>
    %40 = tpu.matmul %37, %39, %cst_26 {dimension_numbers = #tpu.dot_dimension_numbers<[1], [0], [0], [1], [0, 0, 1, 1], [], []>} : vector<384x16xf32>, vector<16x128xf32>, vector<384x128xf32> -> vector<384x128xf32>
    %41 = arith.addf %36, %40 : vector<384x128xf32>
    %42 = vector.extract_strided_slice %2 {offsets = [38, 0], sizes = [384, 16], strides = [1, 1]} : vector<448x16xf32> to vector<384x16xf32>
    %c8 = arith.constant 8 : index
    %c0_27 = arith.constant 0 : index
    %c0_28 = arith.constant 0 : index
    %43 = vector.load %arg3[%c8, %c0_27, %c0_28] : memref<9x16x128xf32, #tpu.memory_space<vmem>>, vector<1x16x128xf32>
    %44 = vector.shape_cast %43 : vector<1x16x128xf32> to vector<16x128xf32>
    %cst_29 = arith.constant dense<0.000000e+00> : vector<384x128xf32>
    %45 = tpu.matmul %42, %44, %cst_29 {dimension_numbers = #tpu.dot_dimension_numbers<[1], [0], [0], [1], [0, 0, 1, 1], [], []>} : vector<384x16xf32>, vector<16x128xf32>, vector<384x128xf32> -> vector<384x128xf32>
    %46 = arith.addf %41, %45 : vector<384x128xf32>
    %c0_30 = arith.constant 0 : index
    %c0_31 = arith.constant 0 : index
    %47 = vector.load %arg4[%c0_30, %c0_31] : memref<1x128xf32, #tpu.memory_space<vmem>>, vector<1x128xf32>
    %48 = vector.broadcast %47 : vector<1x128xf32> to vector<384x128xf32>
    %49 = arith.addf %46, %48 : vector<384x128xf32>
    %c0_32 = arith.constant 0 : index
    %c0_33 = arith.constant 0 : index
    %50 = vector.load %arg5[%c0_32, %c0_33] : memref<384x128xf32, #tpu.memory_space<vmem>>, vector<384x128xf32>
    tpu.vector_store %arg5[%c0_32, %c0_33], %49 {strides = array<i32>} : memref<384x128xf32, #tpu.memory_space<vmem>>, vector<384x128xf32>,
    return
  }
  func.func @transform_0(%arg0: i32) -> (i32, i32) {
    %c0_i32 = arith.constant 0 : i32
    %c0_i32_0 = arith.constant 0 : i32
    return %arg0, %c0_i32 : i32, i32
  }
  func.func @transform_1(%arg0: i32) -> (i32, i32) {
    %c1_i32 = arith.constant 1 : i32
    %0 = arith.addi %arg0, %c1_i32 : i32
    %c6_i32 = arith.constant 6 : i32
    %1 = arith.muli %0, %c6_i32 : i32
    %c0_i32 = arith.constant 0 : i32
    %c0_i32_0 = arith.constant 0 : i32
    return %1, %c0_i32 : i32, i32
  }
  func.func @transform_2(%arg0: i32) -> (i32, i32, i32) {
    %c0_i32 = arith.constant 0 : i32
    %c0_i32_0 = arith.constant 0 : i32
    %c0_i32_1 = arith.constant 0 : i32
    %c0_i32_2 = arith.constant 0 : i32
    return %c0_i32, %c0_i32_0, %c0_i32_1 : i32, i32, i32
  }
  func.func @transform_3(%arg0: i32) -> (i32, i32) {
    %c0_i32 = arith.constant 0 : i32
    %c0_i32_0 = arith.constant 0 : i32
    %c0_i32_1 = arith.constant 0 : i32
    return %c0_i32, %c0_i32_0 : i32, i32
  }
  func.func @transform_4(%arg0: i32) -> (i32, i32) {
    %c0_i32 = arith.constant 0 : i32
    %c0_i32_0 = arith.constant 0 : i32
    return %arg0, %c0_i32 : i32, i32
  }
}

</mosaic_0001>

<bundles_post_ra>
// kernel: tpu_custom_call.1
= control target key start
LH: loop header
LB: loop body
LE: loop exit
PB: predicated region body
PF: predicated region fallthrough
CT: control target
= control target key end

     0   :  { %9 = vsyncpa [#allocation3], 0  ;;  %s5933_s0 = inlined_call_operand.vmem [shape: f32[1152,16], index: 0, kind: input, shape index: {}]   ;;  %s5934_s1 = inlined_call_operand.vmem [shape: f32[1152,16], index: 1, kind: input, shape index: {}]   ;;  %s5935_s2 = inlined_call_operand.vmem [shape: f32[9,16,128], index: 2, kind: input, shape index: {}]   ;;  %s5936_s3 = inlined_call_operand.vmem [shape: f32[1,128], index: 3, kind: input, shape index: {}]   ;;  %s5937_s4 = inlined_call_operand.hbm [shape: f32[768,128], index: 4, kind: output, shape index: {}]  }
   0x1   :  { %11 = vsyncpa [#allocation3 + $0x1], 0  ;;  %s4293_s15 = smov 0   ;;  %s4295_s16 = smov 0  }
   0x2   :  { %s4297_s17 = smov 0   ;;  %s4299_s18 = smov 0  }
   0x3 LB: > { %s4314_s19 = sadd.s32 4294967295, %s4264_s18   ;;  %s3619_s20 = sadd.s32 4294967294, %s4264_s18   ;;  %s4264_s18 = sphi %s4299_s18, %s5999_s18   ;;  %s4260_s17 = sphi %s4297_s17, %s5998_s17   ;;  %s4256_s16 = sphi %s4295_s16, %s5997_s16   ;;  %s4252_s15 = sphi %s4293_s15, %s5996_s15  }
   0x4   : > { %s4318_s21 = sadd.s32 1, %s4264_s18   ;;  %s122_s22 = sadd.s32 1, %s4260_s17 }
   0x5   : > { %s119_s23 = ssub.s32 %s4264_s18, %s4318_s21  ;;  %p132_p0 = scmp.ne.s32.totalorder %s4260_s17, %s4256_s16 }
   0x6   : > { %p120_p1 = scmp.eq.s32.totalorder %s119_s23, 0  ;;  %p133_p2 = scmp.eq.s32.totalorder %s4314_s19, 1 }
   0x7   : > { %p138_p3 = scmp.ne.s32.totalorder %s4256_s16, %s4252_s15  ;;  %p139_p4 = scmp.eq.s32.totalorder %s3619_s20, 1 }
   0x8   : > { %s4329_s24 = scalar_select %p120_p1, %s4260_s17, %s122_s22  }
   0x9   : > { %p4331_p5 = por %p133_p2, %p132_p0  ;;  %p4335_p6 = por %p139_p4, %p138_p3 }
   0xa   : > { %p3622_p7 = scmp.ge.s32.totalorder %s4264_s18, 1  ;;  %p185_p8 = scmp.lt.s32.totalorder %s4264_s18, 3 }
   0xc   : > { %p186_p9 = pnand %p3622_p7, %p185_p8 }
   0xe   : > { %189 = sbr.rel (%p186_p9) target bundleno = 1031 (0x407), region = 36 }
  0x13   : > { %v3627_v0 = vld [vmem:[%s5935_s2 + $0x18] sm:$0xff]  ;;  %v3626_v1 = vld [vmem:[%s5935_s2 + $0x10] sm:$0xff]  ;;  %s218_s5 = smul.u32 48, %s4314_s19  ;;  %v3725_v2 = vld [vmem:[%s5935_s2 + $0x28] sm:$0xff]  ;;  %vm342_vm0 = vcmask 1046528   ;;  %vm440_vm1 = vcmask 130048  }
  0x14   : > { %4078 = vmatpush.msra.mxu1 %v3627_v0  ;;  %4079 = vmatpush.msra.mxu2 %v3627_v0  ;;  %v3775_v3 = vld [vmem:[%s5935_s2 + $0x38] sm:$0xff]  ;;  %v289_v4 = vld [vmem:[%s5935_s2 + $0x8] sm:$0xff]  ;;  %v3724_v55 = vld [vmem:[%s5935_s2 + $0x20] sm:$0xff]  ;;  %s224_s9 = sadd.s32 1, %s4314_s19  ;;  %vm958_vm2 = vcmask 1045504   ;;  %vm1586_vm3 = vcmask 1044480  }
  0x15   : > { %4080 = vmatpush.msra.mxu3 %v3627_v0  ;;  %p219_p10 = scmp.lt.s32.totalorder %s218_s5, 143  ;;  %551 = vmatpush.msra.mxu0 %v3627_v0  ;;  %v3825_v5 = vld [vmem:[%s5935_s2 + $0x48] sm:$0xff]  ;;  %v3774_v56 = vld [vmem:[%s5935_s2 + $0x30] sm:$0xff]  ;;  %v288_v57 = vld [vmem:[%s5935_s2] sm:$0xff]  ;;  %s3624_s10 = smul.u32 48, %s224_s9  ;;  %vm1992_vm4 = vcmask 1043456  }
  0x16   : > { %4081 = vmatpush.msra.mxu1 %v3626_v1  ;;  %4082 = vmatpush.msra.mxu2 %v3626_v1  ;;  %vm2620_vm5 = vcmask 1042432   ;;  %vm3026_vm6 = vcmask 1041408   ;;  %s215_s20 = sand.u32 1, %s4256_s16  }
  0x17   : > { %s6001_s5 = smov (!%p219_p10, %s218_s5), 143  ;;  %4083 = vmatpush.msra.mxu3 %v3626_v1  ;;  %552 = vmatpush.msra.mxu0 %v3626_v1  ;;  %p227_p11 = scmp.lt.s32.totalorder %s3624_s10, 143 }
  0x18   : > { %1166 = vmatpush.msrb.mxu2 %v3725_v2  ;;  %808 = vmatpush.msrb.mxu1 %v289_v4  ;;  %s3623_s14 = sshll.u32 %s6001_s5, 3  ;;  %s4084_s22 = smul.u32 384, %s215_s20 }
  0x19   : > { %1388 = vmatpush.msrb.mxu3 %v3775_v3  ;;  %s4363_s23 = scalar_lea.vmem %s5933_s0, %s3623_s14  ;;  %1794 = vmatpush.msrb.mxu0 %v3825_v5  ;;  %s6003_s10 = smov (!%p227_p11, %s3624_s10), 143 }
  0x1a   : > { %v4366_v6 = vld [vmem:[%s4363_s23 + $0x60] sm:$0xff]  ;;  %v4369_v7 = vld [vmem:[%s4363_s23 + $0x68] sm:$0xff]  ;;  %v4387_v18 = vld [vmem:[%s4363_s23 + $0x70] sm:$0xff]  ;;  %1167 = vmatpush.msrb.mxu2 %v3724_v55  ;;  %809 = vmatpush.msrb.mxu1 %v288_v57  ;;  %s3625_s27 = sshll.u32 %s6003_s10, 3  ;;  %s5512_s29 = scalar_lea.vmem [#allocation2], %s4084_s22 }
  0x1b   : > { %v4372_v8 = vld [vmem:[%s4363_s23 + $0xc0] sm:$0xff]  ;;  %v366_v9 = vrot.slane %v4366_v6, 1  ;;  %v368_v10 = vrot.slane %v4369_v7, 1  ;;  %v4377_v11 = vld [vmem:[%s4363_s23 + $0xc8] sm:$0xff]  ;;  %v4396_v21 = vld [vmem:[%s4363_s23 + $0xd0] sm:$0xff]  ;;  %v370_v28 = vrot.slane %v4387_v18, 1  ;;  %1389 = vmatpush.msrb.mxu3 %v3774_v56  ;;  %s4638_s6 = scalar_lea.vmem %s5934_s1, %s3625_s27 }
  0x1c   : > { %v390_v12 = vrot.slane %v4372_v8, 1  ;;  %v4381_v13 = vld [vmem:[%s4363_s23 + $0x120] sm:$0xff]  ;;  %v272_v14 = vld [vmem:[%s4363_s23 + $0x128] sm:$0xff]  ;;  %v392_v15 = vrot.slane %v4377_v11, 1  ;;  %v273_v24 = vld [vmem:[%s4363_s23 + $0x130] sm:$0xff]  ;;  %v394_v30 = vrot.slane %v4396_v21, 1 }
  0x1d   : > { %v414_v16 = vrot.slane %v4381_v13, 1  ;;  %v416_v17 = vrot.slane %v272_v14, 1  ;;  %v4390_v19 = vld [vmem:[%s4363_s23] sm:$0xff]  ;;  %v369_v20 = vsel %vm342_vm0, %v366_v9, %v368_v10  ;;  %v4399_v22 = vld [vmem:[%s4363_s23 + $0x8] sm:$0xff]  ;;  %v4415_v29 = vld [vmem:[%s4363_s23 + $0x10] sm:$0xff]  ;;  %v418_v32 = vrot.slane %v273_v24, 1 }
  0x1e   : > { %v343_v23 = vrot.slane %v4390_v19, 1  ;;  %3640 = vmatmul.msk.f32.vlgmr.msra.gmra.mxu1 %vm440_vm1, %v369_v20  ;;  %v393_v25 = vsel %vm342_vm0, %v390_v12, %v392_v15  ;;  %v344_v27 = vrot.slane %v4399_v22, 1  ;;  %v346_v33 = vrot.slane %v4415_v29, 1  ;;  %v4425_v37 = vld [vmem:[%s4363_s23 + $0x78] sm:$0xff]  ;;  %v4446_v49 = vld [vmem:[%s4363_s23 + $0x80] sm:$0xff]  ;;  %v4476_v0 = vld [vmem:[%s4363_s23 + $0x88] sm:$0xff] }
  0x1f   : > { %v417_v26 = vsel %vm342_vm0, %v414_v16, %v416_v17  ;;  %3652 = vmatmul.msk.f32.vlgmr.msra.gmra.mxu2 %vm440_vm1, %v393_v25  ;;  %v371_v34 = vsel %vm342_vm0, %v368_v10, %v370_v28  ;;  %v395_v35 = vsel %vm342_vm0, %v392_v15, %v394_v30  ;;  %v419_v36 = vsel %vm342_vm0, %v416_v17, %v418_v32  ;;  %v4428_v38 = vld [vmem:[%s4363_s23 + $0xd8] sm:$0xff]  ;;  %v4449_v50 = vld [vmem:[%s4363_s23 + $0xe0] sm:$0xff]  ;;  %v4479_v1 = vld [vmem:[%s4363_s23 + $0xe8] sm:$0xff]  ;;  %s4077_s5 = smul.u32 384, %s4314_s19  ;;  %s3542_s9 = sshll.u32 %s5512_s29, 4  ;;  %s3543_s9 = int_to_ptr.vmem [resolvable:$true] %s3542_s9 }
  0x20   : > { %3664 = vmatmul.msk.f32.vlgmr.msra.gmra.mxu3 %vm440_vm1, %v417_v26  ;;  %v345_v31 = vsel %vm342_vm0, %v343_v23, %v344_v27  ;;  %v274_v39 = vld [vmem:[%s4363_s23 + $0x138] sm:$0xff]  ;;  %v347_v40 = vsel %vm342_vm0, %v344_v27, %v346_v33  ;;  %v372_v41 = vrot.slane %v4425_v37, 1  ;;  %v396_v43 = vrot.slane %v4428_v38, 1  ;;  %v275_v51 = vld [vmem:[%s4363_s23 + $0x140] sm:$0xff]  ;;  %v276_v2 = vld [vmem:[%s4363_s23 + $0x148] sm:$0xff]  ;;  %s3530_s10 = scalar_lea.sflag [#allocation3], %s215_s20 }
  0x21   : > { %3628 = vmatmul.msk.f32.vlgmr.msra.gmra.mxu0 %vm440_vm1, %v345_v31  ;;  %v4437_v42 = vld [vmem:[%s4363_s23 + $0x18] sm:$0xff]  ;;  %v420_v44 = vrot.slane %v274_v39, 1  ;;  %v4455_v53 = vld [vmem:[%s4363_s23 + $0x20] sm:$0xff]  ;;  %v374_v54 = vrot.slane %v4446_v49, 1  ;;  %v398_v58 = vrot.slane %v4449_v50, 1  ;;  %v422_v59 = vrot.slane %v275_v51, 1  ;;  %s3541_s8 = scalar_lea.hbm %s5937_s4, %s4077_s5 }
  0x22   : > { %v348_v45 = vrot.slane %v4437_v42, 1  ;;  %v373_v46 = vsel %vm342_vm0, %v370_v28, %v372_v41  ;;  %v397_v47 = vsel %vm342_vm0, %v394_v30, %v396_v43  ;;  %v350_v60 = vrot.slane %v4455_v53, 1  ;;  %v4488_v5 = vld [vmem:[%s4363_s23 + $0x28] sm:$0xff]  ;;  %v3824_v10 = vld [vmem:[%s5935_s2 + $0x40] sm:$0xff]  ;;  %v4500_v25 = vld [vmem:[%s4363_s23 + $0x90] sm:$0xff]  ;;  %s3544_s19 = sshll.u32 %s3541_s8, 4  ;;  %s3545_s19 = int_to_ptr.hbm [resolvable:$true] %s3544_s19 }
  0x23   : > { %v421_v48 = vsel %vm342_vm0, %v418_v32, %v420_v44  ;;  %v375_v61 = vsel %vm342_vm0, %v372_v41, %v374_v54  ;;  %v399_v62 = vsel %vm342_vm0, %v396_v43, %v398_v58  ;;  %v423_v63 = vsel %vm342_vm0, %v420_v44, %v422_v59  ;;  %1795 = vmatpush.msrb.mxu0 %v3824_v10  ;;  %v4503_v26 = vld [vmem:[%s4363_s23 + $0xf0] sm:$0xff]  ;;  %v4524_v41 = vld [vmem:[%s4363_s23 + $0xf8] sm:$0xff]  ;;  %v4542_v56 = vld [vmem:[%s4363_s23 + $0xa0] sm:$0xff]  ;;  %s4216_s11 = sshra.s32 %s3545_s19, 4  ;;  %s4222_s22 = scalar_lea.hbm %s5937_s4, 768  ;;  %s4217_s11 = int_to_ptr.hbm [resolvable:$true] %s4216_s11 }
  0x24   : > { %v349_v52 = vsel %vm342_vm0, %v346_v33, %v348_v45  ;;  %v351_v3 = vsel %vm342_vm0, %v348_v45, %v350_v60  ;;  %v376_v4 = vrot.slane %v4476_v0, 1  ;;  %v400_v14 = vrot.slane %v4479_v1, 1  ;;  %v277_v27 = vld [vmem:[%s4363_s23 + $0x150] sm:$0xff]  ;;  %v278_v43 = vld [vmem:[%s4363_s23 + $0x158] sm:$0xff]  ;;  %v4545_v57 = vld [vmem:[%s4363_s23 + $0x100] sm:$0xff]  ;;  %s4218_s12 = scalar_lea.hbm %s4217_s11, 384  ;;  %p4223_p1 = scmp.lt.s32.totalorder %s4217_s11, %s5937_s4 }
  0x25   : > { %v424_v15 = vrot.slane %v276_v2, 1  ;;  %v352_v17 = vrot.slane %v4488_v5, 1  ;;  %v378_v30 = vrot.slane %v4500_v25, 1  ;;  %v4512_v31 = vld [vmem:[%s4363_s23 + $0x30] sm:$0xff]  ;;  %v402_v32 = vrot.slane %v4503_v26, 1  ;;  %p4219_p12 = scmp.ne.s32.totalorder %s4217_s11, %s4218_s12  ;;  %p4224_p2 = scmp.lt.s32.totalorder %s4222_s22, %s4218_s12 }
  0x26   : > { %3641 = vmatmul.msk.f32.gmra.mxu1 %vm440_vm1, %v371_v34  ;;  %v377_v20 = vsel %vm342_vm0, %v374_v54, %v376_v4  ;;  %v401_v23 = vsel %vm342_vm0, %v398_v58, %v400_v14  ;;  %v426_v33 = vrot.slane %v277_v27, 1  ;;  %v354_v34 = vrot.slane %v4512_v31, 1  ;;  %v279_v58 = vld [vmem:[%s4363_s23 + $0x160] sm:$0xff] }
  0x27   : > { %3653 = vmatmul.msk.f32.gmra.mxu2 %vm440_vm1, %v395_v35  ;;  %v425_v24 = vsel %vm342_vm0, %v422_v59, %v424_v15  ;;  %v353_v28 = vsel %vm342_vm0, %v350_v60, %v352_v17  ;;  %v379_v35 = vsel %vm342_vm0, %v376_v4, %v378_v30  ;;  %v382_v60 = vrot.slane %v4542_v56, 1  ;;  %p4220_p13 = pnand %p4219_p12, %p4331_p5  ;;  %p4225_p3 = por %p4224_p2, %p4223_p1 }
  0x28   : > { %3665 = vmatmul.msk.f32.gmra.mxu3 %vm440_vm1, %v419_v36  ;;  %v403_v36 = vsel %vm342_vm0, %v400_v14, %v402_v32  ;;  %v427_v39 = vsel %vm342_vm0, %v424_v15, %v426_v33  ;;  %v355_v44 = vsel %vm342_vm0, %v352_v17, %v354_v34  ;;  %v4563_v14 = vld [vmem:[%s4363_s23 + $0xa8] sm:$0xff]  ;;  %v962_v13 = vrot.slane %v4415_v29, 2 }
  0x29   : > { %3629 = vmatmul.msk.f32.gmra.mxu0 %vm440_vm1, %v347_v40  ;;  %v4521_v40 = vld [vmem:[%s4363_s23 + $0x98] sm:$0xff]  ;;  %v4566_v15 = vld [vmem:[%s4363_s23 + $0x108] sm:$0xff]  ;;  %p4221_p0 = pneg %p4220_p13 }
  0x2a   : > { %v380_v45 = vrot.slane %v4521_v40, 1  ;;  %v280_v17 = vld [vmem:[%s4363_s23 + $0x168] sm:$0xff]  ;;  %v408_v27 = vrot.slane %v4566_v15, 1 }
  0x2b   : > { %p4226_p4 = pnand %p4225_p3, %p4221_p0 }
  0x2e   : > { %3642 = vmatmul.msk.f32.gmra.mxu1 %vm440_vm1, %v373_v46  ;;  %v4533_v46 = vld [vmem:[%s4363_s23 + $0x38] sm:$0xff] }
  0x2f   : > { %3654 = vmatmul.msk.f32.gmra.mxu2 %vm440_vm1, %v397_v47  ;;  %v404_v47 = vrot.slane %v4524_v41, 1  ;;  %v356_v51 = vrot.slane %v4533_v46, 1 }
  0x30   : > { %3666 = vmatmul.msk.f32.gmra.mxu3 %vm440_vm1, %v421_v48  ;;  %v428_v48 = vrot.slane %v278_v43, 1 }
  0x31   : > { %3630 = vmatmul.msk.f32.gmra.mxu0 %vm440_vm1, %v349_v52  ;;  %v381_v52 = vsel %vm342_vm0, %v378_v30, %v380_v45  ;;  %v405_v54 = vsel %vm342_vm0, %v402_v32, %v404_v47  ;;  %v357_v59 = vsel %vm342_vm0, %v354_v34, %v356_v51 }
  0x32   : > { %v429_v55 = vsel %vm342_vm0, %v426_v33, %v428_v48 }
  0x36   : > { %3643 = vmatmul.msk.f32.gmra.mxu1 %vm440_vm1, %v375_v61  ;;  %v4554_v61 = vld [vmem:[%s4363_s23 + $0x40] sm:$0xff] }
  0x37   : > { %3655 = vmatmul.msk.f32.gmra.mxu2 %vm440_vm1, %v399_v62  ;;  %v406_v62 = vrot.slane %v4545_v57, 1  ;;  %v358_v2 = vrot.slane %v4554_v61, 1 }
  0x38   : > { %3667 = vmatmul.msk.f32.gmra.mxu3 %vm440_vm1, %v423_v63  ;;  %v430_v63 = vrot.slane %v279_v58, 1 }
  0x39   : > { %3631 = vmatmul.msk.f32.gmra.mxu0 %vm440_vm1, %v351_v3  ;;  %v383_v3 = vsel %vm342_vm0, %v380_v45, %v382_v60  ;;  %v407_v4 = vsel %vm342_vm0, %v404_v47, %v406_v62  ;;  %v409_v33 = vsel %vm342_vm0, %v406_v62, %v408_v27  ;;  %v3925_v47 = vld [vmem:[%s5935_s2 + $0x68] sm:$0xff]  ;;  %v4615_v62 = vld [vmem:[%s4363_s23 + $0xb8] sm:$0xff] }
  0x3a   : > { %v431_v10 = vsel %vm342_vm0, %v428_v48, %v430_v63  ;;  %v3975_v48 = vld [vmem:[%s5935_s2 + $0x78] sm:$0xff]  ;;  %2422 = vmatpush.msra.mxu2 %v3925_v47 }
  0x3b   : > { %2828 = vmatpush.msra.mxu3 %v3975_v48 }
  0x3e   : > { %3644 = vmatmul.msk.f32.gmra.mxu1 %vm440_vm1, %v377_v20  ;;  %v359_v20 = vsel %vm342_vm0, %v356_v51, %v358_v2  ;;  %v3875_v51 = vld [vmem:[%s5935_s2 + $0x58] sm:$0xff] }
  0x3f   : > { %3656 = vmatmul.msk.f32.gmra.mxu2 %vm440_vm1, %v401_v23  ;;  %v384_v23 = vrot.slane %v4563_v14, 1  ;;  %2200 = vmatpush.msra.mxu1 %v3875_v51  ;;  %v959_v51 = vrot.slane %v4390_v19, 2 }
  0x40   : > { %3668 = vmatmul.msk.f32.gmra.mxu3 %vm440_vm1, %v425_v24  ;;  %v4575_v24 = vld [vmem:[%s4363_s23 + $0x48] sm:$0xff] }
  0x41   : > { %3632 = vmatmul.msk.f32.gmra.mxu0 %vm440_vm1, %v353_v28  ;;  %v432_v28 = vrot.slane %v280_v17, 1  ;;  %v360_v30 = vrot.slane %v4575_v24, 1  ;;  %v385_v32 = vsel %vm342_vm0, %v382_v60, %v384_v23  ;;  %v4025_v17 = vld [vmem:[%s5935_s2 + $0x88] sm:$0xff] }
  0x42   : > { %3234 = vmatpush.msra.mxu0 %v4025_v17  ;;  %v1592_v17 = vrot.slane %v4488_v5, 3 }
  0x43   : > { %v433_v34 = vsel %vm342_vm0, %v430_v63, %v432_v28  ;;  %v361_v43 = vsel %vm342_vm0, %v358_v2, %v360_v30  ;;  %v4618_v63 = vld [vmem:[%s4363_s23 + $0x118] sm:$0xff] }
  0x44   : > { %v282_v2 = vld [vmem:[%s4363_s23 + $0x178] sm:$0xff] }
  0x46   : > { %3645 = vmatmul.msk.f32.gmra.mxu1 %vm440_vm1, %v379_v35  ;;  %v4585_v35 = vld [vmem:[%s4363_s23 + $0xb0] sm:$0xff] }
  0x47   : > { %3657 = vmatmul.msk.f32.gmra.mxu2 %vm440_vm1, %v403_v36  ;;  %v4588_v36 = vld [vmem:[%s4363_s23 + $0x110] sm:$0xff]  ;;  %v386_v45 = vrot.slane %v4585_v35, 1 }
  0x48   : > { %3669 = vmatmul.msk.f32.gmra.mxu3 %vm440_vm1, %v427_v39  ;;  %v281_v39 = vld [vmem:[%s4363_s23 + $0x170] sm:$0xff] }
  0x49   : > { %3633 = vmatmul.msk.f32.gmra.mxu0 %vm440_vm1, %v355_v44  ;;  %v4594_v44 = vld [vmem:[%s4363_s23 + $0x50] sm:$0xff]  ;;  %v387_v58 = vsel %vm342_vm0, %v384_v23, %v386_v45  ;;  %v436_v23 = vrot.slane %v282_v2, 1 }
  0x4e   : > { %3646 = vmatmul.msk.f32.gmra.mxu1 %vm440_vm1, %v381_v52  ;;  %v410_v52 = vrot.slane %v4588_v36, 1 }
  0x4f   : > { %3658 = vmatmul.msk.f32.gmra.mxu2 %vm440_vm1, %v405_v54  ;;  %v434_v54 = vrot.slane %v281_v39, 1 }
  0x50   : > { %3670 = vmatmul.msk.f32.gmra.mxu3 %vm440_vm1, %v429_v55  ;;  %v362_v55 = vrot.slane %v4594_v44, 1 }
  0x51   : > { %3634 = vmatmul.msk.f32.gmra.mxu0 %vm440_vm1, %v357_v59  ;;  %v411_v59 = vsel %vm342_vm0, %v408_v27, %v410_v52  ;;  %v435_v60 = vsel %vm342_vm0, %v432_v28, %v434_v54 }
  0x56   : > { %3647 = vmatmul.msk.f32.gmra.mxu1 %vm440_vm1, %v383_v3  ;;  %v363_v3 = vsel %vm342_vm0, %v360_v30, %v362_v55 }
  0x57   : > { %3659 = vmatmul.msk.f32.gmra.mxu2 %vm440_vm1, %v407_v4  ;;  %v388_v4 = vrot.slane %v4615_v62, 1 }
  0x58   : > { %3671 = vmatmul.msk.f32.gmra.mxu3 %vm440_vm1, %v431_v10  ;;  %v4627_v10 = vld [vmem:[%s4363_s23 + $0x58] sm:$0xff] }
  0x59   : > { %3635 = vmatmul.msk.f32.gmra.mxu0 %vm440_vm1, %v359_v20  ;;  %v412_v20 = vrot.slane %v4618_v63, 1  ;;  %v364_v27 = vrot.slane %v4627_v10, 1  ;;  %v389_v28 = vsel %vm342_vm0, %v386_v45, %v388_v4 }
  0x5b   : > { %v413_v30 = vsel %vm342_vm0, %v410_v52, %v412_v20  ;;  %v415_v45 = vsel %vm342_vm0, %v412_v20, %v414_v16  ;;  %v367_v48 = vsel %vm342_vm0, %v364_v27, %v366_v9  ;;  %v964_v16 = vrot.slane %v4437_v42, 2 }
  0x5c   : > { %v1587_v52 = vrot.slane %v4415_v29, 3 }
  0x5e   : > { %3648 = vmatmul.msk.f32.gmra.mxu1 %vm440_vm1, %v385_v32  ;;  %v437_v32 = vsel %vm342_vm0, %v434_v54, %v436_v23  ;;  %v1588_v54 = vrot.slane %v4437_v42, 3 }
  0x5f   : > { %3660 = vmatmul.msk.f32.gmra.mxu2 %vm440_vm1, %v409_v33  ;;  %v283_v33 = vld [vmem:[%s4638_s6] sm:$0xff] }
  0x60   : > { %3672 = vmatmul.msk.f32.gmra.mxu3 %vm440_vm1, %v433_v34  ;;  %v365_v34 = vsel %vm342_vm0, %v362_v55, %v364_v27  ;;  %v438_v39 = vrot.slane %v283_v33, 1  ;;  %v965_v55 = vsel %vm958_vm2, %v962_v13, %v964_v16  ;;  %v1594_v27 = vrot.slane %v4512_v31, 3 }
  0x61   : > { %3636 = vmatmul.msk.f32.gmra.mxu0 %vm440_vm1, %v361_v43  ;;  %v391_v43 = vsel %vm342_vm0, %v388_v4, %v390_v12  ;;  %v960_v12 = vrot.slane %v4399_v22, 2  ;;  %v968_v4 = vrot.slane %v4488_v5, 2 }
  0x62   : > { %v439_v47 = vsel %vm342_vm0, %v436_v23, %v438_v39 }
  0x63   : > { %v961_v9 = vsel %vm958_vm2, %v959_v51, %v960_v12  ;;  %v963_v2 = vsel %vm958_vm2, %v960_v12, %v962_v13 }
  0x66   : > { %3649 = vmatmul.msk.f32.gmra.mxu1 %vm440_vm1, %v387_v58  ;;  %v1589_v58 = vsel %vm1586_vm3, %v1587_v52, %v1588_v54 }
  0x67   : > { %3661 = vmatmul.msk.f32.gmra.mxu2 %vm440_vm1, %v411_v59  ;;  %v966_v59 = vrot.slane %v4455_v53, 2 }
  0x68   : > { %3673 = vmatmul.msk.f32.gmra.mxu3 %vm440_vm1, %v435_v60  ;;  %v1590_v60 = vrot.slane %v4455_v53, 3 }
  0x69   : > { %3637 = vmatmul.msk.f32.gmra.mxu0 %vm440_vm1, %v363_v3  ;;  %v967_v3 = vsel %vm958_vm2, %v964_v16, %v966_v59  ;;  %v969_v20 = vsel %vm958_vm2, %v966_v59, %v968_v4  ;;  %v976_v16 = vrot.slane %v4575_v24, 2 }
  0x6a   : > { %v1593_v23 = vsel %vm1586_vm3, %v1590_v60, %v1592_v17 }
  0x6e   : > { %3650 = vmatmul.msk.f32.gmra.mxu1 %vm440_vm1, %v389_v28 }
  0x6f   : > { %3662 = vmatmul.msk.f32.gmra.mxu2 %vm440_vm1, %v413_v30  ;;  %v1595_v30 = vsel %vm1586_vm3, %v1592_v17, %v1594_v27 }
  0x70   : > { %3674 = vmatmul.msk.f32.gmra.mxu3 %vm440_vm1, %v437_v32  ;;  %v1596_v32 = vrot.slane %v4533_v46, 3 }
  0x71   : > { %3638 = vmatmul.msk.f32.gmra.mxu0 %vm440_vm1, %v365_v34 }
  0x72   : > { %v1597_v39 = vsel %vm1586_vm3, %v1594_v27, %v1596_v32 }
  0x76   : > { %3651 = vmatmul.msk.f32.gmra.mxu1 %vm440_vm1, %v391_v43  ;;  %v974_v43 = vrot.slane %v4554_v61, 2 }
  0x77   : > { %3663 = vmatmul.msk.f32.gmra.mxu2 %vm440_vm1, %v415_v45 }
  0x78   : > { %3675 = vmatmul.msk.f32.gmra.mxu3 %vm440_vm1, %v439_v47 }
  0x79   : > { %3639 = vmatmul.msk.f32.gmra.mxu0 %vm440_vm1, %v367_v48  ;;  %v1598_v48 = vrot.slane %v4554_v61, 3 }
  0x7b   : > { %v1599_v13 = vsel %vm1586_vm3, %v1596_v32, %v1598_v48 }
  0x7e   : > { %3676 = vmatmul.msk.f32.vlgmr.msrb.gmra.mxu1 %vm440_vm1, %v4390_v19  ;;  %v1591_v19 = vsel %vm1586_vm3, %v1588_v54, %v1590_v60  ;;  %v978_v60 = vrot.slane %v4594_v44, 2 }
  0x7f   : > { %3726 = vmatmul.msk.f32.vlgmr.msrb.gmra.mxu2 %vm440_vm1, %v961_v9  ;;  %v1600_v9 = vrot.slane %v4575_v24, 3 }
  0x80   : > { %3776 = vmatmul.msk.f32.vlgmr.msrb.gmra.mxu3 %vm440_vm1, %v965_v55 }
  0x81   : > { %3826 = vmatmul.msk.f32.vlgmr.msrb.gmra.mxu0 %vm440_vm1, %v1589_v58  ;;  %v1601_v59 = vsel %vm1586_vm3, %v1598_v48, %v1600_v9  ;;  %v1606_v48 = vrot.slane %v4366_v6, 3 }
  0x86   : > { %3677 = vmatmul.msk.f32.gmra.mxu1 %vm440_vm1, %v4399_v22  ;;  %v970_v22 = vrot.slane %v4512_v31, 2 }
  0x87   : > { %3727 = vmatmul.msk.f32.gmra.mxu2 %vm440_vm1, %v963_v2 }
  0x88   : > { %3777 = vmatmul.msk.f32.gmra.mxu3 %vm440_vm1, %v967_v3  ;;  %v971_v28 = vsel %vm958_vm2, %v968_v4, %v970_v22 }
  0x89   : > { %3827 = vmatmul.msk.f32.gmra.mxu0 %vm440_vm1, %v1591_v19  ;;  %v1602_v19 = vrot.slane %v4594_v44, 3 }
  0x8e   : > { %3678 = vmatmul.msk.f32.gmra.mxu1 %vm440_vm1, %v4415_v29  ;;  %v972_v29 = vrot.slane %v4533_v46, 2 }
  0x8f   : > { %3728 = vmatmul.msk.f32.gmra.mxu2 %vm440_vm1, %v965_v55 }
  0x90   : > { %3778 = vmatmul.msk.f32.gmra.mxu3 %vm440_vm1, %v969_v20  ;;  %v973_v34 = vsel %vm958_vm2, %v970_v22, %v972_v29 }
  0x91   : > { %3828 = vmatmul.msk.f32.gmra.mxu0 %vm440_vm1, %v1593_v23  ;;  %v980_v23 = vrot.slane %v4627_v10, 2 }
  0x96   : > { %3679 = vmatmul.msk.f32.gmra.mxu1 %vm440_vm1, %v4437_v42 }
  0x97   : > { %3729 = vmatmul.msk.f32.gmra.mxu2 %vm440_vm1, %v967_v3 }
  0x98   : > { %3779 = vmatmul.msk.f32.gmra.mxu3 %vm440_vm1, %v971_v28 }
  0x99   : > { %3829 = vmatmul.msk.f32.gmra.mxu0 %vm440_vm1, %v1595_v30 }
  0x9b   : > { %v4707_v33 = vpop.f32.mrf.mxu1 }
  0x9e   : > { %3680 = vmatmul.msk.f32.gmra.mxu1 %vm440_vm1, %v4455_v53  ;;  %v4712_v42 = vpop.f32.mrf.mxu0  ;;  %v975_v53 = vsel %vm958_vm2, %v972_v29, %v974_v43 }
  0x9f   : > { %3730 = vmatmul.msk.f32.gmra.mxu2 %vm440_vm1, %v969_v20  ;;  %v1603_v20 = vsel %vm1586_vm3, %v1600_v9, %v1602_v19  ;;  %v984_v9 = vrot.slane %v4369_v7, 2 }
  0xa0   : > { %3780 = vmatmul.msk.f32.gmra.mxu3 %vm440_vm1, %v973_v34 }
  0xa1   : > { %3830 = vmatmul.msk.f32.gmra.mxu0 %vm440_vm1, %v1597_v39 }
  0xa2   : > { %v4719_v45 = vpop.f32.mrf.mxu2 }
  0xa3   : > { %v4721_v47 = vpop.f32.mrf.mxu3  ;;  %v4724_v51 = vpop.f32.mrf.mxu1 }
  0xa4   : > { %5940 = vst [vmem:[#allocation5_spill] sm:$0xff] %v4721_v47 }
  0xa6   : > { %3681 = vmatmul.msk.f32.gmra.mxu1 %vm440_vm1, %v4488_v5  ;;  %v4729_v12 = vpop.f32.mrf.mxu0  ;;  %v977_v5 = vsel %vm958_vm2, %v974_v43, %v976_v16 }
  0xa7   : > { %3731 = vmatmul.msk.f32.gmra.mxu2 %vm440_vm1, %v971_v28  ;;  %v1604_v28 = vrot.slane %v4627_v10, 3 }
  0xa8   : > { %3781 = vmatmul.msk.f32.gmra.mxu3 %vm440_vm1, %v975_v53 }
  0xa9   : > { %3831 = vmatmul.msk.f32.gmra.mxu0 %vm440_vm1, %v1599_v13  ;;  %v1605_v32 = vsel %vm1586_vm3, %v1602_v19, %v1604_v28 }
  0xaa   : > { %v4736_v52 = vpop.f32.mrf.mxu2 }
  0xab   : > { %v4738_v54 = vpop.f32.mrf.mxu3  ;;  %v4741_v55 = vpop.f32.mrf.mxu1 }
  0xac   : > { %5941 = vst [vmem:[#allocation6_spill] sm:$0xff] %v4738_v54 }
  0xae   : > { %3682 = vmatmul.msk.f32.gmra.mxu1 %vm440_vm1, %v4512_v31  ;;  %v4746_v58 = vpop.f32.mrf.mxu0  ;;  %v979_v31 = vsel %vm958_vm2, %v976_v16, %v978_v60  ;;  %v1607_v16 = vsel %vm1586_vm3, %v1604_v28, %v1606_v48 }
  0xaf   : > { %3732 = vmatmul.msk.f32.gmra.mxu2 %vm440_vm1, %v973_v34  ;;  %v982_v34 = vrot.slane %v4366_v6, 2 }
  0xb0   : > { %3782 = vmatmul.msk.f32.gmra.mxu3 %vm440_vm1, %v977_v5 }
  0xb1   : > { %3832 = vmatmul.msk.f32.gmra.mxu0 %vm440_vm1, %v1601_v59 }
  0xb2   : > { %v4753_v2 = vpop.f32.mrf.mxu2 }
  0xb3   : > { %5942 = vst [vmem:[#allocation7_spill] sm:$0xff] %v4753_v2  ;;  %v4755_v3 = vpop.f32.mrf.mxu3  ;;  %v4758_v4 = vpop.f32.mrf.mxu1 }
  0xb4   : > { %5943 = vst [vmem:[#allocation8_spill] sm:$0xff] %v4755_v3 }
  0xb6   : > { %3683 = vmatmul.msk.f32.gmra.mxu1 %vm440_vm1, %v4533_v46  ;;  %v4763_v17 = vpop.f32.mrf.mxu0  ;;  %v981_v46 = vsel %vm958_vm2, %v978_v60, %v980_v23  ;;  %v1608_v60 = vrot.slane %v4369_v7, 3 }
  0xb7   : > { %3733 = vmatmul.msk.f32.gmra.mxu2 %vm440_vm1, %v975_v53 }
  0xb8   : > { %3783 = vmatmul.msk.f32.gmra.mxu3 %vm440_vm1, %v979_v31 }
  0xb9   : > { %3833 = vmatmul.msk.f32.gmra.mxu0 %vm440_vm1, %v1603_v20  ;;  %v1609_v20 = vsel %vm1586_vm3, %v1606_v48, %v1608_v60 }
  0xba   : > { %v4770_v22 = vpop.f32.mrf.mxu2 }
  0xbb   : > { %5944 = vst [vmem:[#allocation9_spill] sm:$0xff] %v4770_v22  ;;  %v4772_v27 = vpop.f32.mrf.mxu3  ;;  %v4775_v30 = vpop.f32.mrf.mxu1 }
  0xbc   : > { %5945 = vst [vmem:[#allocation10_spill] sm:$0xff] %v4772_v27 }
  0xbe   : > { %3684 = vmatmul.msk.f32.gmra.mxu1 %vm440_vm1, %v4554_v61  ;;  %v4780_v29 = vpop.f32.mrf.mxu0  ;;  %v983_v61 = vsel %vm958_vm2, %v980_v23, %v982_v34  ;;  %v986_v23 = vrot.slane %v4387_v18, 2 }
  0xbf   : > { %3734 = vmatmul.msk.f32.gmra.mxu2 %vm440_vm1, %v977_v5 }
  0xc0   : > { %3784 = vmatmul.msk.f32.gmra.mxu3 %vm440_vm1, %v981_v46 }
  0xc1   : > { %3834 = vmatmul.msk.f32.gmra.mxu0 %vm440_vm1, %v1605_v32 }
  0xc2   : > { %v4787_v39 = vpop.f32.mrf.mxu2 }
  0xc3   : > { %5946 = vst [vmem:[#allocation11_spill] sm:$0xff] %v4787_v39  ;;  %v4789_v43 = vpop.f32.mrf.mxu3  ;;  %v4792_v53 = vpop.f32.mrf.mxu1 }
  0xc4   : > { %5947 = vst [vmem:[#allocation12_spill] sm:$0xff] %v4789_v43 }
  0xc6   : > { %3685 = vmatmul.msk.f32.gmra.mxu1 %vm440_vm1, %v4575_v24  ;;  %v4797_v13 = vpop.f32.mrf.mxu0  ;;  %v985_v24 = vsel %vm958_vm2, %v982_v34, %v984_v9  ;;  %v1610_v34 = vrot.slane %v4387_v18, 3 }
  0xc7   : > { %3735 = vmatmul.msk.f32.gmra.mxu2 %vm440_vm1, %v979_v31 }
  0xc8   : > { %3785 = vmatmul.msk.f32.gmra.mxu3 %vm440_vm1, %v983_v61  ;;  %v1611_v48 = vsel %vm1586_vm3, %v1608_v60, %v1610_v34 }
  0xc9   : > { %3835 = vmatmul.msk.f32.gmra.mxu0 %vm440_vm1, %v1607_v16 }
  0xca   : > { %v4804_v5 = vpop.f32.mrf.mxu2 }
  0xcb   : > { %5948 = vst [vmem:[#allocation13_spill] sm:$0xff] %v4804_v5  ;;  %v4806_v59 = vpop.f32.mrf.mxu3  ;;  %v4809_v19 = vpop.f32.mrf.mxu1 }
  0xcc   : > { %5949 = vst [vmem:[#allocation14_spill] sm:$0xff] %v4806_v59 }
  0xce   : > { %3686 = vmatmul.msk.f32.gmra.mxu1 %vm440_vm1, %v4594_v44  ;;  %v4814_v31 = vpop.f32.mrf.mxu0  ;;  %v987_v44 = vsel %vm958_vm2, %v984_v9, %v986_v23  ;;  %v1612_v9 = vrot.slane %v4425_v37, 3 }
  0xcf   : > { %3736 = vmatmul.msk.f32.gmra.mxu2 %vm440_vm1, %v981_v46 }
  0xd0   : > { %3786 = vmatmul.msk.f32.gmra.mxu3 %vm440_vm1, %v985_v24  ;;  %v1613_v60 = vsel %vm1586_vm3, %v1610_v34, %v1612_v9 }
  0xd1   : > { %3836 = vmatmul.msk.f32.gmra.mxu0 %vm440_vm1, %v1609_v20  ;;  %v988_v20 = vrot.slane %v4425_v37, 2 }
  0xd2   : > { %v4821_v28 = vpop.f32.mrf.mxu2 }
  0xd3   : > { %5950 = vst [vmem:[#allocation15_spill] sm:$0xff] %v4821_v28  ;;  %v4823_v32 = vpop.f32.mrf.mxu3  ;;  %v4826_v16 = vpop.f32.mrf.mxu1 }
  0xd4   : > { %5951 = vst [vmem:[#allocation16_spill] sm:$0xff] %v4823_v32 }
  0xd6   : > { %3687 = vmatmul.msk.f32.gmra.mxu1 %vm440_vm1, %v4627_v10  ;;  %v4831_v46 = vpop.f32.mrf.mxu0  ;;  %v989_v10 = vsel %vm958_vm2, %v986_v23, %v988_v20  ;;  %v1614_v23 = vrot.slane %v4446_v49, 3 }
  0xd7   : > { %3737 = vmatmul.msk.f32.gmra.mxu2 %vm440_vm1, %v983_v61 }
  0xd8   : > { %3787 = vmatmul.msk.f32.gmra.mxu3 %vm440_vm1, %v987_v44  ;;  %v1615_v34 = vsel %vm1586_vm3, %v1612_v9, %v1614_v23 }
  0xd9   : > { %3837 = vmatmul.msk.f32.gmra.mxu0 %vm440_vm1, %v1611_v48  ;;  %v990_v48 = vrot.slane %v4446_v49, 2 }
  0xda   : > { %v4838_v32 = vpop.f32.mrf.mxu2 }
  0xdb   : > { %5952 = vst [vmem:[#allocation17_spill] sm:$0xff] %v4838_v32  ;;  %v4840_v59 = vpop.f32.mrf.mxu3  ;;  %v4843_v43 = vpop.f32.mrf.mxu1 }
  0xdc   : > { %5953 = vst [vmem:[#allocation18_spill] sm:$0xff] %v4840_v59 }
  0xde   : > { %3688 = vmatmul.msk.f32.gmra.mxu1 %vm440_vm1, %v4366_v6  ;;  %v4848_v61 = vpop.f32.mrf.mxu0  ;;  %v991_v6 = vsel %vm958_vm2, %v988_v20, %v990_v48  ;;  %v1616_v20 = vrot.slane %v4476_v0, 3 }
  0xdf   : > { %3738 = vmatmul.msk.f32.gmra.mxu2 %vm440_vm1, %v985_v24 }
  0xe0   : > { %3788 = vmatmul.msk.f32.gmra.mxu3 %vm440_vm1, %v989_v10  ;;  %v1617_v9 = vsel %vm1586_vm3, %v1614_v23, %v1616_v20 }
  0xe1   : > { %3838 = vmatmul.msk.f32.gmra.mxu0 %vm440_vm1, %v1613_v60  ;;  %v992_v60 = vrot.slane %v4476_v0, 2 }
  0xe2   : > { %v4855_v59 = vpop.f32.mrf.mxu2 }
  0xe3   : > { %5954 = vst [vmem:[#allocation19_spill] sm:$0xff] %v4855_v59  ;;  %v4857_v27 = vpop.f32.mrf.mxu3  ;;  %v4860_v3 = vpop.f32.mrf.mxu1 }
  0xe4   : > { %5955 = vst [vmem:[#allocation20_spill] sm:$0xff] %v4857_v27 }
  0xe6   : > { %3689 = vmatmul.msk.f32.gmra.mxu1 %vm440_vm1, %v4369_v7  ;;  %v4865_v24 = vpop.f32.mrf.mxu0  ;;  %v993_v7 = vsel %vm958_vm2, %v990_v48, %v992_v60  ;;  %v1618_v48 = vrot.slane %v4500_v25, 3 }
  0xe7   : > { %3739 = vmatmul.msk.f32.gmra.mxu2 %vm440_vm1, %v987_v44 }
  0xe8   : > { %3789 = vmatmul.msk.f32.gmra.mxu3 %vm440_vm1, %v991_v6  ;;  %v1619_v23 = vsel %vm1586_vm3, %v1616_v20, %v1618_v48 }
  0xe9   : > { %3839 = vmatmul.msk.f32.gmra.mxu0 %vm440_vm1, %v1615_v34  ;;  %v994_v34 = vrot.slane %v4500_v25, 2 }
  0xea   : > { %v4872_v27 = vpop.f32.mrf.mxu2 }
  0xeb   : > { %5956 = vst [vmem:[#allocation21_spill] sm:$0xff] %v4872_v27  ;;  %v4874_v54 = vpop.f32.mrf.mxu3  ;;  %v4877_v47 = vpop.f32.mrf.mxu1 }
  0xec   : > { %5957 = vst [vmem:[#allocation22_spill] sm:$0xff] %v4874_v54 }
  0xee   : > { %3690 = vmatmul.msk.f32.gmra.mxu1 %vm440_vm1, %v4387_v18  ;;  %v4882_v44 = vpop.f32.mrf.mxu0  ;;  %v995_v18 = vsel %vm958_vm2, %v992_v60, %v994_v34  ;;  %v1620_v60 = vrot.slane %v4521_v40, 3 }
  0xef   : > { %3740 = vmatmul.msk.f32.gmra.mxu2 %vm440_vm1, %v989_v10 }
  0xf0   : > { %3790 = vmatmul.msk.f32.gmra.mxu3 %vm440_vm1, %v993_v7 }
  0xf1   : > { %3840 = vmatmul.msk.f32.gmra.mxu0 %vm440_vm1, %v1617_v9  ;;  %v996_v9 = vrot.slane %v4521_v40, 2 }
  0xf2   : > { %v4889_v54 = vpop.f32.mrf.mxu2 }
  0xf3   : > { %5958 = vst [vmem:[#allocation23_spill] sm:$0xff] %v4889_v54  ;;  %v4891_v27 = vpop.f32.mrf.mxu3  ;;  %v4894_v59 = vpop.f32.mrf.mxu1 }
  0xf4   : > { %5959 = vst [vmem:[#allocation24_spill] sm:$0xff] %v4891_v27 }
  0xf6   : > { %3691 = vmatmul.msk.f32.gmra.mxu1 %vm440_vm1, %v4425_v37  ;;  %v4899_v10 = vpop.f32.mrf.mxu0  ;;  %v997_v37 = vsel %vm958_vm2, %v994_v34, %v996_v9  ;;  %v1622_v34 = vrot.slane %v4542_v56, 3 }
  0xf7   : > { %3741 = vmatmul.msk.f32.gmra.mxu2 %vm440_vm1, %v991_v6  ;;  %v1621_v6 = vsel %vm1586_vm3, %v1618_v48, %v1620_v60 }
  0xf8   : > { %3791 = vmatmul.msk.f32.gmra.mxu3 %vm440_vm1, %v995_v18  ;;  %v1623_v48 = vsel %vm1586_vm3, %v1620_v60, %v1622_v34 }
  0xf9   : > { %3841 = vmatmul.msk.f32.gmra.mxu0 %vm440_vm1, %v1619_v23  ;;  %v998_v23 = vrot.slane %v4542_v56, 2 }
  0xfa   : > { %v4906_v27 = vpop.f32.mrf.mxu2 }
  0xfb   : > { %5960 = vst [vmem:[#allocation25_spill] sm:$0xff] %v4906_v27  ;;  %v4908_v54 = vpop.f32.mrf.mxu3  ;;  %v811_v32 = vpop.f32.mrf.mxu1 }
  0xfc   : > { %5961 = vst [vmem:[#allocation26_spill] sm:$0xff] %v4908_v54  ;;  %v812_v27 = vadd.f32 %v811_v32, %v4712_v42  ;;  %v1000_v42 = vrot.slane %v4563_v14, 2 }
  0xfe   : > { %3692 = vmatmul.msk.f32.gmra.mxu1 %vm440_vm1, %v4446_v49  ;;  %v1797_v20 = vpop.f32.mrf.mxu0  ;;  %v999_v49 = vsel %vm958_vm2, %v996_v9, %v998_v23  ;;  %v1001_v9 = vsel %vm958_vm2, %v998_v23, %v1000_v42 }
  0xff   : > { %3742 = vmatmul.msk.f32.gmra.mxu2 %vm440_vm1, %v993_v7 }
 0x100   : > { %3792 = vmatmul.msk.f32.gmra.mxu3 %vm440_vm1, %v997_v37 }
 0x101   : > { %3842 = vmatmul.msk.f32.gmra.mxu0 %vm440_vm1, %v1621_v6 }
 0x102   : > { %v1169_v54 = vpop.f32.mrf.mxu2 }
 0x103   : > { %v1391_v28 = vpop.f32.mrf.mxu3  ;;  %v1313_v5 = vadd.f32 %v1169_v54, %v812_v27  ;;  %v814_v39 = vpop.f32.mrf.mxu1 }
 0x104   : > { %v815_v54 = vadd.f32 %v814_v39, %v4729_v12  ;;  %v1002_v12 = vrot.slane %v4585_v35, 2 }
 0x105   : > { %v1535_v22 = vadd.f32 %v1391_v28, %v1313_v5  ;;  %v1624_v28 = vrot.slane %v4563_v14, 3 }
 0x106   : > { %3693 = vmatmul.msk.f32.gmra.mxu1 %vm440_vm1, %v4476_v0  ;;  %v1800_v7 = vpop.f32.mrf.mxu0 }
 0x107   : > { %v4925_v2 = vadd.f32 %v1797_v20, %v1535_v22  ;;  %3743 = vmatmul.msk.f32.gmra.mxu2 %vm440_vm1, %v995_v18  ;;  %v1625_v60 = vsel %vm1586_vm3, %v1622_v34, %v1624_v28  ;;  %v1003_v34 = vsel %vm958_vm2, %v1000_v42, %v1002_v12 }
 0x108   : > { %3793 = vmatmul.msk.f32.gmra.mxu3 %vm440_vm1, %v999_v49 }
 0x109   : > { %3843 = vmatmul.msk.f32.gmra.mxu0 %vm440_vm1, %v1623_v48  ;;  %v1626_v48 = vrot.slane %v4585_v35, 3 }
 0x10a   : > { %v1172_v27 = vpop.f32.mrf.mxu2 }
 0x10b   : > { %v1394_v5 = vpop.f32.mrf.mxu3  ;;  %v1314_v0 = vadd.f32 %v1172_v27, %v815_v54  ;;  %v817_v32 = vpop.f32.mrf.mxu1  ;;  %v1627_v27 = vsel %vm1586_vm3, %v1624_v28, %v1626_v48 }
 0x10c   : > { %v818_v39 = vadd.f32 %v817_v32, %v4746_v58  ;;  %v1004_v58 = vrot.slane %v4615_v62, 2 }
 0x10d   : > { %v1536_v22 = vadd.f32 %v1394_v5, %v1314_v0 }
 0x10e   : > { %3694 = vmatmul.msk.f32.gmra.mxu1 %vm440_vm1, %v4500_v25  ;;  %v1803_v18 = vpop.f32.mrf.mxu0  ;;  %v1005_v28 = vsel %vm958_vm2, %v1002_v12, %v1004_v58  ;;  %v3974_v12 = vld [vmem:[%s5935_s2 + $0x70] sm:$0xff] }
 0x10f   : > { %v4937_v20 = vadd.f32 %v1800_v7, %v1536_v22  ;;  %3744 = vmatmul.msk.f32.gmra.mxu2 %vm440_vm1, %v997_v37  ;;  %v1628_v22 = vrot.slane %v4615_v62, 3  ;;  %2829 = vmatpush.msra.mxu3 %v3974_v12 }
 0x110   : > { %3794 = vmatmul.msk.f32.gmra.mxu3 %vm440_vm1, %v1001_v9 }
 0x111   : > { %3844 = vmatmul.msk.f32.gmra.mxu0 %vm440_vm1, %v1625_v60 }
 0x112   : > { %v1175_v6 = vpop.f32.mrf.mxu2 }
 0x113   : > { %v1397_v23 = vpop.f32.mrf.mxu3  ;;  %v1315_v25 = vadd.f32 %v1175_v6, %v818_v39  ;;  %v820_v54 = vpop.f32.mrf.mxu1  ;;  %v1629_v39 = vsel %vm1586_vm3, %v1626_v48, %v1628_v22 }
 0x114   : > { %v821_v0 = vadd.f32 %v820_v54, %v4763_v17  ;;  %v3924_v17 = vld [vmem:[%s5935_s2 + $0x60] sm:$0xff] }
 0x115   : > { %v1537_v7 = vadd.f32 %v1397_v23, %v1315_v25  ;;  %v1006_v23 = vrot.slane %v4372_v8, 2  ;;  %2423 = vmatpush.msra.mxu2 %v3924_v17  ;;  %v1630_v25 = vrot.slane %v4372_v8, 3  ;;  %v4024_v8 = vld [vmem:[%s5935_s2 + $0x80] sm:$0xff] }
 0x116   : > { %3695 = vmatmul.msk.f32.gmra.mxu1 %vm440_vm1, %v4521_v40  ;;  %v1806_v37 = vpop.f32.mrf.mxu0  ;;  %3235 = vmatpush.msra.mxu0 %v4024_v8 }
 0x117   : > { %v4949_v5 = vadd.f32 %v1803_v18, %v1537_v7  ;;  %3745 = vmatmul.msk.f32.gmra.mxu2 %vm440_vm1, %v999_v49 }
 0x118   : > { %3795 = vmatmul.msk.f32.gmra.mxu3 %vm440_vm1, %v1003_v34 }
 0x119   : > { %3845 = vmatmul.msk.f32.gmra.mxu0 %vm440_vm1, %v1627_v27  ;;  %v1007_v27 = vsel %vm958_vm2, %v1004_v58, %v1006_v23  ;;  %v1008_v58 = vrot.slane %v4377_v11, 2 }
 0x11a   : > { %v1178_v42 = vpop.f32.mrf.mxu2 }
 0x11b   : > { %v1400_v32 = vpop.f32.mrf.mxu3  ;;  %v1316_v40 = vadd.f32 %v1178_v42, %v821_v0  ;;  %v823_v60 = vpop.f32.mrf.mxu1  ;;  %v1631_v42 = vsel %vm1586_vm3, %v1628_v22, %v1630_v25  ;;  %v1632_v22 = vrot.slane %v4377_v11, 3 }
 0x11d   : > { %v1538_v18 = vadd.f32 %v1400_v32, %v1316_v40  ;;  %v1633_v12 = vsel %vm1586_vm3, %v1630_v25, %v1632_v22 }
 0x11e   : > { %3696 = vmatmul.msk.f32.gmra.mxu1 %vm440_vm1, %v4542_v56  ;;  %v1809_v49 = vpop.f32.mrf.mxu0  ;;  %v824_v56 = vadd.f32 %v823_v60, %v4780_v29 }
 0x11f   : > { %v4961_v6 = vadd.f32 %v1806_v37, %v1538_v18  ;;  %3746 = vmatmul.msk.f32.gmra.mxu2 %vm440_vm1, %v1001_v9  ;;  %v3874_v37 = vld [vmem:[%s5935_s2 + $0x50] sm:$0xff] }
 0x120   : > { %3796 = vmatmul.msk.f32.gmra.mxu3 %vm440_vm1, %v1005_v28  ;;  %2201 = vmatpush.msra.mxu1 %v3874_v37 }
 0x121   : > { %3846 = vmatmul.msk.f32.gmra.mxu0 %vm440_vm1, %v1629_v39 }
 0x122   : > { %v1181_v48 = vpop.f32.mrf.mxu2 }
 0x123   : > { %v1403_v9 = vpop.f32.mrf.mxu3  ;;  %v1317_v54 = vadd.f32 %v1181_v48, %v824_v56  ;;  %v826_v7 = vpop.f32.mrf.mxu1 }
 0x124   : > { %v827_v40 = vadd.f32 %v826_v7, %v4797_v13  ;;  %v1010_v13 = vrot.slane %v4396_v21, 2 }
 0x125   : > { %v1539_v0 = vadd.f32 %v1403_v9, %v1317_v54  ;;  %v1634_v9 = vrot.slane %v4396_v21, 3  ;;  %v1012_v21 = vrot.slane %v4428_v38, 2 }
 0x126   : > { %3697 = vmatmul.msk.f32.gmra.mxu1 %vm440_vm1, %v4563_v14  ;;  %v1812_v29 = vpop.f32.mrf.mxu0  ;;  %v1011_v25 = vsel %vm958_vm2, %v1008_v58, %v1010_v13 }
 0x127   : > { %v4982_v32 = vadd.f32 %v1809_v49, %v1539_v0  ;;  %3747 = vmatmul.msk.f32.gmra.mxu2 %vm440_vm1, %v1003_v34  ;;  %v1009_v34 = vsel %vm958_vm2, %v1006_v23, %v1008_v58  ;;  %v1635_v37 = vsel %vm1586_vm3, %v1632_v22, %v1634_v9 }
 0x128   : > { %3797 = vmatmul.msk.f32.gmra.mxu3 %vm440_vm1, %v1007_v27 }
 0x129   : > { %3847 = vmatmul.msk.f32.gmra.mxu0 %vm440_vm1, %v1631_v42 }
 0x12a   : > { %v1184_v14 = vpop.f32.mrf.mxu2 }
 0x12b   : > { %v1406_v60 = vpop.f32.mrf.mxu3  ;;  %v1318_v18 = vadd.f32 %v1184_v14, %v827_v40  ;;  %v829_v49 = vpop.f32.mrf.mxu1  ;;  %v1013_v40 = vsel %vm958_vm2, %v1010_v13, %v1012_v21 }
 0x12c   : > { %v830_v11 = vadd.f32 %v829_v49, %v4814_v31 }
 0x12d   : > { %v1540_v39 = vadd.f32 %v1406_v60, %v1318_v18  ;;  %v4127_v60 = vld [vmem:[%s4363_s23 + $0xc0] sm:$0xff] }
 0x12e   : > { %3698 = vmatmul.msk.f32.gmra.mxu1 %vm440_vm1, %v4585_v35  ;;  %v1815_v17 = vpop.f32.mrf.mxu0 }
 0x12f   : > { %v4997_v56 = vadd.f32 %v1812_v29, %v1540_v39  ;;  %3748 = vmatmul.msk.f32.gmra.mxu2 %vm440_vm1, %v1005_v28 }
 0x130   : > { %3798 = vmatmul.msk.f32.gmra.mxu3 %vm440_vm1, %v1009_v34 }
 0x131   : > { %3848 = vmatmul.msk.f32.gmra.mxu0 %vm440_vm1, %v1633_v12 }
 0x132   : > { %v1187_v23 = vpop.f32.mrf.mxu2 }
 0x133   : > { %v1409_v48 = vpop.f32.mrf.mxu3  ;;  %v1319_v35 = vadd.f32 %v1187_v23, %v830_v11  ;;  %v832_v54 = vpop.f32.mrf.mxu1 }
 0x134   : > { %v833_v31 = vadd.f32 %v832_v54, %v4831_v46 }
 0x135   : > { %v1541_v7 = vadd.f32 %v1409_v48, %v1319_v35  ;;  %v4128_v48 = vld [vmem:[%s4363_s23 + $0xc8] sm:$0xff] }
 0x136   : > { %3699 = vmatmul.msk.f32.gmra.mxu1 %vm440_vm1, %v4615_v62  ;;  %v1818_v28 = vpop.f32.mrf.mxu0  ;;  %v1636_v62 = vrot.slane %v4428_v38, 3  ;;  %v1014_v38 = vrot.slane %v4449_v50, 2 }
 0x137   : > { %v5009_v0 = vadd.f32 %v1815_v17, %v1541_v7  ;;  %3749 = vmatmul.msk.f32.gmra.mxu2 %vm440_vm1, %v1007_v27  ;;  %v1638_v17 = vrot.slane %v4449_v50, 3  ;;  %v1016_v50 = vrot.slane %v4479_v1, 2 }
 0x138   : > { %3799 = vmatmul.msk.f32.gmra.mxu3 %vm440_vm1, %v1011_v25  ;;  %v1637_v22 = vsel %vm1586_vm3, %v1634_v9, %v1636_v62  ;;  %v1015_v11 = vsel %vm958_vm2, %v1012_v21, %v1014_v38 }
 0x139   : > { %3849 = vmatmul.msk.f32.gmra.mxu0 %vm440_vm1, %v1635_v37  ;;  %v1639_v9 = vsel %vm1586_vm3, %v1636_v62, %v1638_v17 }
 0x13a   : > { %v1190_v29 = vpop.f32.mrf.mxu2 }
 0x13b   : > { %v1412_v42 = vpop.f32.mrf.mxu3  ;;  %v1320_v8 = vadd.f32 %v1190_v29, %v833_v31  ;;  %v835_v58 = vpop.f32.mrf.mxu1  ;;  %v1017_v31 = vsel %vm958_vm2, %v1014_v38, %v1016_v50 }
 0x13c   : > { %v836_v46 = vadd.f32 %v835_v58, %v4848_v61 }
 0x13d   : > { %v1542_v14 = vadd.f32 %v1412_v42, %v1320_v8  ;;  %v4129_v42 = vld [vmem:[%s4363_s23 + $0xd0] sm:$0xff] }
 0x13e   : > { %3700 = vmatmul.msk.f32.gmra.mxu1 %vm440_vm1, %v4127_v60  ;;  %v1821_v27 = vpop.f32.mrf.mxu0  ;;  %v1642_v60 = vrot.slane %v4503_v26, 3 }
 0x13f   : > { %v5021_v18 = vadd.f32 %v1818_v28, %v1542_v14  ;;  %3750 = vmatmul.msk.f32.gmra.mxu2 %vm440_vm1, %v1009_v34  ;;  %v1640_v28 = vrot.slane %v4479_v1, 3  ;;  %v1018_v1 = vrot.slane %v4503_v26, 2  ;;  %v1020_v26 = vrot.slane %v4524_v41, 2 }
 0x140   : > { %3800 = vmatmul.msk.f32.gmra.mxu3 %vm440_vm1, %v1013_v40 }
 0x141   : > { %3850 = vmatmul.msk.f32.gmra.mxu0 %vm440_vm1, %v1637_v22  ;;  %v1641_v62 = vsel %vm1586_vm3, %v1638_v17, %v1640_v28  ;;  %v1019_v38 = vsel %vm958_vm2, %v1016_v50, %v1018_v1 }
 0x142   : > { %v1193_v49 = vpop.f32.mrf.mxu2 }
 0x143   : > { %v1415_v39 = vpop.f32.mrf.mxu3  ;;  %v1321_v12 = vadd.f32 %v1193_v49, %v836_v46  ;;  %v838_v13 = vpop.f32.mrf.mxu1  ;;  %v4130_v49 = vld [vmem:[%s4363_s23 + $0xd8] sm:$0xff] }
 0x144   : > { %v839_v61 = vadd.f32 %v838_v13, %v4865_v24 }
 0x145   : > { %v1543_v23 = vadd.f32 %v1415_v39, %v1321_v12  ;;  %v1643_v39 = vsel %vm1586_vm3, %v1640_v28, %v1642_v60 }
 0x146   : > { %3701 = vmatmul.msk.f32.gmra.mxu1 %vm440_vm1, %v4128_v48  ;;  %v1824_v34 = vpop.f32.mrf.mxu0 }
 0x147   : > { %v5033_v35 = vadd.f32 %v1821_v27, %v1543_v23  ;;  %3751 = vmatmul.msk.f32.gmra.mxu2 %vm440_vm1, %v1011_v25  ;;  %v1644_v23 = vrot.slane %v4524_v41, 3  ;;  %v1022_v41 = vrot.slane %v4545_v57, 2 }
 0x148   : > { %3801 = vmatmul.msk.f32.gmra.mxu3 %vm440_vm1, %v1015_v11 }
 0x149   : > { %3851 = vmatmul.msk.f32.gmra.mxu0 %vm440_vm1, %v1639_v9  ;;  %v1021_v9 = vsel %vm958_vm2, %v1018_v1, %v1020_v26  ;;  %v4132_v1 = vld [vmem:[%s4363_s23 + $0xe8] sm:$0xff] }
 0x14a   : > { %v1196_v54 = vpop.f32.mrf.mxu2 }
 0x14b   : > { %v1418_v7 = vpop.f32.mrf.mxu3  ;;  %v1322_v37 = vadd.f32 %v1196_v54, %v839_v61  ;;  %v841_v21 = vpop.f32.mrf.mxu1  ;;  %v4131_v61 = vld [vmem:[%s4363_s23 + $0xe0] sm:$0xff]  ;;  %v1645_v54 = vsel %vm1586_vm3, %v1642_v60, %v1644_v23 }
 0x14c   : > { %v842_v24 = vadd.f32 %v841_v21, %v4882_v44  ;;  %v1646_v21 = vrot.slane %v4545_v57, 3  ;;  %v1024_v57 = vrot.slane %v4566_v15, 2 }
 0x14d   : > { %v1544_v29 = vadd.f32 %v1418_v7, %v1322_v37 }
 0x14e   : > { %3702 = vmatmul.msk.f32.gmra.mxu1 %vm440_vm1, %v4129_v42  ;;  %v1827_v25 = vpop.f32.mrf.mxu0 }
 0x14f   : > { %v5045_v8 = vadd.f32 %v1824_v34, %v1544_v29  ;;  %3752 = vmatmul.msk.f32.gmra.mxu2 %vm440_vm1, %v1013_v40 }
 0x150   : > { %3802 = vmatmul.msk.f32.gmra.mxu3 %vm440_vm1, %v1017_v31 }
 0x151   : > { %3852 = vmatmul.msk.f32.gmra.mxu0 %vm440_vm1, %v1641_v62 }
 0x152   : > { %v1199_v58 = vpop.f32.mrf.mxu2 }
 0x153   : > { %v1421_v14 = vpop.f32.mrf.mxu3  ;;  %v1323_v27 = vadd.f32 %v1199_v58, %v842_v24  ;;  %v844_v22 = vpop.f32.mrf.mxu1  ;;  %v1647_v24 = vsel %vm1586_vm3, %v1644_v23, %v1646_v21  ;;  %v1650_v23 = vrot.slane %v4588_v36, 3 }
 0x154   : > { %v845_v44 = vadd.f32 %v844_v22, %v4899_v10 }
 0x155   : > { %v1545_v46 = vadd.f32 %v1421_v14, %v1323_v27  ;;  %v1648_v27 = vrot.slane %v4566_v15, 3  ;;  %v1026_v15 = vrot.slane %v4588_v36, 2  ;;  %v1028_v36 = vrot.slane %v4618_v63, 2 }
 0x156   : > { %3703 = vmatmul.msk.f32.gmra.mxu1 %vm440_vm1, %v4130_v49  ;;  %v1830_v40 = vpop.f32.mrf.mxu0  ;;  %v1025_v49 = vsel %vm958_vm2, %v1022_v41, %v1024_v57 }
 0x157   : > { %v5057_v17 = vadd.f32 %v1827_v25, %v1545_v46  ;;  %3753 = vmatmul.msk.f32.gmra.mxu2 %vm440_vm1, %v1015_v11  ;;  %v1023_v25 = vsel %vm958_vm2, %v1020_v26, %v1022_v41  ;;  %v1649_v26 = vsel %vm1586_vm3, %v1646_v21, %v1648_v27 }
 0x158   : > { %3803 = vmatmul.msk.f32.gmra.mxu3 %vm440_vm1, %v1019_v38 }
 0x159   : > { %3853 = vmatmul.msk.f32.gmra.mxu0 %vm440_vm1, %v1643_v39  ;;  %v4133_v39 = vld [vmem:[%s4363_s23 + $0xf0] sm:$0xff] }
 0x15a   : > { %v1202_v12 = vpop.f32.mrf.mxu2 }
 0x15b   : > { %v1424_v13 = vpop.f32.mrf.mxu3  ;;  %v1324_v48 = vadd.f32 %v1202_v12, %v845_v44  ;;  %v847_v34 = vpop.f32.mrf.mxu1 }
 0x15c   : > { %v848_v10 = vadd.f32 %v847_v34, %v4707_v33 }
 0x15d   : > { %v1546_v50 = vadd.f32 %v1424_v13, %v1324_v48 }
 0x15e   : > { %3704 = vmatmul.msk.f32.gmra.mxu1 %vm440_vm1, %v4131_v61  ;;  %v1833_v11 = vpop.f32.mrf.mxu0 }
 0x15f   : > { %v5069_v7 = vadd.f32 %v1830_v40, %v1546_v50  ;;  %3754 = vmatmul.msk.f32.gmra.mxu2 %vm440_vm1, %v1017_v31  ;;  %v1027_v50 = vsel %vm958_vm2, %v1024_v57, %v1026_v15 }
 0x160   : > { %3804 = vmatmul.msk.f32.gmra.mxu3 %vm440_vm1, %v1021_v9 }
 0x161   : > { %3854 = vmatmul.msk.f32.gmra.mxu0 %vm440_vm1, %v1645_v54  ;;  %v1651_v54 = vsel %vm1586_vm3, %v1648_v27, %v1650_v23 }
 0x162   : > { %v1205_v28 = vpop.f32.mrf.mxu2 }
 0x163   : > { %v1427_v37 = vpop.f32.mrf.mxu3  ;;  %v1325_v29 = vadd.f32 %v1205_v28, %v848_v10  ;;  %v850_v42 = vpop.f32.mrf.mxu1 }
 0x164   : > { %v851_v33 = vadd.f32 %v850_v42, %v4724_v51  ;;  %v1029_v42 = vsel %vm958_vm2, %v1026_v15, %v1028_v36 }
 0x165   : > { %v1547_v62 = vadd.f32 %v1427_v37, %v1325_v29  ;;  %v1652_v37 = vrot.slane %v4618_v63, 3 }
 0x166   : > { %3705 = vmatmul.msk.f32.gmra.mxu1 %vm440_vm1, %v4132_v1  ;;  %v1836_v31 = vpop.f32.mrf.mxu0  ;;  %v4135_v1 = vld [vmem:[%s4363_s23 + $0x100] sm:$0xff] }
 0x167   : > { %v5081_v58 = vadd.f32 %v1833_v11, %v1547_v62  ;;  %3755 = vmatmul.msk.f32.gmra.mxu2 %vm440_vm1, %v1019_v38  ;;  %v4134_v11 = vld [vmem:[%s4363_s23 + $0xf8] sm:$0xff] }
 0x168   : > { %3805 = vmatmul.msk.f32.gmra.mxu3 %vm440_vm1, %v1023_v25 }
 0x169   : > { %3855 = vmatmul.msk.f32.gmra.mxu0 %vm440_vm1, %v1647_v24  ;;  %v5122_v24 = vld [vmem:[%s4363_s23 + $0x120] sm:$0xff] }
 0x16a   : > { %v1208_v14 = vpop.f32.mrf.mxu2  ;;  %v1030_v63 = vrot.slane %v5122_v24, 2 }
 0x16b   : > { %v1430_v60 = vpop.f32.mrf.mxu3  ;;  %v1326_v22 = vadd.f32 %v1208_v14, %v851_v33  ;;  %v853_v46 = vpop.f32.mrf.mxu1 }
 0x16c   : > { %v854_v51 = vadd.f32 %v853_v46, %v4741_v55  ;;  %v1031_v46 = vsel %vm958_vm2, %v1028_v36, %v1030_v63  ;;  %v5152_v36 = vld [vmem:[%s4363_s23 + $0x130] sm:$0xff] }
 0x16d   : > { %v1548_v40 = vadd.f32 %v1430_v60, %v1326_v22  ;;  %v1654_v60 = vrot.slane %v5122_v24, 3 }
 0x16e   : > { %3706 = vmatmul.msk.f32.gmra.mxu1 %vm440_vm1, %v4133_v39  ;;  %v1839_v38 = vpop.f32.mrf.mxu0 }
 0x16f   : > { %v5093_v44 = vadd.f32 %v1836_v31, %v1548_v40  ;;  %3756 = vmatmul.msk.f32.gmra.mxu2 %vm440_vm1, %v1021_v9  ;;  %v1653_v31 = vsel %vm1586_vm3, %v1650_v23, %v1652_v37  ;;  %v4137_v40 = vld [vmem:[%s4363_s23 + $0x108] sm:$0xff] }
 0x170   : > { %3806 = vmatmul.msk.f32.gmra.mxu3 %vm440_vm1, %v1025_v49 }
 0x171   : > { %3856 = vmatmul.msk.f32.gmra.mxu0 %vm440_vm1, %v1649_v26  ;;  %v5137_v26 = vld [vmem:[%s4363_s23 + $0x128] sm:$0xff] }
 0x172   : > { %v1211_v12 = vpop.f32.mrf.mxu2  ;;  %v1032_v15 = vrot.slane %v5137_v26, 2  ;;  %v1656_v23 = vrot.slane %v5137_v26, 3 }
 0x173   : > { %v1433_v13 = vpop.f32.mrf.mxu3  ;;  %v1327_v48 = vadd.f32 %v1211_v12, %v854_v51  ;;  %v856_v34 = vpop.f32.mrf.mxu1 }
 0x174   : > { %v857_v55 = vadd.f32 %v856_v34, %v4758_v4 }
 0x175   : > { %v1549_v61 = vadd.f32 %v1433_v13, %v1327_v48 }
 0x176   : > { %3707 = vmatmul.msk.f32.gmra.mxu1 %vm440_vm1, %v4134_v11  ;;  %v1842_v9 = vpop.f32.mrf.mxu0  ;;  %v4139_v11 = vld [vmem:[%s4363_s23 + $0x110] sm:$0xff] }
 0x177   : > { %v5105_v41 = vadd.f32 %v1839_v38, %v1549_v61  ;;  %3757 = vmatmul.msk.f32.gmra.mxu2 %vm440_vm1, %v1023_v25  ;;  %v1655_v38 = vsel %vm1586_vm3, %v1652_v37, %v1654_v60  ;;  %v1033_v61 = vsel %vm958_vm2, %v1030_v63, %v1032_v15 }
 0x178   : > { %3807 = vmatmul.msk.f32.gmra.mxu3 %vm440_vm1, %v1027_v50 }
 0x179   : > { %3857 = vmatmul.msk.f32.gmra.mxu0 %vm440_vm1, %v1651_v54  ;;  %v1657_v54 = vsel %vm1586_vm3, %v1654_v60, %v1656_v23 }
 0x17a   : > { %v1214_v10 = vpop.f32.mrf.mxu2 }
 0x17b   : > { %v1436_v28 = vpop.f32.mrf.mxu3  ;;  %v1328_v21 = vadd.f32 %v1214_v10, %v857_v55  ;;  %v859_v29 = vpop.f32.mrf.mxu1  ;;  %v1034_v55 = vrot.slane %v5152_v36, 2 }
 0x17c   : > { %v860_v57 = vadd.f32 %v859_v29, %v4775_v30 }
 0x17d   : > { %v1550_v62 = vadd.f32 %v1436_v28, %v1328_v21  ;;  %v1658_v21 = vrot.slane %v5152_v36, 3 }
 0x17e   : > { %3708 = vmatmul.msk.f32.gmra.mxu1 %vm440_vm1, %v4135_v1  ;;  %v1845_v25 = vpop.f32.mrf.mxu0  ;;  %v1035_v1 = vsel %vm958_vm2, %v1032_v15, %v1034_v55 }
 0x17f   : > { %v5117_v4 = vadd.f32 %v1842_v9, %v1550_v62  ;;  %3758 = vmatmul.msk.f32.gmra.mxu2 %vm440_vm1, %v1025_v49  ;;  %v1659_v63 = vsel %vm1586_vm3, %v1656_v23, %v1658_v21 }
 0x180   : > { %3808 = vmatmul.msk.f32.gmra.mxu3 %vm440_vm1, %v1029_v42 }
 0x181   : > { %3858 = vmatmul.msk.f32.gmra.mxu0 %vm440_vm1, %v1653_v31 }
 0x182   : > { %v1217_v33 = vpop.f32.mrf.mxu2 }
 0x183   : > { %v1439_v14 = vpop.f32.mrf.mxu3  ;;  %v1329_v27 = vadd.f32 %v1217_v33, %v860_v57  ;;  %v862_v22 = vpop.f32.mrf.mxu1 }
 0x184   : > { %v863_v51 = vadd.f32 %v862_v22, %v4792_v53 }
 0x185   : > { %v1551_v49 = vadd.f32 %v1439_v14, %v1329_v27 }
 0x186   : > { %3709 = vmatmul.msk.f32.gmra.mxu1 %vm440_vm1, %v4137_v40  ;;  %v1848_v39 = vpop.f32.mrf.mxu0 }
 0x187   : > { %v5132_v30 = vadd.f32 %v1845_v25, %v1551_v49  ;;  %3759 = vmatmul.msk.f32.gmra.mxu2 %vm440_vm1, %v1027_v50  ;;  %v4141_v25 = vld [vmem:[%s4363_s23 + $0x118] sm:$0xff] }
 0x188   : > { %3809 = vmatmul.msk.f32.gmra.mxu3 %vm440_vm1, %v1031_v46 }
 0x189   : > { %3859 = vmatmul.msk.f32.gmra.mxu0 %vm440_vm1, %v1655_v38 }
 0x18a   : > { %v1220_v12 = vpop.f32.mrf.mxu2 }
 0x18b   : > { %v1442_v13 = vpop.f32.mrf.mxu3  ;;  %v1330_v48 = vadd.f32 %v1220_v12, %v863_v51  ;;  %v865_v34 = vpop.f32.mrf.mxu1 }
 0x18c   : > { %v866_v10 = vadd.f32 %v865_v34, %v4809_v19  ;;  %v4142_v19 = vld [vmem:[%s4363_s23 + $0x138] sm:$0xff] }
 0x18d   : > { %v1552_v50 = vadd.f32 %v1442_v13, %v1330_v48  ;;  %v1036_v33 = vrot.slane %v4142_v19, 2  ;;  %v1660_v22 = vrot.slane %v4142_v19, 3 }
 0x18e   : > { %3710 = vmatmul.msk.f32.gmra.mxu1 %vm440_vm1, %v4139_v11  ;;  %v1851_v9 = vpop.f32.mrf.mxu0 }
 0x18f   : > { %v5147_v53 = vadd.f32 %v1848_v39, %v1552_v50  ;;  %3760 = vmatmul.msk.f32.gmra.mxu2 %vm440_vm1, %v1029_v42  ;;  %v1037_v39 = vsel %vm958_vm2, %v1034_v55, %v1036_v33  ;;  %v1661_v15 = vsel %vm1586_vm3, %v1658_v21, %v1660_v22 }
 0x190   : > { %3810 = vmatmul.msk.f32.gmra.mxu3 %vm440_vm1, %v1033_v61 }
 0x191   : > { %3860 = vmatmul.msk.f32.gmra.mxu0 %vm440_vm1, %v1657_v54 }
 0x192   : > { %v1223_v28 = vpop.f32.mrf.mxu2 }
 0x193   : > { %v1445_v37 = vpop.f32.mrf.mxu3  ;;  %v1331_v29 = vadd.f32 %v1223_v28, %v866_v10  ;;  %v868_v62 = vpop.f32.mrf.mxu1 }
 0x194   : > { %v869_v14 = vadd.f32 %v868_v62, %v4826_v16  ;;  %v4143_v16 = vld [vmem:[%s4363_s23 + $0x140] sm:$0xff] }
 0x195   : > { %v1553_v42 = vadd.f32 %v1445_v37, %v1331_v29  ;;  %v1038_v12 = vrot.slane %v4143_v16, 2  ;;  %v1662_v34 = vrot.slane %v4143_v16, 3 }
 0x196   : > { %3711 = vmatmul.msk.f32.gmra.mxu1 %vm440_vm1, %v4141_v25  ;;  %v1854_v31 = vpop.f32.mrf.mxu0 }
 0x197   : > { %v5162_v57 = vadd.f32 %v1851_v9, %v1553_v42  ;;  %3761 = vmatmul.msk.f32.gmra.mxu2 %vm440_vm1, %v1031_v46  ;;  %v1039_v11 = vsel %vm958_vm2, %v1036_v33, %v1038_v12  ;;  %v1663_v54 = vsel %vm1586_vm3, %v1660_v22, %v1662_v34 }
 0x198   : > { %3811 = vmatmul.msk.f32.gmra.mxu3 %vm440_vm1, %v1035_v1 }
 0x199   : > { %3861 = vmatmul.msk.f32.gmra.mxu0 %vm440_vm1, %v1659_v63 }
 0x19a   : > { %v1226_v60 = vpop.f32.mrf.mxu2 }
 0x19b   : > { %v1448_v27 = vpop.f32.mrf.mxu3  ;;  %v1332_v49 = vadd.f32 %v1226_v60, %v869_v14  ;;  %v871_v40 = vpop.f32.mrf.mxu1 }
 0x19c   : > { %v872_v13 = vadd.f32 %v871_v40, %v4843_v43  ;;  %v4144_v43 = vld [vmem:[%s4363_s23 + $0x148] sm:$0xff] }
 0x19d   : > { %v1554_v38 = vadd.f32 %v1448_v27, %v1332_v49  ;;  %v1040_v10 = vrot.slane %v4144_v43, 2  ;;  %v1664_v29 = vrot.slane %v4144_v43, 3 }
 0x19e   : > { %3712 = vmatmul.msk.f32.gmra.mxu1 %vm440_vm1, %v5122_v24  ;;  %v1857_v46 = vpop.f32.mrf.mxu0 }
 0x19f   : > { %v5173_v51 = vadd.f32 %v1854_v31, %v1554_v38  ;;  %3762 = vmatmul.msk.f32.gmra.mxu2 %vm440_vm1, %v1033_v61  ;;  %v1041_v42 = vsel %vm958_vm2, %v1038_v12, %v1040_v10  ;;  %v1665_v31 = vsel %vm1586_vm3, %v1662_v34, %v1664_v29 }
 0x1a0   : > { %3812 = vmatmul.msk.f32.gmra.mxu3 %vm440_vm1, %v1037_v39 }
 0x1a1   : > { %3862 = vmatmul.msk.f32.gmra.mxu0 %vm440_vm1, %v1661_v15 }
 0x1a2   : > { %v1229_v23 = vpop.f32.mrf.mxu2 }
 0x1a3   : > { %v1451_v48 = vpop.f32.mrf.mxu3  ;;  %v1333_v24 = vadd.f32 %v1229_v23, %v872_v13  ;;  %v874_v50 = vpop.f32.mrf.mxu1 }
 0x1a4   : > { %v875_v28 = vadd.f32 %v874_v50, %v4860_v3  ;;  %v4145_v3 = vld [vmem:[%s4363_s23 + $0x150] sm:$0xff] }
 0x1a5   : > { %v1555_v9 = vadd.f32 %v1451_v48, %v1333_v24  ;;  %v1042_v33 = vrot.slane %v4145_v3, 2  ;;  %v1666_v22 = vrot.slane %v4145_v3, 3 }
 0x1a6   : > { %3713 = vmatmul.msk.f32.gmra.mxu1 %vm440_vm1, %v5137_v26  ;;  %v1860_v61 = vpop.f32.mrf.mxu0 }
 0x1a7   : > { %v5184_v55 = vadd.f32 %v1857_v46, %v1555_v9  ;;  %3763 = vmatmul.msk.f32.gmra.mxu2 %vm440_vm1, %v1035_v1  ;;  %v1043_v40 = vsel %vm958_vm2, %v1040_v10, %v1042_v33  ;;  %v1667_v46 = vsel %vm1586_vm3, %v1664_v29, %v1666_v22 }
 0x1a8   : > { %3813 = vmatmul.msk.f32.gmra.mxu3 %vm440_vm1, %v1039_v11 }
 0x1a9   : > { %3863 = vmatmul.msk.f32.gmra.mxu0 %vm440_vm1, %v1663_v54 }
 0x1aa   : > { %v1232_v37 = vpop.f32.mrf.mxu2 }
 0x1ab   : > { %v1454_v21 = vpop.f32.mrf.mxu3  ;;  %v1334_v26 = vadd.f32 %v1232_v37, %v875_v28  ;;  %v877_v62 = vpop.f32.mrf.mxu1 }
 0x1ac   : > { %v878_v14 = vadd.f32 %v877_v62, %v4877_v47  ;;  %v4146_v47 = vld [vmem:[%s4363_s23 + $0x158] sm:$0xff] }
 0x1ad   : > { %v1556_v25 = vadd.f32 %v1454_v21, %v1334_v26  ;;  %v1044_v12 = vrot.slane %v4146_v47, 2  ;;  %v1668_v34 = vrot.slane %v4146_v47, 3 }
 0x1ae   : > { %3714 = vmatmul.msk.f32.gmra.mxu1 %vm440_vm1, %v5152_v36  ;;  %v1863_v1 = vpop.f32.mrf.mxu0 }
 0x1af   : > { %v5195_v63 = vadd.f32 %v1860_v61, %v1556_v25  ;;  %3764 = vmatmul.msk.f32.gmra.mxu2 %vm440_vm1, %v1037_v39  ;;  %v1045_v50 = vsel %vm958_vm2, %v1042_v33, %v1044_v12  ;;  %v1669_v61 = vsel %vm1586_vm3, %v1666_v22, %v1668_v34 }
 0x1b0   : > { %3814 = vmatmul.msk.f32.gmra.mxu3 %vm440_vm1, %v1041_v42 }
 0x1b1   : > { %3864 = vmatmul.msk.f32.gmra.mxu0 %vm440_vm1, %v1665_v31 }
 0x1b2   : > { %v1235_v60 = vpop.f32.mrf.mxu2 }
 0x1b3   : > { %v1457_v27 = vpop.f32.mrf.mxu3  ;;  %v1335_v36 = vadd.f32 %v1235_v60, %v878_v14  ;;  %v880_v49 = vpop.f32.mrf.mxu1 }
 0x1b4   : > { %v881_v13 = vadd.f32 %v880_v49, %v4894_v59  ;;  %v4147_v59 = vld [vmem:[%s4363_s23 + $0x160] sm:$0xff] }
 0x1b5   : > { %v1557_v38 = vadd.f32 %v1457_v27, %v1335_v36  ;;  %v1046_v10 = vrot.slane %v4147_v59, 2  ;;  %v1670_v29 = vrot.slane %v4147_v59, 3 }
 0x1b6   : > { %3715 = vmatmul.msk.f32.gmra.mxu1 %vm440_vm1, %v4142_v19  ;;  %v1866_v39 = vpop.f32.mrf.mxu0 }
 0x1b7   : > { %v5205_v15 = vadd.f32 %v1863_v1, %v1557_v38  ;;  %3765 = vmatmul.msk.f32.gmra.mxu2 %vm440_vm1, %v1039_v11  ;;  %v1047_v62 = vsel %vm958_vm2, %v1044_v12, %v1046_v10  ;;  %v1671_v1 = vsel %vm1586_vm3, %v1668_v34, %v1670_v29 }
 0x1b8   : > { %3815 = vmatmul.msk.f32.gmra.mxu3 %vm440_vm1, %v1043_v40 }
 0x1b9   : > { %3865 = vmatmul.msk.f32.gmra.mxu0 %vm440_vm1, %v1667_v46 }
 0x1ba   : > { %v1238_v23 = vpop.f32.mrf.mxu2 }
 0x1bb   : > { %v1460_v48 = vpop.f32.mrf.mxu3  ;;  %v1336_v19 = vadd.f32 %v1238_v23, %v881_v13  ;;  %v883_v24 = vpop.f32.mrf.mxu1  ;;  %v5962_v13 = vld [vmem:[#allocation7_spill] sm:$0xff] }
 0x1bc   : > { %v884_v28 = vadd.f32 %v883_v24, %v4719_v45  ;;  %v5230_v45 = vld [vmem:[%s4363_s23 + $0x168] sm:$0xff] }
 0x1bd   : > { %v1558_v9 = vadd.f32 %v1460_v48, %v1336_v19  ;;  %v1048_v33 = vrot.slane %v5230_v45, 2  ;;  %v1672_v27 = vrot.slane %v5230_v45, 3 }
 0x1be   : > { %3716 = vmatmul.msk.f32.gmra.mxu1 %vm440_vm1, %v4143_v16  ;;  %v1869_v11 = vpop.f32.mrf.mxu0 }
 0x1bf   : > { %v5215_v54 = vadd.f32 %v1866_v39, %v1558_v9  ;;  %3766 = vmatmul.msk.f32.gmra.mxu2 %vm440_vm1, %v1041_v42  ;;  %v1049_v49 = vsel %vm958_vm2, %v1046_v10, %v1048_v33  ;;  %v1673_v39 = vsel %vm1586_vm3, %v1670_v29, %v1672_v27 }
 0x1c0   : > { %3816 = vmatmul.msk.f32.gmra.mxu3 %vm440_vm1, %v1045_v50 }
 0x1c1   : > { %3866 = vmatmul.msk.f32.gmra.mxu0 %vm440_vm1, %v1669_v61 }
 0x1c2   : > { %v1241_v37 = vpop.f32.mrf.mxu2 }
 0x1c3   : > { %v1463_v21 = vpop.f32.mrf.mxu3  ;;  %v1337_v16 = vadd.f32 %v1241_v37, %v884_v28  ;;  %v886_v26 = vpop.f32.mrf.mxu1  ;;  %v4150_v28 = vld [vmem:[%s4363_s23 + $0x178] sm:$0xff] }
 0x1c4   : > { %v887_v14 = vadd.f32 %v886_v26, %v4736_v52  ;;  %v5244_v52 = vld [vmem:[%s4363_s23 + $0x170] sm:$0xff]  ;;  %v1052_v37 = vrot.slane %v4150_v28, 2 }
 0x1c5   : > { %v1559_v25 = vadd.f32 %v1463_v21, %v1337_v16  ;;  %v1050_v12 = vrot.slane %v5244_v52, 2  ;;  %v1674_v34 = vrot.slane %v5244_v52, 3  ;;  %v5963_v21 = vld [vmem:[#allocation9_spill] sm:$0xff] }
 0x1c6   : > { %3717 = vmatmul.msk.f32.gmra.mxu1 %vm440_vm1, %v4144_v43  ;;  %v1872_v42 = vpop.f32.mrf.mxu0 }
 0x1c7   : > { %v5225_v31 = vadd.f32 %v1869_v11, %v1559_v25  ;;  %3767 = vmatmul.msk.f32.gmra.mxu2 %vm440_vm1, %v1043_v40  ;;  %v1051_v9 = vsel %vm958_vm2, %v1048_v33, %v1050_v12  ;;  %v1675_v61 = vsel %vm1586_vm3, %v1672_v27, %v1674_v34  ;;  %v1676_v25 = vrot.slane %v4150_v28, 3 }
 0x1c8   : > { %3817 = vmatmul.msk.f32.gmra.mxu3 %vm440_vm1, %v1047_v62 }
 0x1c9   : > { %3867 = vmatmul.msk.f32.gmra.mxu0 %vm440_vm1, %v1671_v1  ;;  %v1053_v1 = vsel %vm958_vm2, %v1050_v12, %v1052_v37 }
 0x1ca   : > { %v1244_v60 = vpop.f32.mrf.mxu2 }
 0x1cb   : > { %v1466_v43 = vpop.f32.mrf.mxu3  ;;  %v1338_v22 = vadd.f32 %v1244_v60, %v887_v14  ;;  %v889_v36 = vpop.f32.mrf.mxu1  ;;  %v1677_v14 = vsel %vm1586_vm3, %v1674_v34, %v1676_v25 }
 0x1cc   : > { %v890_v23 = vadd.f32 %v889_v36, %v5962_v13 }
 0x1cd   : > { %v1560_v40 = vadd.f32 %v1466_v43, %v1338_v22  ;;  %v4151_v43 = vld [vmem:[%s4638_s6] sm:$0xff]  ;;  %v5964_v22 = vld [vmem:[#allocation11_spill] sm:$0xff] }
 0x1ce   : > { %3718 = vmatmul.msk.f32.gmra.mxu1 %vm440_vm1, %v4145_v3  ;;  %v1875_v38 = vpop.f32.mrf.mxu0  ;;  %v1054_v27 = vrot.slane %v4151_v43, 2 }
 0x1cf   : > { %v5239_v46 = vadd.f32 %v1872_v42, %v1560_v40  ;;  %3768 = vmatmul.msk.f32.gmra.mxu2 %vm440_vm1, %v1045_v50 }
 0x1d0   : > { %3818 = vmatmul.msk.f32.gmra.mxu3 %vm440_vm1, %v1049_v49  ;;  %v1055_v13 = vsel %vm958_vm2, %v1052_v37, %v1054_v27 }
 0x1d1   : > { %3868 = vmatmul.msk.f32.gmra.mxu0 %vm440_vm1, %v1673_v39  ;;  %v1678_v39 = vrot.slane %v4151_v43, 3 }
 0x1d2   : > { %v1247_v48 = vpop.f32.mrf.mxu2 }
 0x1d3   : > { %v1469_v3 = vpop.f32.mrf.mxu3  ;;  %v1339_v19 = vadd.f32 %v1247_v48, %v890_v23  ;;  %v892_v24 = vpop.f32.mrf.mxu1  ;;  %v284_v48 = vld [vmem:[%s4638_s6 + $0x8] sm:$0xff] }
 0x1d4   : > { %v893_v29 = vadd.f32 %v892_v24, %v5963_v21  ;;  %v5965_v24 = vld [vmem:[#allocation13_spill] sm:$0xff]  ;;  %v1680_v37 = vrot.slane %v284_v48, 3 }
 0x1d5   : > { %v1561_v50 = vadd.f32 %v1469_v3, %v1339_v19  ;;  %v1679_v3 = vsel %vm1586_vm3, %v1676_v25, %v1678_v39  ;;  %v1366_v19 = vrot.slane %v284_v48, 2 }
 0x1d6   : > { %3719 = vmatmul.msk.f32.gmra.mxu1 %vm440_vm1, %v4146_v47  ;;  %v1878_v11 = vpop.f32.mrf.mxu0  ;;  %v1681_v25 = vsel %vm1586_vm3, %v1678_v39, %v1680_v37 }
 0x1d7   : > { %v5253_v10 = vadd.f32 %v1875_v38, %v1561_v50  ;;  %3769 = vmatmul.msk.f32.gmra.mxu2 %vm440_vm1, %v1047_v62 }
 0x1d8   : > { %3819 = vmatmul.msk.f32.gmra.mxu3 %vm440_vm1, %v1051_v9 }
 0x1d9   : > { %3869 = vmatmul.msk.f32.gmra.mxu0 %vm440_vm1, %v1675_v61 }
 0x1da   : > { %v1250_v16 = vpop.f32.mrf.mxu2 }
 0x1db   : > { %v1472_v26 = vpop.f32.mrf.mxu3  ;;  %v1340_v47 = vadd.f32 %v1250_v16, %v893_v29  ;;  %v895_v42 = vpop.f32.mrf.mxu1  ;;  %v1367_v29 = vsel %vm958_vm2, %v1054_v27, %v1366_v19 }
 0x1dc   : > { %v896_v36 = vadd.f32 %v895_v42, %v5964_v22 }
 0x1dd   : > { %v1562_v33 = vadd.f32 %v1472_v26, %v1340_v47  ;;  %v285_v26 = vld [vmem:[%s4638_s6 + $0x10] sm:$0xff] }
 0x1de   : > { %3720 = vmatmul.msk.f32.gmra.mxu1 %vm440_vm1, %v4147_v59  ;;  %v1881_v62 = vpop.f32.mrf.mxu0  ;;  %v1368_v42 = vrot.slane %v285_v26, 2 }
 0x1df   : > { %v5263_v60 = vadd.f32 %v1878_v11, %v1562_v33  ;;  %3770 = vmatmul.msk.f32.gmra.mxu2 %vm440_vm1, %v1049_v49  ;;  %v5966_v33 = vld [vmem:[#allocation15_spill] sm:$0xff] }
 0x1e0   : > { %3820 = vmatmul.msk.f32.gmra.mxu3 %vm440_vm1, %v1053_v1 }
 0x1e1   : > { %3870 = vmatmul.msk.f32.gmra.mxu0 %vm440_vm1, %v1677_v14 }
 0x1e2   : > { %v1253_v40 = vpop.f32.mrf.mxu2 }
 0x1e3   : > { %v1475_v38 = vpop.f32.mrf.mxu3  ;;  %v1341_v59 = vadd.f32 %v1253_v40, %v896_v36  ;;  %v898_v12 = vpop.f32.mrf.mxu1  ;;  %v1369_v36 = vsel %vm958_vm2, %v1366_v19, %v1368_v42  ;;  %v4155_v19 = vld [vmem:[%s4363_s23 + $0x28] sm:$0xff] }
 0x1e4   : > { %v899_v50 = vadd.f32 %v898_v12, %v5965_v24  ;;  %v1998_v24 = vrot.slane %v4155_v19, 4 }
 0x1e5   : > { %v1563_v23 = vadd.f32 %v1475_v38, %v1341_v59  ;;  %v4152_v59 = vld [vmem:[%s4363_s23 + $0x10] sm:$0xff] }
 0x1e6   : > { %3721 = vmatmul.msk.f32.gmra.mxu1 %vm440_vm1, %v5230_v45  ;;  %v1884_v49 = vpop.f32.mrf.mxu0  ;;  %v1993_v12 = vrot.slane %v4152_v59, 4 }
 0x1e7   : > { %v5275_v34 = vadd.f32 %v1881_v62, %v1563_v23  ;;  %3771 = vmatmul.msk.f32.gmra.mxu2 %vm440_vm1, %v1051_v9  ;;  %v4153_v23 = vld [vmem:[%s4363_s23 + $0x18] sm:$0xff] }
 0x1e8   : > { %3821 = vmatmul.msk.f32.gmra.mxu3 %vm440_vm1, %v1055_v13  ;;  %v1994_v48 = vrot.slane %v4153_v23, 4 }
 0x1e9   : > { %3871 = vmatmul.msk.f32.gmra.mxu0 %vm440_vm1, %v1679_v3 }
 0x1ea   : > { %v1256_v11 = vpop.f32.mrf.mxu2 }
 0x1eb   : > { %v1478_v61 = vpop.f32.mrf.mxu3  ;;  %v1342_v21 = vadd.f32 %v1256_v11, %v899_v50  ;;  %v901_v45 = vpop.f32.mrf.mxu1  ;;  %v5967_v11 = vld [vmem:[#allocation17_spill] sm:$0xff] }
 0x1ec   : > { %v902_v62 = vadd.f32 %v901_v45, %v5966_v33  ;;  %v3028_v45 = vrot.slane %v4155_v19, 6 }
 0x1ed   : > { %v1564_v16 = vadd.f32 %v1478_v61, %v1342_v21 }
 0x1ee   : > { %3722 = vmatmul.msk.f32.gmra.mxu1 %vm440_vm1, %v5244_v52  ;;  %v1887_v9 = vpop.f32.mrf.mxu0  ;;  %v1682_v52 = vrot.slane %v285_v26, 3  ;;  %v1995_v26 = vsel %vm1992_vm4, %v1993_v12, %v1994_v48 }
 0x1ef   : > { %v5286_v47 = vadd.f32 %v1884_v49, %v1564_v16  ;;  %3772 = vmatmul.msk.f32.gmra.mxu2 %vm440_vm1, %v1053_v1  ;;  %v4154_v49 = vld [vmem:[%s4363_s23 + $0x20] sm:$0xff] }
 0x1f0   : > { %3822 = vmatmul.msk.f32.gmra.mxu3 %vm440_vm1, %v1367_v29  ;;  %v1683_v38 = vsel %vm1586_vm3, %v1680_v37, %v1682_v52  ;;  %v1996_v3 = vrot.slane %v4154_v49, 4  ;;  %v2621_v50 = vrot.slane %v4154_v49, 5  ;;  %v3027_v21 = vrot.slane %v4154_v49, 6 }
 0x1f1   : > { %3872 = vmatmul.msk.f32.gmra.mxu0 %vm440_vm1, %v1681_v25 }
 0x1f2   : > { %v1259_v14 = vpop.f32.mrf.mxu2 }
 0x1f3   : > { %v1481_v43 = vpop.f32.mrf.mxu3  ;;  %v1343_v27 = vadd.f32 %v1259_v14, %v902_v62  ;;  %v904_v22 = vpop.f32.mrf.mxu1  ;;  %v3029_v62 = vsel %vm3026_vm6, %v3027_v21, %v3028_v45 }
 0x1f4   : > { %v905_v61 = vadd.f32 %v904_v22, %v5967_v11  ;;  %v5968_v22 = vld [vmem:[#allocation19_spill] sm:$0xff] }
 0x1f5   : > { %v1565_v40 = vadd.f32 %v1481_v43, %v1343_v27  ;;  %v4156_v43 = vld [vmem:[%s4363_s23 + $0x30] sm:$0xff] }
 0x1f6   : > { %3723 = vmatmul.msk.f32.gmra.mxu1 %vm440_vm1, %v4150_v28  ;;  %v1890_v1 = vpop.f32.mrf.mxu0  ;;  %v2622_v28 = vrot.slane %v4155_v19, 5  ;;  %v2000_v52 = vrot.slane %v4156_v43, 4  ;;  %v2624_v27 = vrot.slane %v4156_v43, 5  ;;  %v3030_v59 = vrot.slane %v4156_v43, 6 }
 0x1f7   : > { %v5295_v39 = vadd.f32 %v1887_v9, %v1565_v40  ;;  %3773 = vmatmul.msk.f32.gmra.mxu2 %vm440_vm1, %v1055_v13  ;;  %v1999_v9 = vsel %vm1992_vm4, %v1996_v3, %v1998_v24 }
 0x1f8   : > { %3823 = vmatmul.msk.f32.gmra.mxu3 %vm440_vm1, %v1369_v36  ;;  %v2623_v25 = vsel %vm2620_vm5, %v2621_v50, %v2622_v28  ;;  %v2001_v49 = vsel %vm1992_vm4, %v1998_v24, %v2000_v52  ;;  %v2625_v19 = vsel %vm2620_vm5, %v2622_v28, %v2624_v27 }
 0x1f9   : > { %3873 = vmatmul.msk.f32.gmra.mxu0 %vm440_vm1, %v1683_v38 }
 0x1fa   : > { %v1262_v37 = vpop.f32.mrf.mxu2 }
 0x1fb   : > { %v1484_v13 = vpop.f32.mrf.mxu3  ;;  %v1344_v29 = vadd.f32 %v1262_v37, %v905_v61  ;;  %v907_v16 = vpop.f32.mrf.mxu1  ;;  %v3031_v61 = vsel %vm3026_vm6, %v3028_v45, %v3030_v59 }
 0x1fc   : > { %v908_v36 = vadd.f32 %v907_v16, %v5968_v22 }
 0x1fd   : > { %v1566_v42 = vadd.f32 %v1484_v13, %v1344_v29  ;;  %v4157_v13 = vld [vmem:[%s4363_s23 + $0x38] sm:$0xff] }
 0x1fe   : > { %3876 = vmatmul.msk.f32.vlgmr.msra.gmra.mxu1 %vm440_vm1, %v1995_v26  ;;  %v1893_v33 = vpop.f32.mrf.mxu0  ;;  %v2002_v21 = vrot.slane %v4157_v13, 4  ;;  %v2626_v29 = vrot.slane %v4157_v13, 5  ;;  %v3032_v16 = vrot.slane %v4157_v13, 6 }
 0x1ff   : > { %v5310_v14 = vadd.f32 %v1890_v1, %v1566_v42  ;;  %3926 = vmatmul.msk.f32.vlgmr.msra.gmra.mxu2 %vm440_vm1, %v1999_v9  ;;  %v1997_v1 = vsel %vm1992_vm4, %v1994_v48, %v1996_v3  ;;  %v5969_v48 = vld [vmem:[#allocation21_spill] sm:$0xff] }
 0x200   : > { %3976 = vmatmul.msk.f32.vlgmr.msra.gmra.mxu3 %vm440_vm1, %v2623_v25  ;;  %v2003_v45 = vsel %vm1992_vm4, %v2000_v52, %v2002_v21  ;;  %v2627_v42 = vsel %vm2620_vm5, %v2624_v27, %v2626_v29  ;;  %v3033_v43 = vsel %vm3026_vm6, %v3030_v59, %v3032_v16 }
 0x201   : > { %4026 = vmatmul.msk.f32.vlgmr.msra.gmra.mxu0 %vm440_vm1, %v3029_v62 }
 0x202   : > { %v1265_v40 = vpop.f32.mrf.mxu2 }
 0x203   : > { %v1487_v38 = vpop.f32.mrf.mxu3  ;;  %v1345_v12 = vadd.f32 %v1265_v40, %v908_v36  ;;  %v910_v23 = vpop.f32.mrf.mxu1  ;;  %v4158_v36 = vld [vmem:[%s4363_s23 + $0x40] sm:$0xff] }
 0x204   : > { %v911_v3 = vadd.f32 %v910_v23, %v5969_v48  ;;  %v2004_v40 = vrot.slane %v4158_v36, 4 }
 0x205   : > { %v1567_v50 = vadd.f32 %v1487_v38, %v1345_v12  ;;  %v2628_v38 = vrot.slane %v4158_v36, 5  ;;  %v5970_v12 = vld [vmem:[#allocation23_spill] sm:$0xff] }
 0x206   : > { %3877 = vmatmul.msk.f32.gmra.mxu1 %vm440_vm1, %v1997_v1  ;;  %v1896_v11 = vpop.f32.mrf.mxu0  ;;  %v2005_v59 = vsel %vm1992_vm4, %v2002_v21, %v2004_v40 }
 0x207   : > { %v5322_v37 = vadd.f32 %v1893_v33, %v1567_v50  ;;  %3927 = vmatmul.msk.f32.gmra.mxu2 %vm440_vm1, %v2001_v49  ;;  %v2629_v50 = vsel %vm2620_vm5, %v2626_v29, %v2628_v38 }
 0x208   : > { %3977 = vmatmul.msk.f32.gmra.mxu3 %vm440_vm1, %v2625_v19 }
 0x209   : > { %4027 = vmatmul.msk.f32.gmra.mxu0 %vm440_vm1, %v3031_v61 }
 0x20a   : > { %v1268_v24 = vpop.f32.mrf.mxu2 }
 0x20b   : > { %v1490_v28 = vpop.f32.mrf.mxu3  ;;  %v1346_v26 = vadd.f32 %v1268_v24, %v911_v3  ;;  %v913_v25 = vpop.f32.mrf.mxu1  ;;  %v4159_v3 = vld [vmem:[%s4363_s23 + $0x48] sm:$0xff] }
 0x20c   : > { %v914_v23 = vadd.f32 %v913_v25, %v5970_v12  ;;  %v2006_v24 = vrot.slane %v4159_v3, 4 }
 0x20d   : > { %v1568_v33 = vadd.f32 %v1490_v28, %v1346_v26  ;;  %v2630_v28 = vrot.slane %v4159_v3, 5  ;;  %v5971_v26 = vld [vmem:[#allocation25_spill] sm:$0xff] }
 0x20e   : > { %3878 = vmatmul.msk.f32.gmra.mxu1 %vm440_vm1, %v1999_v9  ;;  %v1899_v62 = vpop.f32.mrf.mxu0  ;;  %v3034_v9 = vrot.slane %v4158_v36, 6 }
 0x20f   : > { %v5333_v22 = vadd.f32 %v1896_v11, %v1568_v33  ;;  %3928 = vmatmul.msk.f32.gmra.mxu2 %vm440_vm1, %v2003_v45 }
 0x210   : > { %3978 = vmatmul.msk.f32.gmra.mxu3 %vm440_vm1, %v2627_v42  ;;  %v3035_v13 = vsel %vm3026_vm6, %v3032_v16, %v3034_v9  ;;  %v2007_v16 = vsel %vm1992_vm4, %v2004_v40, %v2006_v24 }
 0x211   : > { %4028 = vmatmul.msk.f32.gmra.mxu0 %vm440_vm1, %v3033_v43 }
 0x212   : > { %v1271_v52 = vpop.f32.mrf.mxu2 }
 0x213   : > { %v1493_v27 = vpop.f32.mrf.mxu3  ;;  %v1347_v1 = vadd.f32 %v1271_v52, %v914_v23  ;;  %v916_v19 = vpop.f32.mrf.mxu1  ;;  %v4160_v52 = vld [vmem:[%s4363_s23 + $0x50] sm:$0xff] }
 0x214   : > { %v917_v25 = vadd.f32 %v916_v19, %v5971_v26  ;;  %v5972_v19 = vld [vmem:[#allocation5_spill] sm:$0xff] }
 0x215   : > { %v1569_v11 = vadd.f32 %v1493_v27, %v1347_v1  ;;  %v2008_v27 = vrot.slane %v4160_v52, 4  ;;  %v2632_v1 = vrot.slane %v4160_v52, 5 }
 0x216   : > { %3879 = vmatmul.msk.f32.gmra.mxu1 %vm440_vm1, %v2001_v49  ;;  %v1902_v61 = vpop.f32.mrf.mxu0  ;;  %v3036_v49 = vrot.slane %v4159_v3, 6 }
 0x217   : > { %v5344_v48 = vadd.f32 %v1899_v62, %v1569_v11  ;;  %3929 = vmatmul.msk.f32.gmra.mxu2 %vm440_vm1, %v2005_v59  ;;  %v2631_v62 = vsel %vm2620_vm5, %v2628_v38, %v2630_v28 }
 0x218   : > { %3979 = vmatmul.msk.f32.gmra.mxu3 %vm440_vm1, %v2629_v50  ;;  %v3037_v12 = vsel %vm3026_vm6, %v3034_v9, %v3036_v49  ;;  %v2009_v9 = vsel %vm1992_vm4, %v2006_v24, %v2008_v27 }
 0x219   : > { %4029 = vmatmul.msk.f32.gmra.mxu0 %vm440_vm1, %v3035_v13 }
 0x21a   : > { %v1274_v21 = vpop.f32.mrf.mxu2 }
 0x21b   : > { %v1496_v29 = vpop.f32.mrf.mxu3  ;;  %v1348_v42 = vadd.f32 %v1274_v21, %v917_v25  ;;  %v919_v33 = vpop.f32.mrf.mxu1 }
 0x21c   : > { %v920_v50 = vadd.f32 %v919_v33, %v5972_v19 }
 0x21d   : > { %v1570_v43 = vadd.f32 %v1496_v29, %v1348_v42  ;;  %v4161_v29 = vld [vmem:[%s4363_s23 + $0x58] sm:$0xff] }
 0x21e   : > { %3880 = vmatmul.msk.f32.gmra.mxu1 %vm440_vm1, %v2003_v45  ;;  %v1905_v36 = vpop.f32.mrf.mxu0  ;;  %v3038_v45 = vrot.slane %v4160_v52, 6  ;;  %v2010_v42 = vrot.slane %v4161_v29, 4  ;;  %v2634_v33 = vrot.slane %v4161_v29, 5 }
 0x21f   : > { %v5355_v23 = vadd.f32 %v1902_v61, %v1570_v43  ;;  %3930 = vmatmul.msk.f32.gmra.mxu2 %vm440_vm1, %v2007_v16  ;;  %v2633_v61 = vsel %vm2620_vm5, %v2630_v28, %v2632_v1 }
 0x220   : > { %3980 = vmatmul.msk.f32.gmra.mxu3 %vm440_vm1, %v2631_v62  ;;  %v3039_v25 = vsel %vm3026_vm6, %v3036_v49, %v3038_v45  ;;  %v5973_v62 = vld [vmem:[#allocation6_spill] sm:$0xff]  ;;  %v2011_v49 = vsel %vm1992_vm4, %v2008_v27, %v2010_v42 }
 0x221   : > { %4030 = vmatmul.msk.f32.gmra.mxu0 %vm440_vm1, %v3037_v12 }
 0x222   : > { %v1277_v40 = vpop.f32.mrf.mxu2 }
 0x223   : > { %v1499_v38 = vpop.f32.mrf.mxu3  ;;  %v1349_v11 = vadd.f32 %v1277_v40, %v920_v50  ;;  %v922_v13 = vpop.f32.mrf.mxu1 }
 0x224   : > { %v923_v43 = vadd.f32 %v922_v13, %v5973_v62 }
 0x225   : > { %v1571_v3 = vadd.f32 %v1499_v38, %v1349_v11  ;;  %v4162_v11 = vld [vmem:[%s4363_s23 + $0x60] sm:$0xff] }
 0x226   : > { %3881 = vmatmul.msk.f32.gmra.mxu1 %vm440_vm1, %v2005_v59  ;;  %v1908_v26 = vpop.f32.mrf.mxu0  ;;  %v3040_v59 = vrot.slane %v4161_v29, 6  ;;  %v2012_v13 = vrot.slane %v4162_v11, 4 }
 0x227   : > { %v5366_v21 = vadd.f32 %v1905_v36, %v1571_v3  ;;  %3931 = vmatmul.msk.f32.gmra.mxu2 %vm440_vm1, %v2009_v9  ;;  %v2635_v36 = vsel %vm2620_vm5, %v2632_v1, %v2634_v33  ;;  %v5974_v3 = vld [vmem:[#allocation8_spill] sm:$0xff] }
 0x228   : > { %3981 = vmatmul.msk.f32.gmra.mxu3 %vm440_vm1, %v2633_v61  ;;  %v3041_v40 = vsel %vm3026_vm6, %v3038_v45, %v3040_v59  ;;  %v2636_v61 = vrot.slane %v4162_v11, 5  ;;  %v2013_v45 = vsel %vm1992_vm4, %v2010_v42, %v2012_v13 }
 0x229   : > { %4031 = vmatmul.msk.f32.gmra.mxu0 %vm440_vm1, %v3039_v25 }
 0x22a   : > { %v1280_v24 = vpop.f32.mrf.mxu2 }
 0x22b   : > { %v1502_v28 = vpop.f32.mrf.mxu3  ;;  %v1350_v12 = vadd.f32 %v1280_v24, %v923_v43  ;;  %v925_v52 = vpop.f32.mrf.mxu1 }
 0x22c   : > { %v926_v25 = vadd.f32 %v925_v52, %v5974_v3  ;;  %v4163_v52 = vld [vmem:[%s4363_s23 + $0x68] sm:$0xff] }
 0x22d   : > { %v1572_v19 = vadd.f32 %v1502_v28, %v1350_v12 }
 0x22e   : > { %3882 = vmatmul.msk.f32.gmra.mxu1 %vm440_vm1, %v2007_v16  ;;  %v1911_v50 = vpop.f32.mrf.mxu0  ;;  %v3042_v16 = vrot.slane %v4162_v11, 6 }
 0x22f   : > { %v5377_v38 = vadd.f32 %v1908_v26, %v1572_v19  ;;  %3932 = vmatmul.msk.f32.gmra.mxu2 %vm440_vm1, %v2011_v49  ;;  %v2637_v26 = vsel %vm2620_vm5, %v2634_v33, %v2636_v61  ;;  %v2638_v19 = vrot.slane %v4163_v52, 5 }
 0x230   : > { %3982 = vmatmul.msk.f32.gmra.mxu3 %vm440_vm1, %v2635_v36  ;;  %v3043_v28 = vsel %vm3026_vm6, %v3040_v59, %v3042_v16  ;;  %v2014_v36 = vrot.slane %v4163_v52, 4 }
 0x231   : > { %4032 = vmatmul.msk.f32.gmra.mxu0 %vm440_vm1, %v3041_v40  ;;  %v5975_v40 = vld [vmem:[#allocation10_spill] sm:$0xff] }
 0x232   : > { %v1283_v27 = vpop.f32.mrf.mxu2  ;;  %v2015_v59 = vsel %vm1992_vm4, %v2012_v13, %v2014_v36 }
 0x233   : > { %v1505_v1 = vpop.f32.mrf.mxu3  ;;  %v1351_v29 = vadd.f32 %v1283_v27, %v926_v25  ;;  %v928_v62 = vpop.f32.mrf.mxu1 }
 0x234   : > { %v929_v11 = vadd.f32 %v928_v62, %v5975_v40  ;;  %v4164_v62 = vld [vmem:[%s4363_s23 + $0x70] sm:$0xff] }
 0x235   : > { %v1573_v43 = vadd.f32 %v1505_v1, %v1351_v29 }
 0x236   : > { %3883 = vmatmul.msk.f32.gmra.mxu1 %vm440_vm1, %v2009_v9  ;;  %v1914_v24 = vpop.f32.mrf.mxu0  ;;  %v3044_v9 = vrot.slane %v4163_v52, 6  ;;  %v5976_v52 = vld [vmem:[#allocation12_spill] sm:$0xff] }
 0x237   : > { %v5388_v12 = vadd.f32 %v1911_v50, %v1573_v43  ;;  %3933 = vmatmul.msk.f32.gmra.mxu2 %vm440_vm1, %v2013_v45  ;;  %v2639_v50 = vsel %vm2620_vm5, %v2636_v61, %v2638_v19  ;;  %v2016_v43 = vrot.slane %v4164_v62, 4 }
 0x238   : > { %3983 = vmatmul.msk.f32.gmra.mxu3 %vm440_vm1, %v2637_v26  ;;  %v3045_v29 = vsel %vm3026_vm6, %v3042_v16, %v3044_v9 }
 0x239   : > { %4033 = vmatmul.msk.f32.gmra.mxu0 %vm440_vm1, %v3043_v28  ;;  %v2640_v28 = vrot.slane %v4164_v62, 5  ;;  %v2017_v16 = vsel %vm1992_vm4, %v2014_v36, %v2016_v43 }
 0x23a   : > { %v1286_v42 = vpop.f32.mrf.mxu2 }
 0x23b   : > { %v1508_v33 = vpop.f32.mrf.mxu3  ;;  %v1352_v3 = vadd.f32 %v1286_v42, %v929_v11  ;;  %v931_v25 = vpop.f32.mrf.mxu1 }
 0x23c   : > { %v932_v40 = vadd.f32 %v931_v25, %v5976_v52  ;;  %v4165_v25 = vld [vmem:[%s4363_s23 + $0x78] sm:$0xff]  ;;  %v5978_v52 = vld [vmem:[#allocation14_spill] sm:$0xff] }
 0x23d   : > { %v1574_v27 = vadd.f32 %v1508_v33, %v1352_v3 }
 0x23e   : > { %3884 = vmatmul.msk.f32.gmra.mxu1 %vm440_vm1, %v2011_v49  ;;  %v1917_v1 = vpop.f32.mrf.mxu0  ;;  %v3046_v49 = vrot.slane %v4164_v62, 6  ;;  %v2642_v62 = vrot.slane %v4165_v25, 5 }
 0x23f   : > { %v5399_v26 = vadd.f32 %v1914_v24, %v1574_v27  ;;  %3934 = vmatmul.msk.f32.gmra.mxu2 %vm440_vm1, %v2015_v59  ;;  %v2641_v24 = vsel %vm2620_vm5, %v2638_v19, %v2640_v28 }
 0x240   : > { %3984 = vmatmul.msk.f32.gmra.mxu3 %vm440_vm1, %v2639_v50  ;;  %v3047_v50 = vsel %vm3026_vm6, %v3044_v9, %v3046_v49 }
 0x241   : > { %4034 = vmatmul.msk.f32.gmra.mxu0 %vm440_vm1, %v3045_v29  ;;  %v2018_v29 = vrot.slane %v4165_v25, 4 }
 0x242   : > { %v1289_v13 = vpop.f32.mrf.mxu2 }
 0x243   : > { %v1511_v61 = vpop.f32.mrf.mxu3  ;;  %v1353_v11 = vadd.f32 %v1289_v13, %v932_v40  ;;  %v934_v42 = vpop.f32.mrf.mxu1  ;;  %v2019_v9 = vsel %vm1992_vm4, %v2016_v43, %v2018_v29 }
 0x244   : > { %v935_v40 = vadd.f32 %v934_v42, %v5978_v52  ;;  %v4166_v42 = vld [vmem:[%s4363_s23 + $0x80] sm:$0xff]  ;;  %v5980_v52 = vld [vmem:[#allocation16_spill] sm:$0xff] }
 0x245   : > { %v1575_v33 = vadd.f32 %v1511_v61, %v1353_v11 }
 0x246   : > { %3885 = vmatmul.msk.f32.gmra.mxu1 %vm440_vm1, %v2013_v45  ;;  %v1920_v3 = vpop.f32.mrf.mxu0  ;;  %v3048_v45 = vrot.slane %v4165_v25, 6  ;;  %v2644_v25 = vrot.slane %v4166_v42, 5 }
 0x247   : > { %v5410_v27 = vadd.f32 %v1917_v1, %v1575_v33  ;;  %3935 = vmatmul.msk.f32.gmra.mxu2 %vm440_vm1, %v2017_v16  ;;  %v2643_v1 = vsel %vm2620_vm5, %v2640_v28, %v2642_v62 }
 0x248   : > { %3985 = vmatmul.msk.f32.gmra.mxu3 %vm440_vm1, %v2641_v24  ;;  %v3049_v33 = vsel %vm3026_vm6, %v3046_v49, %v3048_v45 }
 0x249   : > { %5977 = vst [vmem:[#allocation7_spill] sm:$0xff] %v5410_v27  ;;  %4035 = vmatmul.msk.f32.gmra.mxu0 %vm440_vm1, %v3047_v50  ;;  %v2020_v50 = vrot.slane %v4166_v42, 4 }
 0x24a   : > { %v1292_v36 = vpop.f32.mrf.mxu2 }
 0x24b   : > { %v1514_v19 = vpop.f32.mrf.mxu3  ;;  %v1354_v13 = vadd.f32 %v1292_v36, %v935_v40  ;;  %v937_v61 = vpop.f32.mrf.mxu1  ;;  %v2021_v49 = vsel %vm1992_vm4, %v2018_v29, %v2020_v50 }
 0x24c   : > { %v938_v40 = vadd.f32 %v937_v61, %v5980_v52  ;;  %v4167_v61 = vld [vmem:[%s4363_s23 + $0x88] sm:$0xff] }
 0x24d   : > { %v1576_v11 = vadd.f32 %v1514_v19, %v1354_v13  ;;  %v5982_v52 = vld [vmem:[#allocation18_spill] sm:$0xff] }
 0x24e   : > { %3886 = vmatmul.msk.f32.gmra.mxu1 %vm440_vm1, %v2015_v59  ;;  %v1923_v24 = vpop.f32.mrf.mxu0  ;;  %v3050_v59 = vrot.slane %v4166_v42, 6  ;;  %v2646_v42 = vrot.slane %v4167_v61, 5 }
 0x24f   : > { %v5421_v27 = vadd.f32 %v1920_v3, %v1576_v11  ;;  %3936 = vmatmul.msk.f32.gmra.mxu2 %vm440_vm1, %v2019_v9  ;;  %v2645_v3 = vsel %vm2620_vm5, %v2642_v62, %v2644_v25 }
 0x250   : > { %3986 = vmatmul.msk.f32.gmra.mxu3 %vm440_vm1, %v2643_v1  ;;  %v3051_v11 = vsel %vm3026_vm6, %v3048_v45, %v3050_v59 }
 0x251   : > { %5979 = vst [vmem:[#allocation9_spill] sm:$0xff] %v5421_v27  ;;  %4036 = vmatmul.msk.f32.gmra.mxu0 %vm440_vm1, %v3049_v33  ;;  %v2022_v33 = vrot.slane %v4167_v61, 4 }
 0x252   : > { %v1295_v43 = vpop.f32.mrf.mxu2 }
 0x253   : > { %v1517_v28 = vpop.f32.mrf.mxu3  ;;  %v1355_v36 = vadd.f32 %v1295_v43, %v938_v40  ;;  %v940_v19 = vpop.f32.mrf.mxu1  ;;  %v2023_v45 = vsel %vm1992_vm4, %v2020_v50, %v2022_v33 }
 0x254   : > { %v941_v40 = vadd.f32 %v940_v19, %v5982_v52  ;;  %v4168_v19 = vld [vmem:[%s4363_s23 + $0x90] sm:$0xff]  ;;  %v5984_v52 = vld [vmem:[#allocation20_spill] sm:$0xff] }
 0x255   : > { %v1577_v13 = vadd.f32 %v1517_v28, %v1355_v36 }
 0x256   : > { %3887 = vmatmul.msk.f32.gmra.mxu1 %vm440_vm1, %v2017_v16  ;;  %v1926_v1 = vpop.f32.mrf.mxu0  ;;  %v3052_v16 = vrot.slane %v4167_v61, 6  ;;  %v2648_v61 = vrot.slane %v4168_v19, 5 }
 0x257   : > { %v5432_v27 = vadd.f32 %v1923_v24, %v1577_v13  ;;  %3937 = vmatmul.msk.f32.gmra.mxu2 %vm440_vm1, %v2021_v49  ;;  %v2647_v24 = vsel %vm2620_vm5, %v2644_v25, %v2646_v42 }
 0x258   : > { %3987 = vmatmul.msk.f32.gmra.mxu3 %vm440_vm1, %v2645_v3  ;;  %v3053_v13 = vsel %vm3026_vm6, %v3050_v59, %v3052_v16 }
 0x259   : > { %5981 = vst [vmem:[#allocation11_spill] sm:$0xff] %v5432_v27  ;;  %4037 = vmatmul.msk.f32.gmra.mxu0 %vm440_vm1, %v3051_v11  ;;  %v2024_v11 = vrot.slane %v4168_v19, 4 }
 0x25a   : > { %v1298_v29 = vpop.f32.mrf.mxu2 }
 0x25b   : > { %v1520_v62 = vpop.f32.mrf.mxu3  ;;  %v1356_v43 = vadd.f32 %v1298_v29, %v941_v40  ;;  %v943_v28 = vpop.f32.mrf.mxu1  ;;  %v2025_v59 = vsel %vm1992_vm4, %v2022_v33, %v2024_v11 }
 0x25c   : > { %v944_v40 = vadd.f32 %v943_v28, %v5984_v52  ;;  %v4169_v28 = vld [vmem:[%s4363_s23 + $0x98] sm:$0xff]  ;;  %v5986_v52 = vld [vmem:[#allocation22_spill] sm:$0xff] }
 0x25d   : > { %v1578_v36 = vadd.f32 %v1520_v62, %v1356_v43 }
 0x25e   : > { %3888 = vmatmul.msk.f32.gmra.mxu1 %vm440_vm1, %v2019_v9  ;;  %v1929_v3 = vpop.f32.mrf.mxu0  ;;  %v3054_v9 = vrot.slane %v4168_v19, 6  ;;  %v2650_v19 = vrot.slane %v4169_v28, 5 }
 0x25f   : > { %v5443_v27 = vadd.f32 %v1926_v1, %v1578_v36  ;;  %3938 = vmatmul.msk.f32.gmra.mxu2 %vm440_vm1, %v2023_v45  ;;  %v2649_v1 = vsel %vm2620_vm5, %v2646_v42, %v2648_v61 }
 0x260   : > { %3988 = vmatmul.msk.f32.gmra.mxu3 %vm440_vm1, %v2647_v24  ;;  %v3055_v36 = vsel %vm3026_vm6, %v3052_v16, %v3054_v9 }
 0x261   : > { %5983 = vst [vmem:[#allocation13_spill] sm:$0xff] %v5443_v27  ;;  %4038 = vmatmul.msk.f32.gmra.mxu0 %vm440_vm1, %v3053_v13  ;;  %v2026_v13 = vrot.slane %v4169_v28, 4 }
 0x262   : > { %v1301_v50 = vpop.f32.mrf.mxu2 }
 0x263   : > { %v1523_v25 = vpop.f32.mrf.mxu3  ;;  %v1357_v29 = vadd.f32 %v1301_v50, %v944_v40  ;;  %v946_v62 = vpop.f32.mrf.mxu1  ;;  %v2027_v16 = vsel %vm1992_vm4, %v2024_v11, %v2026_v13 }
 0x264   : > { %v947_v40 = vadd.f32 %v946_v62, %v5986_v52  ;;  %v4170_v62 = vld [vmem:[%s4363_s23 + $0xa0] sm:$0xff]  ;;  %v5988_v52 = vld [vmem:[#allocation24_spill] sm:$0xff] }
 0x265   : > { %v1579_v43 = vadd.f32 %v1523_v25, %v1357_v29 }
 0x266   : > { %3889 = vmatmul.msk.f32.gmra.mxu1 %vm440_vm1, %v2021_v49  ;;  %v1932_v24 = vpop.f32.mrf.mxu0  ;;  %v3056_v49 = vrot.slane %v4169_v28, 6  ;;  %v2652_v28 = vrot.slane %v4170_v62, 5 }
 0x267   : > { %v5454_v27 = vadd.f32 %v1929_v3, %v1579_v43  ;;  %3939 = vmatmul.msk.f32.gmra.mxu2 %vm440_vm1, %v2025_v59  ;;  %v2651_v3 = vsel %vm2620_vm5, %v2648_v61, %v2650_v19 }
 0x268   : > { %3989 = vmatmul.msk.f32.gmra.mxu3 %vm440_vm1, %v2649_v1  ;;  %v3057_v43 = vsel %vm3026_vm6, %v3054_v9, %v3056_v49 }
 0x269   : > { %5985 = vst [vmem:[#allocation15_spill] sm:$0xff] %v5454_v27  ;;  %4039 = vmatmul.msk.f32.gmra.mxu0 %vm440_vm1, %v3055_v36  ;;  %v2028_v36 = vrot.slane %v4170_v62, 4 }
 0x26a   : > { %v1304_v33 = vpop.f32.mrf.mxu2 }
 0x26b   : > { %v1526_v42 = vpop.f32.mrf.mxu3  ;;  %v1358_v50 = vadd.f32 %v1304_v33, %v947_v40  ;;  %v949_v25 = vpop.f32.mrf.mxu1  ;;  %v2029_v9 = vsel %vm1992_vm4, %v2026_v13, %v2028_v36 }
 0x26c   : > { %v950_v40 = vadd.f32 %v949_v25, %v5988_v52  ;;  %v4171_v25 = vld [vmem:[%s4363_s23 + $0xa8] sm:$0xff] }
 0x26d   : > { %v1580_v29 = vadd.f32 %v1526_v42, %v1358_v50  ;;  %v5989_v52 = vld [vmem:[#allocation26_spill] sm:$0xff] }
 0x26e   : > { %3890 = vmatmul.msk.f32.gmra.mxu1 %vm440_vm1, %v2023_v45  ;;  %v1935_v1 = vpop.f32.mrf.mxu0  ;;  %v3058_v45 = vrot.slane %v4170_v62, 6  ;;  %v2654_v62 = vrot.slane %v4171_v25, 5 }
 0x26f   : > { %v5465_v27 = vadd.f32 %v1932_v24, %v1580_v29  ;;  %3940 = vmatmul.msk.f32.gmra.mxu2 %vm440_vm1, %v2027_v16  ;;  %v2653_v24 = vsel %vm2620_vm5, %v2650_v19, %v2652_v28 }
 0x270   : > { %3990 = vmatmul.msk.f32.gmra.mxu3 %vm440_vm1, %v2651_v3  ;;  %v3059_v29 = vsel %vm3026_vm6, %v3056_v49, %v3058_v45 }
 0x271   : > { %5987 = vst [vmem:[#allocation17_spill] sm:$0xff] %v5465_v27  ;;  %4040 = vmatmul.msk.f32.gmra.mxu0 %vm440_vm1, %v3057_v43  ;;  %v2030_v43 = vrot.slane %v4171_v25, 4 }
 0x272   : > { %v1307_v11 = vpop.f32.mrf.mxu2 }
 0x273   : > { %v1529_v61 = vpop.f32.mrf.mxu3  ;;  %v1359_v33 = vadd.f32 %v1307_v11, %v950_v40  ;;  %v952_v42 = vpop.f32.mrf.mxu1 }
 0x274   : > { %v953_v40 = vadd.f32 %v952_v42, %v5989_v52 }
 0x275   : > { %v1581_v50 = vadd.f32 %v1529_v61, %v1359_v33  ;;  %v2655_v61 = vsel %vm2620_vm5, %v2652_v28, %v2654_v62 }
 0x276   : > { %3891 = vmatmul.msk.f32.gmra.mxu1 %vm440_vm1, %v2025_v59  ;;  %v1938_v3 = vpop.f32.mrf.mxu0  ;;  %v3060_v59 = vrot.slane %v4171_v25, 6 }
 0x277   : > { %v5476_v27 = vadd.f32 %v1935_v1, %v1581_v50  ;;  %3941 = vmatmul.msk.f32.gmra.mxu2 %vm440_vm1, %v2029_v9  ;;  %v2031_v1 = vsel %vm1992_vm4, %v2028_v36, %v2030_v43 }
 0x278   : > { %3991 = vmatmul.msk.f32.gmra.mxu3 %vm440_vm1, %v2653_v24  ;;  %v3061_v42 = vsel %vm3026_vm6, %v3058_v45, %v3060_v59 }
 0x279   : > { %4041 = vmatmul.msk.f32.gmra.mxu0 %vm440_vm1, %v3059_v29  ;;  %v4172_v29 = vld [vmem:[%s4363_s23 + $0xb0] sm:$0xff] }
 0x27a   : > { %v1310_v13 = vpop.f32.mrf.mxu2  ;;  %v2032_v25 = vrot.slane %v4172_v29, 4  ;;  %v2656_v52 = vrot.slane %v4172_v29, 5 }
 0x27b   : > { %v1532_v19 = vpop.f32.mrf.mxu3  ;;  %v1360_v11 = vadd.f32 %v1310_v13, %v953_v40  ;;  %v2203_v49 = vpop.f32.mrf.mxu1  ;;  %v3062_v40 = vrot.slane %v4172_v29, 6 }
 0x27c   : > { %v2347_v36 = vadd.f32 %v2203_v49, %v4925_v2  ;;  %v5502_v2 = vld [vmem:[%s5936_s3] ss:$0 sm:$0xff] }
 0x27d   : > { %v1582_v33 = vadd.f32 %v1532_v19, %v1360_v11  ;;  %v2657_v19 = vsel %vm2620_vm5, %v2654_v62, %v2656_v52 }
 0x27e   : > { %3892 = vmatmul.msk.f32.gmra.mxu1 %vm440_vm1, %v2027_v16  ;;  %v3237_v24 = vpop.f32.mrf.mxu0 }
 0x27f   : > { %v5487_v50 = vadd.f32 %v1938_v3, %v1582_v33  ;;  %3942 = vmatmul.msk.f32.gmra.mxu2 %vm440_vm1, %v2031_v1  ;;  %v2033_v3 = vsel %vm1992_vm4, %v2030_v43, %v2032_v25 }
 0x280   : > { %3992 = vmatmul.msk.f32.gmra.mxu3 %vm440_vm1, %v2655_v61  ;;  %v3063_v61 = vsel %vm3026_vm6, %v3060_v59, %v3062_v40 }
 0x281   : > { %4042 = vmatmul.msk.f32.gmra.mxu0 %vm440_vm1, %v3061_v42  ;;  %v4173_v42 = vld [vmem:[%s4363_s23 + $0xb8] sm:$0xff] }
 0x282   : > { %v2425_v28 = vpop.f32.mrf.mxu2  ;;  %v2034_v43 = vrot.slane %v4173_v42, 4  ;;  %v2658_v29 = vrot.slane %v4173_v42, 5 }
 0x283   : > { %v2831_v16 = vpop.f32.mrf.mxu3  ;;  %v2569_v13 = vadd.f32 %v2425_v28, %v2347_v36  ;;  %v2206_v45 = vpop.f32.mrf.mxu1 }
 0x284   : > { %v2348_v62 = vadd.f32 %v2206_v45, %v4937_v20 }
 0x285   : > { %v2975_v11 = vadd.f32 %v2831_v16, %v2569_v13  ;;  %v3064_v16 = vrot.slane %v4173_v42, 6  ;;  %v2035_v13 = vsel %vm1992_vm4, %v2032_v25, %v2034_v43 }
 0x286   : > { %3893 = vmatmul.msk.f32.gmra.mxu1 %vm440_vm1, %v2029_v9  ;;  %v3240_v49 = vpop.f32.mrf.mxu0 }
 0x287   : > { %v3381_v33 = vadd.f32 %v3237_v24, %v2975_v11  ;;  %3943 = vmatmul.msk.f32.gmra.mxu2 %vm440_vm1, %v2033_v3  ;;  %v3065_v45 = vsel %vm3026_vm6, %v3062_v40, %v3064_v16 }
 0x288   : > { %3993 = vmatmul.msk.f32.gmra.mxu3 %vm440_vm1, %v2657_v19  ;;  %v2659_v19 = vsel %vm2620_vm5, %v2656_v52, %v2658_v29 }
 0x289   : > { %v3433_v36 = vadd.f32 %v5502_v2, %v3381_v33  ;;  %4043 = vmatmul.msk.f32.gmra.mxu0 %vm440_vm1, %v3063_v61  ;;  %v4174_v33 = vld [vmem:[%s4363_s23 + $0xc0] sm:$0xff] }
 0x28a   : > { %v2428_v28 = vpop.f32.mrf.mxu2  ;;  %v2036_v42 = vrot.slane %v4174_v33, 4 }
 0x28b   : > { %v2834_v9 = vpop.f32.mrf.mxu3  ;;  %3481 = vst [vmem:[%s5512_s29] sm:$0xff] %v3433_v36  ;;  %v2570_v59 = vadd.f32 %v2428_v28, %v2348_v62  ;;  %v2209_v24 = vpop.f32.mrf.mxu1  ;;  %v2660_v62 = vrot.slane %v4174_v33, 5  ;;  %v3066_v28 = vrot.slane %v4174_v33, 6 }
 0x28c   : > { %v2349_v36 = vadd.f32 %v2209_v24, %v4949_v5 }
 0x28d   : > { %v2976_v11 = vadd.f32 %v2834_v9, %v2570_v59  ;;  %v2037_v9 = vsel %vm1992_vm4, %v2034_v43, %v2036_v42  ;;  %v2661_v59 = vsel %vm2620_vm5, %v2658_v29, %v2660_v62  ;;  %v3067_v24 = vsel %vm3026_vm6, %v3064_v16, %v3066_v28 }
 0x28e   : > { %3894 = vmatmul.msk.f32.gmra.mxu1 %vm440_vm1, %v2031_v1  ;;  %v3243_v20 = vpop.f32.mrf.mxu0 }
 0x28f   : > { %v3382_v61 = vadd.f32 %v3240_v49, %v2976_v11  ;;  %3944 = vmatmul.msk.f32.gmra.mxu2 %vm440_vm1, %v2035_v13 }
 0x290   : > { %3994 = vmatmul.msk.f32.gmra.mxu3 %vm440_vm1, %v2659_v19 }
 0x291   : > { %v3434_v25 = vadd.f32 %v5502_v2, %v3382_v61  ;;  %4044 = vmatmul.msk.f32.gmra.mxu0 %vm440_vm1, %v3065_v45  ;;  %v4175_v45 = vld [vmem:[%s4363_s23 + $0xc8] sm:$0xff] }
 0x292   : > { %v2431_v52 = vpop.f32.mrf.mxu2  ;;  %v2038_v61 = vrot.slane %v4175_v45, 4  ;;  %v2662_v33 = vrot.slane %v4175_v45, 5 }
 0x293   : > { %v2837_v1 = vpop.f32.mrf.mxu3  ;;  %3482 = vst [vmem:[%s5512_s29 + $0x8] sm:$0xff] %v3434_v25  ;;  %v2571_v40 = vadd.f32 %v2431_v52, %v2349_v36  ;;  %v2212_v49 = vpop.f32.mrf.mxu1  ;;  %v3068_v25 = vrot.slane %v4175_v45, 6 }
 0x294   : > { %v2350_v36 = vadd.f32 %v2212_v49, %v4961_v6  ;;  %v2039_v52 = vsel %vm1992_vm4, %v2036_v42, %v2038_v61 }
 0x295   : > { %v2977_v19 = vadd.f32 %v2837_v1, %v2571_v40  ;;  %v2663_v1 = vsel %vm2620_vm5, %v2660_v62, %v2662_v33  ;;  %v3069_v49 = vsel %vm3026_vm6, %v3066_v28, %v3068_v25 }
 0x296   : > { %3895 = vmatmul.msk.f32.gmra.mxu1 %vm440_vm1, %v2033_v3  ;;  %v3246_v5 = vpop.f32.mrf.mxu0 }
 0x297   : > { %v3383_v11 = vadd.f32 %v3243_v20, %v2977_v19  ;;  %3945 = vmatmul.msk.f32.gmra.mxu2 %vm440_vm1, %v2037_v9  ;;  %v4176_v19 = vld [vmem:[%s4363_s23 + $0xd0] sm:$0xff] }
 0x298   : > { %3995 = vmatmul.msk.f32.gmra.mxu3 %vm440_vm1, %v2661_v59 }
 0x299   : > { %v3435_v43 = vadd.f32 %v5502_v2, %v3383_v11  ;;  %4045 = vmatmul.msk.f32.gmra.mxu0 %vm440_vm1, %v3067_v24  ;;  %v2040_v24 = vrot.slane %v4176_v19, 4  ;;  %v2664_v11 = vrot.slane %v4176_v19, 5 }
 0x29a   : > { %v2434_v29 = vpop.f32.mrf.mxu2 }
 0x29b   : > { %v2840_v3 = vpop.f32.mrf.mxu3  ;;  %3483 = vst [vmem:[%s5512_s29 + $0x10] sm:$0xff] %v3435_v43  ;;  %v2572_v16 = vadd.f32 %v2434_v29, %v2350_v36  ;;  %v2215_v20 = vpop.f32.mrf.mxu1  ;;  %v3070_v36 = vrot.slane %v4176_v19, 6  ;;  %v2041_v43 = vsel %vm1992_vm4, %v2038_v61, %v2040_v24  ;;  %v2665_v29 = vsel %vm2620_vm5, %v2662_v33, %v2664_v11 }
 0x29c   : > { %v2351_v45 = vadd.f32 %v2215_v20, %v4982_v32 }
 0x29d   : > { %v2978_v40 = vadd.f32 %v2840_v3, %v2572_v16  ;;  %v3071_v16 = vsel %vm3026_vm6, %v3068_v25, %v3070_v36 }
 0x29e   : > { %3896 = vmatmul.msk.f32.gmra.mxu1 %vm440_vm1, %v2035_v13  ;;  %v3249_v6 = vpop.f32.mrf.mxu0 }
 0x29f   : > { %v3384_v59 = vadd.f32 %v3246_v5, %v2978_v40  ;;  %3946 = vmatmul.msk.f32.gmra.mxu2 %vm440_vm1, %v2039_v52 }
 0x2a0   : > { %3996 = vmatmul.msk.f32.gmra.mxu3 %vm440_vm1, %v2663_v1  ;;  %v4177_v1 = vld [vmem:[%s4363_s23 + $0xd8] sm:$0xff] }
 0x2a1   : > { %v3436_v42 = vadd.f32 %v5502_v2, %v3384_v59  ;;  %4046 = vmatmul.msk.f32.gmra.mxu0 %vm440_vm1, %v3069_v49  ;;  %v2042_v40 = vrot.slane %v4177_v1, 4  ;;  %v2666_v49 = vrot.slane %v4177_v1, 5  ;;  %v3072_v19 = vrot.slane %v4177_v1, 6 }
 0x2a2   : > { %v2437_v62 = vpop.f32.mrf.mxu2 }
 0x2a3   : > { %v2843_v13 = vpop.f32.mrf.mxu3  ;;  %3484 = vst [vmem:[%s5512_s29 + $0x18] sm:$0xff] %v3436_v42  ;;  %v2573_v28 = vadd.f32 %v2437_v62, %v2351_v45  ;;  %v2218_v5 = vpop.f32.mrf.mxu1  ;;  %v2043_v45 = vsel %vm1992_vm4, %v2040_v24, %v2042_v40  ;;  %v2667_v42 = vsel %vm2620_vm5, %v2664_v11, %v2666_v49 }
 0x2a4   : > { %v2352_v59 = vadd.f32 %v2218_v5, %v4997_v56  ;;  %v4178_v5 = vld [vmem:[%s4363_s23 + $0xe0] sm:$0xff] }
 0x2a5   : > { %v2979_v3 = vadd.f32 %v2843_v13, %v2573_v28  ;;  %v3073_v13 = vsel %vm3026_vm6, %v3070_v36, %v3072_v19 }
 0x2a6   : > { %3897 = vmatmul.msk.f32.gmra.mxu1 %vm440_vm1, %v2037_v9  ;;  %v3252_v32 = vpop.f32.mrf.mxu0 }
 0x2a7   : > { %v3385_v20 = vadd.f32 %v3249_v6, %v2979_v3  ;;  %3947 = vmatmul.msk.f32.gmra.mxu2 %vm440_vm1, %v2041_v43  ;;  %v2668_v3 = vrot.slane %v4178_v5, 5 }
 0x2a8   : > { %3997 = vmatmul.msk.f32.gmra.mxu3 %vm440_vm1, %v2665_v29  ;;  %v2044_v29 = vrot.slane %v4178_v5, 4 }
 0x2a9   : > { %v3437_v61 = vadd.f32 %v5502_v2, %v3385_v20  ;;  %4047 = vmatmul.msk.f32.gmra.mxu0 %vm440_vm1, %v3071_v16  ;;  %v3074_v20 = vrot.slane %v4178_v5, 6 }
 0x2aa   : > { %v2440_v33 = vpop.f32.mrf.mxu2  ;;  %v2045_v1 = vsel %vm1992_vm4, %v2042_v40, %v2044_v29 }
 0x2ab   : > { %v2846_v9 = vpop.f32.mrf.mxu3  ;;  %3485 = vst [vmem:[%s5512_s29 + $0x20] sm:$0xff] %v3437_v61  ;;  %v2574_v25 = vadd.f32 %v2440_v33, %v2352_v59  ;;  %v2221_v6 = vpop.f32.mrf.mxu1  ;;  %v2669_v59 = vsel %vm2620_vm5, %v2666_v49, %v2668_v3  ;;  %v3075_v33 = vsel %vm3026_vm6, %v3072_v19, %v3074_v20 }
 0x2ac   : > { %v2353_v16 = vadd.f32 %v2221_v6, %v5009_v0 }
 0x2ad   : > { %v2980_v62 = vadd.f32 %v2846_v9, %v2574_v25  ;;  %v4179_v25 = vld [vmem:[%s4363_s23 + $0xe8] sm:$0xff] }
 0x2ae   : > { %3898 = vmatmul.msk.f32.gmra.mxu1 %vm440_vm1, %v2039_v52  ;;  %v3255_v56 = vpop.f32.mrf.mxu0  ;;  %v2046_v6 = vrot.slane %v4179_v25, 4 }
 0x2af   : > { %v3386_v28 = vadd.f32 %v3252_v32, %v2980_v62  ;;  %3948 = vmatmul.msk.f32.gmra.mxu2 %vm440_vm1, %v2043_v45 }
 0x2b0   : > { %3998 = vmatmul.msk.f32.gmra.mxu3 %vm440_vm1, %v2667_v42  ;;  %v2670_v42 = vrot.slane %v4179_v25, 5 }
 0x2b1   : > { %v3438_v24 = vadd.f32 %v5502_v2, %v3386_v28  ;;  %4048 = vmatmul.msk.f32.gmra.mxu0 %vm440_vm1, %v3073_v13  ;;  %v3076_v13 = vrot.slane %v4179_v25, 6  ;;  %v2047_v28 = vsel %vm1992_vm4, %v2044_v29, %v2046_v6 }
 0x2b2   : > { %v2443_v11 = vpop.f32.mrf.mxu2  ;;  %v2671_v5 = vsel %vm2620_vm5, %v2668_v3, %v2670_v42 }
 0x2b3   : > { %v2849_v52 = vpop.f32.mrf.mxu3  ;;  %3486 = vst [vmem:[%s5512_s29 + $0x28] sm:$0xff] %v3438_v24  ;;  %v2575_v36 = vadd.f32 %v2443_v11, %v2353_v16  ;;  %v2224_v32 = vpop.f32.mrf.mxu1  ;;  %v3077_v24 = vsel %vm3026_vm6, %v3074_v20, %v3076_v13 }
 0x2b4   : > { %v2354_v62 = vadd.f32 %v2224_v32, %v5021_v18 }
 0x2b5   : > { %v2981_v61 = vadd.f32 %v2849_v52, %v2575_v36  ;;  %v4180_v52 = vld [vmem:[%s4363_s23 + $0xf0] sm:$0xff] }
 0x2b6   : > { %3899 = vmatmul.msk.f32.gmra.mxu1 %vm440_vm1, %v2041_v43  ;;  %v3258_v0 = vpop.f32.mrf.mxu0  ;;  %v2048_v36 = vrot.slane %v4180_v52, 4  ;;  %v2672_v32 = vrot.slane %v4180_v52, 5 }
 0x2b7   : > { %v3387_v9 = vadd.f32 %v3255_v56, %v2981_v61  ;;  %3949 = vmatmul.msk.f32.gmra.mxu2 %vm440_vm1, %v2045_v1  ;;  %v3078_v61 = vrot.slane %v4180_v52, 6 }
 0x2b8   : > { %3999 = vmatmul.msk.f32.gmra.mxu3 %vm440_vm1, %v2669_v59 }
 0x2b9   : > { %v3439_v40 = vadd.f32 %v5502_v2, %v3387_v9  ;;  %4049 = vmatmul.msk.f32.gmra.mxu0 %vm440_vm1, %v3075_v33  ;;  %v2049_v33 = vsel %vm1992_vm4, %v2046_v6, %v2048_v36  ;;  %v2673_v9 = vsel %vm2620_vm5, %v2670_v42, %v2672_v32 }
 0x2ba   : > { %v2446_v49 = vpop.f32.mrf.mxu2 }
 0x2bb   : > { %v2852_v43 = vpop.f32.mrf.mxu3  ;;  %3487 = vst [vmem:[%s5512_s29 + $0x30] sm:$0xff] %v3439_v40  ;;  %v2576_v19 = vadd.f32 %v2446_v49, %v2354_v62  ;;  %v2227_v56 = vpop.f32.mrf.mxu1  ;;  %v3079_v62 = vsel %vm3026_vm6, %v3076_v13, %v3078_v61  ;;  %v4181_v49 = vld [vmem:[%s4363_s23 + $0xf8] sm:$0xff] }
 0x2bc   : > { %v2355_v59 = vadd.f32 %v2227_v56, %v5033_v35 }
 0x2bd   : > { %v2982_v16 = vadd.f32 %v2852_v43, %v2576_v19  ;;  %v2050_v43 = vrot.slane %v4181_v49, 4  ;;  %v2674_v19 = vrot.slane %v4181_v49, 5 }
 0x2be   : > { %3900 = vmatmul.msk.f32.gmra.mxu1 %vm440_vm1, %v2043_v45  ;;  %v3261_v18 = vpop.f32.mrf.mxu0 }
 0x2bf   : > { %v3388_v11 = vadd.f32 %v3258_v0, %v2982_v16  ;;  %3950 = vmatmul.msk.f32.gmra.mxu2 %vm440_vm1, %v2047_v28 }
 0x2c0   : > { %4000 = vmatmul.msk.f32.gmra.mxu3 %vm440_vm1, %v2671_v5  ;;  %v3080_v5 = vrot.slane %v4181_v49, 6 }
 0x2c1   : > { %v3440_v29 = vadd.f32 %v5502_v2, %v3388_v11  ;;  %4050 = vmatmul.msk.f32.gmra.mxu0 %vm440_vm1, %v3077_v24  ;;  %v2675_v24 = vsel %vm2620_vm5, %v2672_v32, %v2674_v19 }
 0x2c2   : > { %v2449_v3 = vpop.f32.mrf.mxu2  ;;  %v3081_v52 = vsel %vm3026_vm6, %v3078_v61, %v3080_v5 }
 0x2c3   : > { %v2855_v45 = vpop.f32.mrf.mxu3  ;;  %3488 = vst [vmem:[%s5512_s29 + $0x38] sm:$0xff] %v3440_v29  ;;  %v2577_v20 = vadd.f32 %v2449_v3, %v2355_v59  ;;  %v2230_v0 = vpop.f32.mrf.mxu1  ;;  %v4182_v29 = vld [vmem:[%s4363_s23 + $0x100] sm:$0xff] }
 0x2c4   : > { %v2356_v56 = vadd.f32 %v2230_v0, %v5045_v8  ;;  %v2052_v3 = vrot.slane %v4182_v29, 4  ;;  %v3082_v0 = vrot.slane %v4182_v29, 6 }
 0x2c5   : > { %v2983_v25 = vadd.f32 %v2855_v45, %v2577_v20  ;;  %v2676_v45 = vrot.slane %v4182_v29, 5  ;;  %v4184_v29 = vld [vmem:[%s4363_s23 + $0x110] sm:$0xff] }
 0x2c6   : > { %3901 = vmatmul.msk.f32.gmra.mxu1 %vm440_vm1, %v2045_v1  ;;  %v3264_v35 = vpop.f32.mrf.mxu0 }
 0x2c7   : > { %v3389_v40 = vadd.f32 %v3261_v18, %v2983_v25  ;;  %3951 = vmatmul.msk.f32.gmra.mxu2 %vm440_vm1, %v2049_v33  ;;  %v2051_v18 = vsel %vm1992_vm4, %v2048_v36, %v2050_v43  ;;  %v2053_v25 = vsel %vm1992_vm4, %v2050_v43, %v2052_v3 }
 0x2c8   : > { %4001 = vmatmul.msk.f32.gmra.mxu3 %vm440_vm1, %v2673_v9 }
 0x2c9   : > { %v3441_v6 = vadd.f32 %v5502_v2, %v3389_v40  ;;  %4051 = vmatmul.msk.f32.gmra.mxu0 %vm440_vm1, %v3079_v62  ;;  %v3083_v40 = vsel %vm3026_vm6, %v3080_v5, %v3082_v0 }
 0x2ca   : > { %v2452_v42 = vpop.f32.mrf.mxu2 }
 0x2cb   : > { %v2858_v1 = vpop.f32.mrf.mxu3  ;;  %3489 = vst [vmem:[%s5512_s29 + $0x40] sm:$0xff] %v3441_v6  ;;  %v2578_v13 = vadd.f32 %v2452_v42, %v2356_v56  ;;  %v2233_v16 = vpop.f32.mrf.mxu1  ;;  %v4183_v56 = vld [vmem:[%s4363_s23 + $0x108] sm:$0xff] }
 0x2cc   : > { %v2357_v20 = vadd.f32 %v2233_v16, %v5057_v17  ;;  %v2054_v6 = vrot.slane %v4183_v56, 4  ;;  %v2678_v42 = vrot.slane %v4183_v56, 5 }
 0x2cd   : > { %v2984_v11 = vadd.f32 %v2858_v1, %v2578_v13  ;;  %v3084_v13 = vrot.slane %v4183_v56, 6 }
 0x2ce   : > { %3902 = vmatmul.msk.f32.gmra.mxu1 %vm440_vm1, %v2047_v28  ;;  %v3267_v8 = vpop.f32.mrf.mxu0 }
 0x2cf   : > { %v3390_v59 = vadd.f32 %v3264_v35, %v2984_v11  ;;  %3952 = vmatmul.msk.f32.gmra.mxu2 %vm440_vm1, %v2051_v18  ;;  %v2677_v35 = vsel %vm2620_vm5, %v2674_v19, %v2676_v45  ;;  %v2679_v11 = vsel %vm2620_vm5, %v2676_v45, %v2678_v42 }
 0x2d0   : > { %4002 = vmatmul.msk.f32.gmra.mxu3 %vm440_vm1, %v2675_v24  ;;  %v2055_v24 = vsel %vm1992_vm4, %v2052_v3, %v2054_v6 }
 0x2d1   : > { %v3442_v36 = vadd.f32 %v5502_v2, %v3390_v59  ;;  %4052 = vmatmul.msk.f32.gmra.mxu0 %vm440_vm1, %v3081_v52  ;;  %v3085_v52 = vsel %vm3026_vm6, %v3082_v0, %v3084_v13 }
 0x2d2   : > { %v2455_v32 = vpop.f32.mrf.mxu2 }
 0x2d3   : > { %v2861_v28 = vpop.f32.mrf.mxu3  ;;  %3490 = vst [vmem:[%s5512_s29 + $0x48] sm:$0xff] %v3442_v36  ;;  %v2579_v61 = vadd.f32 %v2455_v32, %v2357_v20  ;;  %v2236_v9 = vpop.f32.mrf.mxu1  ;;  %v2056_v20 = vrot.slane %v4184_v29, 4  ;;  %v2680_v36 = vrot.slane %v4184_v29, 5 }
 0x2d4   : > { %v2358_v1 = vadd.f32 %v2236_v9, %v5069_v7 }
 0x2d5   : > { %v2985_v62 = vadd.f32 %v2861_v28, %v2579_v61  ;;  %v3086_v28 = vrot.slane %v4184_v29, 6  ;;  %v2057_v9 = vsel %vm1992_vm4, %v2054_v6, %v2056_v20 }
 0x2d6   : > { %3903 = vmatmul.msk.f32.gmra.mxu1 %vm440_vm1, %v2049_v33  ;;  %v3270_v17 = vpop.f32.mrf.mxu0 }
 0x2d7   : > { %v3391_v49 = vadd.f32 %v3267_v8, %v2985_v62  ;;  %3953 = vmatmul.msk.f32.gmra.mxu2 %vm440_vm1, %v2053_v25 }
 0x2d8   : > { %4003 = vmatmul.msk.f32.gmra.mxu3 %vm440_vm1, %v2677_v35  ;;  %v2681_v35 = vsel %vm2620_vm5, %v2678_v42, %v2680_v36 }
 0x2d9   : > { %v3443_v43 = vadd.f32 %v5502_v2, %v3391_v49  ;;  %4053 = vmatmul.msk.f32.gmra.mxu0 %vm440_vm1, %v3083_v40  ;;  %v4185_v49 = vld [vmem:[%s4363_s23 + $0x118] sm:$0xff] }
 0x2da   : > { %v2458_v19 = vpop.f32.mrf.mxu2  ;;  %v2058_v56 = vrot.slane %v4185_v49, 4 }
 0x2db   : > { %v2864_v33 = vpop.f32.mrf.mxu3  ;;  %3491 = vst [vmem:[%s5512_s29 + $0x50] sm:$0xff] %v3443_v43  ;;  %v2580_v5 = vadd.f32 %v2458_v19, %v2358_v1  ;;  %v2239_v16 = vpop.f32.mrf.mxu1  ;;  %v2682_v1 = vrot.slane %v4185_v49, 5  ;;  %v3088_v19 = vrot.slane %v4185_v49, 6 }
 0x2dc   : > { %v2359_v32 = vadd.f32 %v2239_v16, %v5081_v58 }
 0x2dd   : > { %v2986_v8 = vadd.f32 %v2864_v33, %v2580_v5  ;;  %v2059_v5 = vsel %vm1992_vm4, %v2056_v20, %v2058_v56  ;;  %v2683_v16 = vsel %vm2620_vm5, %v2680_v36, %v2682_v1 }
 0x2de   : > { %3904 = vmatmul.msk.f32.gmra.mxu1 %vm440_vm1, %v2051_v18  ;;  %v3273_v7 = vpop.f32.mrf.mxu0 }
 0x2df   : > { %v3392_v59 = vadd.f32 %v3270_v17, %v2986_v8  ;;  %3954 = vmatmul.msk.f32.gmra.mxu2 %vm440_vm1, %v2055_v24  ;;  %v3087_v17 = vsel %vm3026_vm6, %v3084_v13, %v3086_v28  ;;  %v3089_v8 = vsel %vm3026_vm6, %v3086_v28, %v3088_v19 }
 0x2e0   : > { %4004 = vmatmul.msk.f32.gmra.mxu3 %vm440_vm1, %v2679_v11 }
 0x2e1   : > { %v3444_v3 = vadd.f32 %v5502_v2, %v3392_v59  ;;  %4054 = vmatmul.msk.f32.gmra.mxu0 %vm440_vm1, %v3085_v52  ;;  %v4186_v52 = vld [vmem:[%s4363_s23 + $0x120] sm:$0xff] }
 0x2e2   : > { %v2461_v45 = vpop.f32.mrf.mxu2  ;;  %v2060_v59 = vrot.slane %v4186_v52, 4  ;;  %v2684_v29 = vrot.slane %v4186_v52, 5 }
 0x2e3   : > { %v2867_v18 = vpop.f32.mrf.mxu3  ;;  %3492 = vst [vmem:[%s5512_s29 + $0x58] sm:$0xff] %v3444_v3  ;;  %v2581_v0 = vadd.f32 %v2461_v45, %v2359_v32  ;;  %v2242_v61 = vpop.f32.mrf.mxu1  ;;  %v3090_v3 = vrot.slane %v4186_v52, 6 }
 0x2e4   : > { %v2360_v43 = vadd.f32 %v2242_v61, %v5093_v44  ;;  %v2061_v28 = vsel %vm1992_vm4, %v2058_v56, %v2060_v59 }
 0x2e5   : > { %v2987_v62 = vadd.f32 %v2867_v18, %v2581_v0  ;;  %v2685_v0 = vsel %vm2620_vm5, %v2682_v1, %v2684_v29 }
 0x2e6   : > { %3905 = vmatmul.msk.f32.gmra.mxu1 %vm440_vm1, %v2053_v25  ;;  %v3276_v58 = vpop.f32.mrf.mxu0 }
 0x2e7   : > { %v3393_v40 = vadd.f32 %v3273_v7, %v2987_v62  ;;  %3955 = vmatmul.msk.f32.gmra.mxu2 %vm440_vm1, %v2057_v9 }
 0x2e8   : > { %4005 = vmatmul.msk.f32.gmra.mxu3 %vm440_vm1, %v2681_v35  ;;  %v3091_v35 = vsel %vm3026_vm6, %v3088_v19, %v3090_v3 }
 0x2e9   : > { %v3445_v6 = vadd.f32 %v5502_v2, %v3393_v40  ;;  %4055 = vmatmul.msk.f32.gmra.mxu0 %vm440_vm1, %v3087_v17 }
 0x2ea   : > { %v2464_v42 = vpop.f32.mrf.mxu2 }
 0x2eb   : > { %v2870_v25 = vpop.f32.mrf.mxu3  ;;  %3493 = vst [vmem:[%s5512_s29 + $0x60] sm:$0xff] %v3445_v6  ;;  %v2582_v33 = vadd.f32 %v2464_v42, %v2360_v43  ;;  %v2245_v13 = vpop.f32.mrf.mxu1 }
 0x2ec   : > { %v2361_v32 = vadd.f32 %v2245_v13, %v5105_v41 }
 0x2ed   : > { %v2988_v11 = vadd.f32 %v2870_v25, %v2582_v33 }
 0x2ee   : > { %3906 = vmatmul.msk.f32.gmra.mxu1 %vm440_vm1, %v2055_v24  ;;  %v3279_v44 = vpop.f32.mrf.mxu0 }
 0x2ef   : > { %v3394_v7 = vadd.f32 %v3276_v58, %v2988_v11  ;;  %3956 = vmatmul.msk.f32.gmra.mxu2 %vm440_vm1, %v2059_v5  ;;  %v4187_v58 = vld [vmem:[%s4363_s23 + $0x128] sm:$0xff]  ;;  %v4188_v11 = vld [vmem:[%s4363_s23 + $0x130] sm:$0xff] }
 0x2f0   : > { %4006 = vmatmul.msk.f32.gmra.mxu3 %vm440_vm1, %v2683_v16  ;;  %v2062_v17 = vrot.slane %v4187_v58, 4  ;;  %v2686_v40 = vrot.slane %v4187_v58, 5  ;;  %v3092_v43 = vrot.slane %v4187_v58, 6 }
 0x2f1   : > { %v3446_v20 = vadd.f32 %v5502_v2, %v3394_v7  ;;  %4056 = vmatmul.msk.f32.gmra.mxu0 %vm440_vm1, %v3089_v8  ;;  %v2688_v8 = vrot.slane %v4188_v11, 5 }
 0x2f2   : > { %v2467_v36 = vpop.f32.mrf.mxu2  ;;  %v2063_v25 = vsel %vm1992_vm4, %v2060_v59, %v2062_v17  ;;  %v2687_v19 = vsel %vm2620_vm5, %v2684_v29, %v2686_v40  ;;  %v3093_v13 = vsel %vm3026_vm6, %v3090_v3, %v3092_v43  ;;  %v3094_v29 = vrot.slane %v4188_v11, 6 }
 0x2f3   : > { %v2873_v24 = vpop.f32.mrf.mxu3  ;;  %3494 = vst [vmem:[%s5512_s29 + $0x68] sm:$0xff] %v3446_v20  ;;  %v2583_v45 = vadd.f32 %v2467_v36, %v2361_v32  ;;  %v2248_v18 = vpop.f32.mrf.mxu1 }
 0x2f4   : > { %v2362_v49 = vadd.f32 %v2248_v18, %v5117_v4 }
 0x2f5   : > { %v2989_v61 = vadd.f32 %v2873_v24, %v2583_v45  ;;  %v2689_v24 = vsel %vm2620_vm5, %v2686_v40, %v2688_v8  ;;  %v3095_v45 = vsel %vm3026_vm6, %v3092_v43, %v3094_v29 }
 0x2f6   : > { %3907 = vmatmul.msk.f32.gmra.mxu1 %vm440_vm1, %v2057_v9  ;;  %v3282_v41 = vpop.f32.mrf.mxu0 }
 0x2f7   : > { %v3395_v62 = vadd.f32 %v3279_v44, %v2989_v61  ;;  %3957 = vmatmul.msk.f32.gmra.mxu2 %vm440_vm1, %v2061_v28  ;;  %v2064_v44 = vrot.slane %v4188_v11, 4 }
 0x2f8   : > { %4007 = vmatmul.msk.f32.gmra.mxu3 %vm440_vm1, %v2685_v0  ;;  %v4189_v0 = vld [vmem:[%s4363_s23 + $0x138] sm:$0xff] }
 0x2f9   : > { %v3447_v56 = vadd.f32 %v5502_v2, %v3395_v62  ;;  %4057 = vmatmul.msk.f32.gmra.mxu0 %vm440_vm1, %v3091_v35  ;;  %v2065_v36 = vsel %vm1992_vm4, %v2062_v17, %v2064_v44  ;;  %v2066_v61 = vrot.slane %v4189_v0, 4  ;;  %v3096_v17 = vrot.slane %v4189_v0, 6 }
 0x2fa   : > { %v2470_v1 = vpop.f32.mrf.mxu2 }
 0x2fb   : > { %v2876_v9 = vpop.f32.mrf.mxu3  ;;  %3495 = vst [vmem:[%s5512_s29 + $0x70] sm:$0xff] %v3447_v56  ;;  %v2584_v6 = vadd.f32 %v2470_v1, %v2362_v49  ;;  %v2251_v42 = vpop.f32.mrf.mxu1  ;;  %v2067_v56 = vsel %vm1992_vm4, %v2064_v44, %v2066_v61  ;;  %v3097_v43 = vsel %vm3026_vm6, %v3094_v29, %v3096_v17 }
 0x2fc   : > { %v2363_v7 = vadd.f32 %v2251_v42, %v5132_v30  ;;  %v4190_v42 = vld [vmem:[%s4363_s23 + $0x140] sm:$0xff] }
 0x2fd   : > { %v2990_v33 = vadd.f32 %v2876_v9, %v2584_v6  ;;  %v3098_v11 = vrot.slane %v4190_v42, 6 }
 0x2fe   : > { %3908 = vmatmul.msk.f32.gmra.mxu1 %vm440_vm1, %v2059_v5  ;;  %v3285_v4 = vpop.f32.mrf.mxu0 }
 0x2ff   : > { %v3396_v16 = vadd.f32 %v3282_v41, %v2990_v33  ;;  %3958 = vmatmul.msk.f32.gmra.mxu2 %vm440_vm1, %v2063_v25  ;;  %v2690_v41 = vrot.slane %v4189_v0, 5  ;;  %v2692_v33 = vrot.slane %v4190_v42, 5 }
 0x300   : > { %4008 = vmatmul.msk.f32.gmra.mxu3 %vm440_vm1, %v2687_v19  ;;  %v2068_v19 = vrot.slane %v4190_v42, 4 }
 0x301   : > { %v3448_v52 = vadd.f32 %v5502_v2, %v3396_v16  ;;  %4058 = vmatmul.msk.f32.gmra.mxu0 %vm440_vm1, %v3093_v13  ;;  %v2691_v1 = vsel %vm2620_vm5, %v2688_v8, %v2690_v41 }
 0x302   : > { %v2473_v59 = vpop.f32.mrf.mxu2 }
 0x303   : > { %v2879_v5 = vpop.f32.mrf.mxu3  ;;  %3496 = vst [vmem:[%s5512_s29 + $0x78] sm:$0xff] %v3448_v52  ;;  %v2585_v32 = vadd.f32 %v2473_v59, %v2363_v7  ;;  %v2254_v20 = vpop.f32.mrf.mxu1  ;;  %v2069_v7 = vsel %vm1992_vm4, %v2066_v61, %v2068_v19  ;;  %v2693_v52 = vsel %vm2620_vm5, %v2690_v41, %v2692_v33 }
 0x304   : > { %v2364_v35 = vadd.f32 %v2254_v20, %v5147_v53 }
 0x305   : > { %v2991_v3 = vadd.f32 %v2879_v5, %v2585_v32  ;;  %v3099_v5 = vsel %vm3026_vm6, %v3096_v17, %v3098_v11  ;;  %v4191_v32 = vld [vmem:[%s4363_s23 + $0x148] sm:$0xff]  ;;  %v4192_v17 = vld [vmem:[%s4363_s23 + $0x150] sm:$0xff] }
 0x306   : > { %3909 = vmatmul.msk.f32.gmra.mxu1 %vm440_vm1, %v2061_v28  ;;  %v3288_v30 = vpop.f32.mrf.mxu0  ;;  %v2070_v20 = vrot.slane %v4191_v32, 4 }
 0x307   : > { %v3397_v18 = vadd.f32 %v3285_v4, %v2991_v3  ;;  %3959 = vmatmul.msk.f32.gmra.mxu2 %vm440_vm1, %v2065_v36 }
 0x308   : > { %4009 = vmatmul.msk.f32.gmra.mxu3 %vm440_vm1, %v2689_v24  ;;  %v2694_v24 = vrot.slane %v4191_v32, 5  ;;  %v2071_v41 = vsel %vm1992_vm4, %v2068_v19, %v2070_v20 }
 0x309   : > { %v3449_v62 = vadd.f32 %v5502_v2, %v3397_v18  ;;  %4059 = vmatmul.msk.f32.gmra.mxu0 %vm440_vm1, %v3095_v45  ;;  %v3100_v18 = vrot.slane %v4191_v32, 6 }
 0x30a   : > { %v2476_v58 = vpop.f32.mrf.mxu2 }
 0x30b   : > { %v2882_v28 = vpop.f32.mrf.mxu3  ;;  %3497 = vst [vmem:[%s5512_s29 + $0x80] sm:$0xff] %v3449_v62  ;;  %v2586_v40 = vadd.f32 %v2476_v58, %v2364_v35  ;;  %v2257_v49 = vpop.f32.mrf.mxu1  ;;  %v2695_v35 = vsel %vm2620_vm5, %v2692_v33, %v2694_v24  ;;  %v3101_v58 = vsel %vm3026_vm6, %v3098_v11, %v3100_v18 }
 0x30c   : > { %v2365_v4 = vadd.f32 %v2257_v49, %v5162_v57  ;;  %v2696_v49 = vrot.slane %v4192_v17, 5 }
 0x30d   : > { %v2992_v9 = vadd.f32 %v2882_v28, %v2586_v40  ;;  %v2072_v40 = vrot.slane %v4192_v17, 4 }
 0x30e   : > { %3910 = vmatmul.msk.f32.gmra.mxu1 %vm440_vm1, %v2063_v25  ;;  %v3291_v53 = vpop.f32.mrf.mxu0  ;;  %v2697_v33 = vsel %vm2620_vm5, %v2694_v24, %v2696_v49 }
 0x30f   : > { %v3398_v6 = vadd.f32 %v3288_v30, %v2992_v9  ;;  %3960 = vmatmul.msk.f32.gmra.mxu2 %vm440_vm1, %v2067_v56  ;;  %v2073_v19 = vsel %vm1992_vm4, %v2070_v20, %v2072_v40 }
 0x310   : > { %4010 = vmatmul.msk.f32.gmra.mxu3 %vm440_vm1, %v2691_v1 }
 0x311   : > { %v3450_v13 = vadd.f32 %v5502_v2, %v3398_v6  ;;  %4060 = vmatmul.msk.f32.gmra.mxu0 %vm440_vm1, %v3097_v43  ;;  %v3102_v43 = vrot.slane %v4192_v17, 6 }
 0x312   : > { %v2479_v16 = vpop.f32.mrf.mxu2 }
 0x313   : > { %v2885_v25 = vpop.f32.mrf.mxu3  ;;  %3498 = vst [vmem:[%s5512_s29 + $0x88] sm:$0xff] %v3450_v13  ;;  %v2587_v44 = vadd.f32 %v2479_v16, %v2365_v4  ;;  %v2260_v8 = vpop.f32.mrf.mxu1  ;;  %v3103_v13 = vsel %vm3026_vm6, %v3100_v18, %v3102_v43 }
 0x314   : > { %v2366_v3 = vadd.f32 %v2260_v8, %v5173_v51 }
 0x315   : > { %v2993_v59 = vadd.f32 %v2885_v25, %v2587_v44  ;;  %v4193_v25 = vld [vmem:[%s4363_s23 + $0x158] sm:$0xff] }
 0x316   : > { %3911 = vmatmul.msk.f32.gmra.mxu1 %vm440_vm1, %v2065_v36  ;;  %v3294_v57 = vpop.f32.mrf.mxu0  ;;  %v2074_v11 = vrot.slane %v4193_v25, 4  ;;  %v2698_v44 = vrot.slane %v4193_v25, 5 }
 0x317   : > { %v3399_v29 = vadd.f32 %v3291_v53, %v2993_v59  ;;  %3961 = vmatmul.msk.f32.gmra.mxu2 %vm440_vm1, %v2069_v7 }
 0x318   : > { %4011 = vmatmul.msk.f32.gmra.mxu3 %vm440_vm1, %v2693_v52  ;;  %v2075_v32 = vsel %vm1992_vm4, %v2072_v40, %v2074_v11  ;;  %v2699_v20 = vsel %vm2620_vm5, %v2696_v49, %v2698_v44 }
 0x319   : > { %v3451_v30 = vadd.f32 %v5502_v2, %v3399_v29  ;;  %4061 = vmatmul.msk.f32.gmra.mxu0 %vm440_vm1, %v3099_v5 }
 0x31a   : > { %v2482_v45 = vpop.f32.mrf.mxu2 }
 0x31b   : > { %v2888_v36 = vpop.f32.mrf.mxu3  ;;  %3499 = vst [vmem:[%s5512_s29 + $0x90] sm:$0xff] %v3451_v30  ;;  %v2588_v0 = vadd.f32 %v2482_v45, %v2366_v3  ;;  %v2263_v61 = vpop.f32.mrf.mxu1  ;;  %v4194_v45 = vld [vmem:[%s4363_s23 + $0x160] sm:$0xff] }
 0x31c   : > { %v2367_v1 = vadd.f32 %v2263_v61, %v5184_v55  ;;  %v2700_v18 = vrot.slane %v4194_v45, 5 }
 0x31d   : > { %v2994_v62 = vadd.f32 %v2888_v36, %v2588_v0  ;;  %v2076_v36 = vrot.slane %v4194_v45, 4 }
 0x31e   : > { %3912 = vmatmul.msk.f32.gmra.mxu1 %vm440_vm1, %v2067_v56  ;;  %v3297_v51 = vpop.f32.mrf.mxu0  ;;  %v2701_v17 = vsel %vm2620_vm5, %v2698_v44, %v2700_v18 }
 0x31f   : > { %v3400_v28 = vadd.f32 %v3294_v57, %v2994_v62  ;;  %3962 = vmatmul.msk.f32.gmra.mxu2 %vm440_vm1, %v2071_v41  ;;  %v3104_v57 = vrot.slane %v4193_v25, 6  ;;  %v3106_v62 = vrot.slane %v4194_v45, 6 }
 0x320   : > { %4012 = vmatmul.msk.f32.gmra.mxu3 %vm440_vm1, %v2695_v35 }
 0x321   : > { %v3452_v9 = vadd.f32 %v5502_v2, %v3400_v28  ;;  %4062 = vmatmul.msk.f32.gmra.mxu0 %vm440_vm1, %v3101_v58  ;;  %v3105_v3 = vsel %vm3026_vm6, %v3102_v43, %v3104_v57  ;;  %v2077_v28 = vsel %vm1992_vm4, %v2074_v11, %v2076_v36  ;;  %v3107_v49 = vsel %vm3026_vm6, %v3104_v57, %v3106_v62 }
 0x322   : > { %v2485_v53 = vpop.f32.mrf.mxu2 }
 0x323   : > { %v2891_v56 = vpop.f32.mrf.mxu3  ;;  %3500 = vst [vmem:[%s5512_s29 + $0x98] sm:$0xff] %v3452_v9  ;;  %v2589_v6 = vadd.f32 %v2485_v53, %v2367_v1  ;;  %v2266_v42 = vpop.f32.mrf.mxu1  ;;  %v4195_v9 = vld [vmem:[%s4363_s23 + $0x168] sm:$0xff] }
 0x324   : > { %v2368_v8 = vadd.f32 %v2266_v42, %v5195_v63  ;;  %v2078_v53 = vrot.slane %v4195_v9, 4 }
 0x325   : > { %v2995_v4 = vadd.f32 %v2891_v56, %v2589_v6  ;;  %v2702_v56 = vrot.slane %v4195_v9, 5 }
 0x326   : > { %3913 = vmatmul.msk.f32.gmra.mxu1 %vm440_vm1, %v2069_v7  ;;  %v3300_v55 = vpop.f32.mrf.mxu0 }
 0x327   : > { %v3401_v16 = vadd.f32 %v3297_v51, %v2995_v4  ;;  %3963 = vmatmul.msk.f32.gmra.mxu2 %vm440_vm1, %v2073_v19 }
 0x328   : > { %4013 = vmatmul.msk.f32.gmra.mxu3 %vm440_vm1, %v2697_v33  ;;  %v3108_v33 = vrot.slane %v4195_v9, 6 }
 0x329   : > { %v3453_v52 = vadd.f32 %v5502_v2, %v3401_v16  ;;  %4063 = vmatmul.msk.f32.gmra.mxu0 %vm440_vm1, %v3103_v13  ;;  %v2079_v13 = vsel %vm1992_vm4, %v2076_v36, %v2078_v53  ;;  %v2703_v16 = vsel %vm2620_vm5, %v2700_v18, %v2702_v56  ;;  %v4197_v18 = vld [vmem:[%s4363_s23 + $0x178] sm:$0xff] }
 0x32a   : > { %v2488_v59 = vpop.f32.mrf.mxu2  ;;  %v3109_v11 = vsel %vm3026_vm6, %v3106_v62, %v3108_v33 }
 0x32b   : > { %v2894_v7 = vpop.f32.mrf.mxu3  ;;  %3501 = vst [vmem:[%s5512_s29 + $0xa0] sm:$0xff] %v3453_v52  ;;  %v2590_v5 = vadd.f32 %v2488_v59, %v2368_v8  ;;  %v2269_v29 = vpop.f32.mrf.mxu1  ;;  %v4196_v8 = vld [vmem:[%s4363_s23 + $0x170] sm:$0xff] }
 0x32c   : > { %v2369_v0 = vadd.f32 %v2269_v29, %v5205_v15  ;;  %v2080_v52 = vrot.slane %v4196_v8, 4  ;;  %v2704_v59 = vrot.slane %v4196_v8, 5 }
 0x32d   : > { %v2996_v24 = vadd.f32 %v2894_v7, %v2590_v5 }
 0x32e   : > { %3914 = vmatmul.msk.f32.gmra.mxu1 %vm440_vm1, %v2071_v41  ;;  %v3303_v63 = vpop.f32.mrf.mxu0 }
 0x32f   : > { %v3402_v30 = vadd.f32 %v3300_v55, %v2996_v24  ;;  %3964 = vmatmul.msk.f32.gmra.mxu2 %vm440_vm1, %v2075_v32 }
 0x330   : > { %4014 = vmatmul.msk.f32.gmra.mxu3 %vm440_vm1, %v2699_v20 }
 0x331   : > { %v3454_v61 = vadd.f32 %v5502_v2, %v3402_v30  ;;  %4064 = vmatmul.msk.f32.gmra.mxu0 %vm440_vm1, %v3105_v3  ;;  %v2705_v3 = vsel %vm2620_vm5, %v2702_v56, %v2704_v59 }
 0x332   : > { %v2491_v35 = vpop.f32.mrf.mxu2 }
 0x333   : > { %v2897_v41 = vpop.f32.mrf.mxu3  ;;  %3502 = vst [vmem:[%s5512_s29 + $0xa8] sm:$0xff] %v3454_v61  ;;  %v2591_v51 = vadd.f32 %v2491_v35, %v2369_v0  ;;  %v2272_v58 = vpop.f32.mrf.mxu1  ;;  %v2082_v0 = vrot.slane %v4197_v18, 4  ;;  %v2706_v61 = vrot.slane %v4197_v18, 5 }
 0x334   : > { %v2370_v43 = vadd.f32 %v2272_v58, %v5215_v54  ;;  %v3112_v58 = vrot.slane %v4197_v18, 6 }
 0x335   : > { %v2997_v40 = vadd.f32 %v2897_v41, %v2591_v51 }
 0x336   : > { %3915 = vmatmul.msk.f32.gmra.mxu1 %vm440_vm1, %v2073_v19  ;;  %v3306_v15 = vpop.f32.mrf.mxu0 }
 0x337   : > { %v3403_v1 = vadd.f32 %v3303_v63, %v2997_v40  ;;  %3965 = vmatmul.msk.f32.gmra.mxu2 %vm440_vm1, %v2077_v28  ;;  %v2081_v63 = vsel %vm1992_vm4, %v2078_v53, %v2080_v52  ;;  %v2083_v40 = vsel %vm1992_vm4, %v2080_v52, %v2082_v0  ;;  %v4198_v53 = vld [vmem:[%s4638_s6] sm:$0xff] }
 0x338   : > { %4015 = vmatmul.msk.f32.gmra.mxu3 %vm440_vm1, %v2701_v17  ;;  %v2084_v56 = vrot.slane %v4198_v53, 4 }
 0x339   : > { %v3455_v6 = vadd.f32 %v5502_v2, %v3403_v1  ;;  %4065 = vmatmul.msk.f32.gmra.mxu0 %vm440_vm1, %v3107_v49 }
 0x33a   : > { %v2494_v42 = vpop.f32.mrf.mxu2 }
 0x33b   : > { %v2900_v19 = vpop.f32.mrf.mxu3  ;;  %3503 = vst [vmem:[%s5512_s29 + $0xb0] sm:$0xff] %v3455_v6  ;;  %v2592_v4 = vadd.f32 %v2494_v42, %v2370_v43  ;;  %v2275_v55 = vpop.f32.mrf.mxu1  ;;  %v2708_v43 = vrot.slane %v4198_v53, 5 }
 0x33c   : > { %v2371_v7 = vadd.f32 %v2275_v55, %v5225_v31 }
 0x33d   : > { %v2998_v25 = vadd.f32 %v2900_v19, %v2592_v4  ;;  %v3114_v4 = vrot.slane %v4198_v53, 6 }
 0x33e   : > { %3916 = vmatmul.msk.f32.gmra.mxu1 %vm440_vm1, %v2075_v32  ;;  %v3309_v54 = vpop.f32.mrf.mxu0  ;;  %v3110_v32 = vrot.slane %v4196_v8, 6 }
 0x33f   : > { %v3404_v44 = vadd.f32 %v3306_v15, %v2998_v25  ;;  %3966 = vmatmul.msk.f32.gmra.mxu2 %vm440_vm1, %v2079_v13  ;;  %v2707_v15 = vsel %vm2620_vm5, %v2704_v59, %v2706_v61  ;;  %v2709_v25 = vsel %vm2620_vm5, %v2706_v61, %v2708_v43 }
 0x340   : > { %4016 = vmatmul.msk.f32.gmra.mxu3 %vm440_vm1, %v2703_v16  ;;  %v3111_v45 = vsel %vm3026_vm6, %v3108_v33, %v3110_v32  ;;  %v3113_v1 = vsel %vm3026_vm6, %v3110_v32, %v3112_v58  ;;  %v2085_v16 = vsel %vm1992_vm4, %v2082_v0, %v2084_v56 }
 0x341   : > { %v3456_v57 = vadd.f32 %v5502_v2, %v3404_v44  ;;  %4066 = vmatmul.msk.f32.gmra.mxu0 %vm440_vm1, %v3109_v11  ;;  %v4199_v44 = vld [vmem:[%s4638_s6 + $0x8] sm:$0xff] }
 0x342   : > { %v2497_v5 = vpop.f32.mrf.mxu2  ;;  %v2086_v8 = vrot.slane %v4199_v44, 4  ;;  %v2710_v52 = vrot.slane %v4199_v44, 5  ;;  %v3116_v32 = vrot.slane %v4199_v44, 6 }
 0x343   : > { %v2903_v29 = vpop.f32.mrf.mxu3  ;;  %3504 = vst [vmem:[%s5512_s29 + $0xb8] sm:$0xff] %v3456_v57  ;;  %v2593_v20 = vadd.f32 %v2497_v5, %v2371_v7  ;;  %v2278_v24 = vpop.f32.mrf.mxu1  ;;  %v5801_v7 = vld [vmem:[%s5936_s3] ss:$0 sm:$0xff] }
 0x344   : > { %v2372_v35 = vadd.f32 %v2278_v24, %v5239_v46 }
 0x345   : > { %v2999_v30 = vadd.f32 %v2903_v29, %v2593_v20 }
 0x346   : > { %3917 = vmatmul.msk.f32.gmra.mxu1 %vm440_vm1, %v2077_v28  ;;  %v3312_v31 = vpop.f32.mrf.mxu0 }
 0x347   : > { %v3405_v36 = vadd.f32 %v3309_v54, %v2999_v30  ;;  %3967 = vmatmul.msk.f32.gmra.mxu2 %vm440_vm1, %v2081_v63 }
 0x348   : > { %4017 = vmatmul.msk.f32.gmra.mxu3 %vm440_vm1, %v2705_v3 }
 0x349   : > { %v3457_v41 = vadd.f32 %v5502_v2, %v3405_v36  ;;  %4067 = vmatmul.msk.f32.gmra.mxu0 %vm440_vm1, %v3111_v45  ;;  %v4201_v36 = vld [vmem:[%s4638_s6 + $0x10] sm:$0xff] }
 0x34a   : > { %v2500_v62 = vpop.f32.mrf.mxu2  ;;  %v2088_v18 = vrot.slane %v4201_v36, 4  ;;  %v2712_v0 = vrot.slane %v4201_v36, 5 }
 0x34b   : > { %v2906_v51 = vpop.f32.mrf.mxu3  ;;  %3505 = vst [vmem:[%s5512_s29 + $0xc0] sm:$0xff] %v3457_v41  ;;  %v2594_v28 = vadd.f32 %v2500_v62, %v2372_v35  ;;  %v2281_v17 = vpop.f32.mrf.mxu1 }
 0x34c   : > { %v2373_v6 = vadd.f32 %v2281_v17, %v5253_v10  ;;  %v2089_v17 = vsel %vm1992_vm4, %v2086_v8, %v2088_v18 }
 0x34d   : > { %v3000_v49 = vadd.f32 %v2906_v51, %v2594_v28  ;;  %v3118_v51 = vrot.slane %v4201_v36, 6 }
 0x34e   : > { %3918 = vmatmul.msk.f32.gmra.mxu1 %vm440_vm1, %v2079_v13  ;;  %v3315_v46 = vpop.f32.mrf.mxu0 }
 0x34f   : > { %v3406_v9 = vadd.f32 %v3312_v31, %v3000_v49  ;;  %3968 = vmatmul.msk.f32.gmra.mxu2 %vm440_vm1, %v2083_v40  ;;  %v3117_v31 = vsel %vm3026_vm6, %v3114_v4, %v3116_v32  ;;  %v286_v49 = vld [vmem:[%s4638_s6 + $0x18] sm:$0xff] }
 0x350   : > { %4018 = vmatmul.msk.f32.gmra.mxu3 %vm440_vm1, %v2707_v15  ;;  %v2714_v53 = vrot.slane %v286_v49, 5 }
 0x351   : > { %v3458_v42 = vadd.f32 %v5502_v2, %v3406_v9  ;;  %4068 = vmatmul.msk.f32.gmra.mxu0 %vm440_vm1, %v3113_v1  ;;  %v3115_v2 = vsel %vm3026_vm6, %v3112_v58, %v3114_v4  ;;  %v2400_v9 = vrot.slane %v286_v49, 4 }
 0x352   : > { %v2503_v19 = vpop.f32.mrf.mxu2 }
 0x353   : > { %v2909_v33 = vpop.f32.mrf.mxu3  ;;  %3506 = vst [vmem:[%s5512_s29 + $0xc8] sm:$0xff] %v3458_v42  ;;  %v2595_v55 = vadd.f32 %v2503_v19, %v2373_v6  ;;  %v2284_v13 = vpop.f32.mrf.mxu1  ;;  %v3120_v19 = vrot.slane %v286_v49, 6 }
 0x354   : > { %v2374_v59 = vadd.f32 %v2284_v13, %v5263_v60  ;;  %v2711_v60 = vsel %vm2620_vm5, %v2708_v43, %v2710_v52  ;;  %v2715_v13 = vsel %vm2620_vm5, %v2712_v0, %v2714_v53 }
 0x355   : > { %v3001_v54 = vadd.f32 %v2909_v33, %v2595_v55  ;;  %v2401_v55 = vsel %vm1992_vm4, %v2088_v18, %v2400_v9 }
 0x356   : > { %3919 = vmatmul.msk.f32.gmra.mxu1 %vm440_vm1, %v2081_v63  ;;  %v3318_v10 = vpop.f32.mrf.mxu0  ;;  %v2087_v63 = vsel %vm1992_vm4, %v2084_v56, %v2086_v8 }
 0x357   : > { %v3407_v11 = vadd.f32 %v3315_v46, %v3001_v54  ;;  %3969 = vmatmul.msk.f32.gmra.mxu2 %vm440_vm1, %v2085_v16  ;;  %v3119_v46 = vsel %vm3026_vm6, %v3116_v32, %v3118_v51  ;;  %v3121_v54 = vsel %vm3026_vm6, %v3118_v51, %v3120_v19 }
 0x358   : > { %4019 = vmatmul.msk.f32.gmra.mxu3 %vm440_vm1, %v2709_v25  ;;  %v287_v25 = vld [vmem:[%s4638_s6 + $0x20] sm:$0xff] }
 0x359   : > { %v3459_v57 = vadd.f32 %v5801_v7, %v3407_v11  ;;  %4069 = vmatmul.msk.f32.gmra.mxu0 %vm440_vm1, %v3115_v2  ;;  %v2402_v2 = vrot.slane %v287_v25, 4  ;;  %v2716_v11 = vrot.slane %v287_v25, 5 }
 0x35a   : > { %v2506_v5 = vpop.f32.mrf.mxu2 }
 0x35b   : > { %v2912_v29 = vpop.f32.mrf.mxu3  ;;  %3507 = vst [vmem:[%s5512_s29 + $0xd0] sm:$0xff] %v3459_v57  ;;  %v2596_v20 = vadd.f32 %v2506_v5, %v2374_v59  ;;  %v2287_v24 = vpop.f32.mrf.mxu1  ;;  %v3122_v57 = vrot.slane %v287_v25, 6  ;;  %v2403_v32 = vsel %vm1992_vm4, %v2400_v9, %v2402_v2 }
 0x35c   : > { %v2375_v61 = vadd.f32 %v2287_v24, %v5275_v34 }
 0x35d   : > { %v3002_v3 = vadd.f32 %v2912_v29, %v2596_v20  ;;  %v2717_v20 = vsel %vm2620_vm5, %v2714_v53, %v2716_v11 }
 0x35e   : > { %3920 = vmatmul.msk.f32.gmra.mxu1 %vm440_vm1, %v2083_v40  ;;  %v3321_v30 = vpop.f32.mrf.mxu0  ;;  %v2713_v40 = vsel %vm2620_vm5, %v2710_v52, %v2712_v0 }
 0x35f   : > { %v3408_v45 = vadd.f32 %v3318_v10, %v3002_v3  ;;  %3970 = vmatmul.msk.f32.gmra.mxu2 %vm440_vm1, %v2087_v63 }
 0x360   : > { %4020 = vmatmul.msk.f32.gmra.mxu3 %vm440_vm1, %v2711_v60 }
 0x361   : > { %v3460_v35 = vadd.f32 %v5801_v7, %v3408_v45  ;;  %4070 = vmatmul.msk.f32.gmra.mxu0 %vm440_vm1, %v3117_v31 }
 0x362   : > { %v2509_v41 = vpop.f32.mrf.mxu2 }
 0x363   : > { %v2915_v62 = vpop.f32.mrf.mxu3  ;;  %3508 = vst [vmem:[%s5512_s29 + $0xd8] sm:$0xff] %v3460_v35  ;;  %v2597_v58 = vadd.f32 %v2509_v41, %v2375_v61  ;;  %v2290_v28 = vpop.f32.mrf.mxu1 }
 0x364   : > { %v2376_v56 = vadd.f32 %v2290_v28, %v5286_v47 }
 0x365   : > { %v3003_v15 = vadd.f32 %v2915_v62, %v2597_v58 }
 0x366   : > { %3921 = vmatmul.msk.f32.gmra.mxu1 %vm440_vm1, %v2085_v16  ;;  %v3324_v34 = vpop.f32.mrf.mxu0 }
 0x367   : > { %v3409_v1 = vadd.f32 %v3321_v30, %v3003_v15  ;;  %3971 = vmatmul.msk.f32.gmra.mxu2 %vm440_vm1, %v2089_v17 }
 0x368   : > { %4021 = vmatmul.msk.f32.gmra.mxu3 %vm440_vm1, %v2713_v40 }
 0x369   : > { %v3461_v43 = vadd.f32 %v5801_v7, %v3409_v1  ;;  %4071 = vmatmul.msk.f32.gmra.mxu0 %vm440_vm1, %v3119_v46 }
 0x36a   : > { %v2512_v6 = vpop.f32.mrf.mxu2 }
 0x36b   : > { %v2918_v42 = vpop.f32.mrf.mxu3  ;;  %3509 = vst [vmem:[%s5512_s29 + $0xe0] sm:$0xff] %v3461_v43  ;;  %v2598_v33 = vadd.f32 %v2512_v6, %v2376_v56  ;;  %v2293_v4 = vpop.f32.mrf.mxu1 }
 0x36c   : > { %v2377_v44 = vadd.f32 %v2293_v4, %v5295_v39  ;;  %v3123_v39 = vsel %vm3026_vm6, %v3120_v19, %v3122_v57 }
 0x36d   : > { %v3004_v16 = vadd.f32 %v2918_v42, %v2598_v33 }
 0x36e   : > { %3922 = vmatmul.msk.f32.gmra.mxu1 %vm440_vm1, %v2087_v63  ;;  %v3327_v47 = vpop.f32.mrf.mxu0 }
 0x36f   : > { %v3410_v10 = vadd.f32 %v3324_v34, %v3004_v16  ;;  %3972 = vmatmul.msk.f32.gmra.mxu2 %vm440_vm1, %v2401_v55 }
 0x370   : > { %4022 = vmatmul.msk.f32.gmra.mxu3 %vm440_vm1, %v2715_v13 }
 0x371   : > { %v3462_v8 = vadd.f32 %v5801_v7, %v3410_v10  ;;  %4072 = vmatmul.msk.f32.gmra.mxu0 %vm440_vm1, %v3121_v54 }
 0x372   : > { %v2515_v52 = vpop.f32.mrf.mxu2 }
 0x373   : > { %v2921_v59 = vpop.f32.mrf.mxu3  ;;  %3510 = vst [vmem:[%s5512_s29 + $0xe8] sm:$0xff] %v3462_v8  ;;  %v2599_v5 = vadd.f32 %v2515_v52, %v2377_v44  ;;  %v2296_v29 = vpop.f32.mrf.mxu1 }
 0x374   : > { %v2378_v3 = vadd.f32 %v2296_v29, %v5310_v14 }
 0x375   : > { %v3005_v24 = vadd.f32 %v2921_v59, %v2599_v5 }
 0x376   : > { %3923 = vmatmul.msk.f32.gmra.mxu1 %vm440_vm1, %v2089_v17  ;;  %v3330_v63 = vpop.f32.mrf.mxu0 }
 0x377   : > { %v3411_v60 = vadd.f32 %v3327_v47, %v3005_v24  ;;  %3973 = vmatmul.msk.f32.gmra.mxu2 %vm440_vm1, %v2403_v32 }
 0x378   : > { %4023 = vmatmul.msk.f32.gmra.mxu3 %vm440_vm1, %v2717_v20 }
 0x379   : > { %v3463_v30 = vadd.f32 %v5801_v7, %v3411_v60  ;;  %4073 = vmatmul.msk.f32.gmra.mxu0 %vm440_vm1, %v3123_v39 }
 0x37a   : > { %v2518_v31 = vpop.f32.mrf.mxu2 }
 0x37b   : > { %v2924_v45 = vpop.f32.mrf.mxu3  ;;  %3511 = vst [vmem:[%s5512_s29 + $0xf0] sm:$0xff] %v3463_v30  ;;  %v2600_v36 = vadd.f32 %v2518_v31, %v2378_v3  ;;  %v2299_v18 = vpop.f32.mrf.mxu1 }
 0x37c   : > { %v2379_v41 = vadd.f32 %v2299_v18, %v5322_v37 }
 0x37d   : > { %v3006_v0 = vadd.f32 %v2924_v45, %v2600_v36 }
 0x37e   : > { %v3333_v61 = vpop.f32.mrf.mxu0 }
 0x37f   : > { %v3412_v35 = vadd.f32 %v3330_v63, %v3006_v0 }
 0x381   : > { %v3464_v62 = vadd.f32 %v5801_v7, %v3412_v35 }
 0x382   : > { %v2521_v51 = vpop.f32.mrf.mxu2 }
 0x383   : > { %v2927_v58 = vpop.f32.mrf.mxu3  ;;  %3512 = vst [vmem:[%s5512_s29 + $0xf8] sm:$0xff] %v3464_v62  ;;  %v2601_v14 = vadd.f32 %v2521_v51, %v2379_v41  ;;  %v2302_v28 = vpop.f32.mrf.mxu1 }
 0x384   : > { %v2380_v49 = vadd.f32 %v2302_v28, %v5333_v22 }
 0x385   : > { %v3007_v17 = vadd.f32 %v2927_v58, %v2601_v14 }
 0x386   : > { %v3336_v40 = vpop.f32.mrf.mxu0 }
 0x387   : > { %v3413_v15 = vadd.f32 %v3333_v61, %v3007_v17 }
 0x389   : > { %v3465_v34 = vadd.f32 %v5801_v7, %v3413_v15 }
 0x38a   : > { %v2524_v46 = vpop.f32.mrf.mxu2 }
 0x38b   : > { %v2930_v1 = vpop.f32.mrf.mxu3  ;;  %3513 = vst [vmem:[%s5512_s29 + $0x100] sm:$0xff] %v3465_v34  ;;  %v2602_v9 = vadd.f32 %v2524_v46, %v2380_v49  ;;  %v2305_v37 = vpop.f32.mrf.mxu1 }
 0x38c   : > { %v2381_v6 = vadd.f32 %v2305_v37, %v5344_v48 }
 0x38d   : > { %v3008_v53 = vadd.f32 %v2930_v1, %v2602_v9  ;;  %v5990_v1 = vld [vmem:[#allocation7_spill] sm:$0xff] }
 0x38e   : > { %v3339_v56 = vpop.f32.mrf.mxu0 }
 0x38f   : > { %v3414_v43 = vadd.f32 %v3336_v40, %v3008_v53 }
 0x391   : > { %v3466_v42 = vadd.f32 %v5801_v7, %v3414_v43 }
 0x392   : > { %v2527_v19 = vpop.f32.mrf.mxu2 }
 0x393   : > { %v2933_v33 = vpop.f32.mrf.mxu3  ;;  %3514 = vst [vmem:[%s5512_s29 + $0x108] sm:$0xff] %v3466_v42  ;;  %v2603_v4 = vadd.f32 %v2527_v19, %v2381_v6  ;;  %v2308_v22 = vpop.f32.mrf.mxu1 }
 0x394   : > { %v2382_v25 = vadd.f32 %v2308_v22, %v5355_v23 }
 0x395   : > { %v3009_v55 = vadd.f32 %v2933_v33, %v2603_v4  ;;  %v5991_v33 = vld [vmem:[#allocation9_spill] sm:$0xff] }
 0x396   : > { %v3342_v13 = vpop.f32.mrf.mxu0 }
 0x397   : > { %v3415_v16 = vadd.f32 %v3339_v56, %v3009_v55 }
 0x399   : > { %v3467_v47 = vadd.f32 %v5801_v7, %v3415_v16 }
 0x39a   : > { %v2530_v54 = vpop.f32.mrf.mxu2 }
 0x39b   : > { %v2936_v10 = vpop.f32.mrf.mxu3  ;;  %3515 = vst [vmem:[%s5512_s29 + $0x110] sm:$0xff] %v3467_v47  ;;  %v2604_v2 = vadd.f32 %v2530_v54, %v2382_v25  ;;  %v2311_v48 = vpop.f32.mrf.mxu1 }
 0x39c   : > { %v2383_v52 = vadd.f32 %v2311_v48, %v5366_v21 }
 0x39d   : > { %v3010_v11 = vadd.f32 %v2936_v10, %v2604_v2  ;;  %v5992_v2 = vld [vmem:[#allocation11_spill] sm:$0xff] }
 0x39e   : > { %v3345_v44 = vpop.f32.mrf.mxu0 }
 0x39f   : > { %v3416_v8 = vadd.f32 %v3342_v13, %v3010_v11 }
 0x3a1   : > { %v3468_v59 = vadd.f32 %v5801_v7, %v3416_v8 }
 0x3a2   : > { %v2533_v57 = vpop.f32.mrf.mxu2 }
 0x3a3   : > { %v2939_v5 = vpop.f32.mrf.mxu3  ;;  %3516 = vst [vmem:[%s5512_s29 + $0x118] sm:$0xff] %v3468_v59  ;;  %v2605_v29 = vadd.f32 %v2533_v57, %v2383_v52  ;;  %v2314_v23 = vpop.f32.mrf.mxu1 }
 0x3a4   : > { %v2384_v63 = vadd.f32 %v2314_v23, %v5377_v38  ;;  %v5993_v23 = vld [vmem:[#allocation13_spill] sm:$0xff] }
 0x3a5   : > { %v3011_v32 = vadd.f32 %v2939_v5, %v2605_v29 }
 0x3a6   : > { %v3348_v20 = vpop.f32.mrf.mxu0 }
 0x3a7   : > { %v3417_v24 = vadd.f32 %v3345_v44, %v3011_v32 }
 0x3a9   : > { %v3469_v39 = vadd.f32 %v5801_v7, %v3417_v24 }
 0x3aa   : > { %v2536_v60 = vpop.f32.mrf.mxu2 }
 0x3ab   : > { %v2942_v3 = vpop.f32.mrf.mxu3  ;;  %3517 = vst [vmem:[%s5512_s29 + $0x120] sm:$0xff] %v3469_v39  ;;  %v2606_v30 = vadd.f32 %v2536_v60, %v2384_v63  ;;  %v2317_v21 = vpop.f32.mrf.mxu1 }
 0x3ac   : > { %v2385_v18 = vadd.f32 %v2317_v21, %v5388_v12 }
 0x3ad   : > { %v3012_v31 = vadd.f32 %v2942_v3, %v2606_v30 }
 0x3ae   : > { %v3351_v45 = vpop.f32.mrf.mxu0 }
 0x3af   : > { %v3418_v36 = vadd.f32 %v3348_v20, %v3012_v31  ;;  %v5994_v31 = vld [vmem:[#allocation15_spill] sm:$0xff] }
 0x3b1   : > { %v3470_v0 = vadd.f32 %v5801_v7, %v3418_v36 }
 0x3b2   : > { %v2539_v61 = vpop.f32.mrf.mxu2 }
 0x3b3   : > { %v2945_v35 = vpop.f32.mrf.mxu3  ;;  %3518 = vst [vmem:[%s5512_s29 + $0x128] sm:$0xff] %v3470_v0  ;;  %v2607_v41 = vadd.f32 %v2539_v61, %v2385_v18  ;;  %v2320_v38 = vpop.f32.mrf.mxu1 }
 0x3b4   : > { %v2386_v14 = vadd.f32 %v2320_v38, %v5399_v26 }
 0x3b5   : > { %v3013_v62 = vadd.f32 %v2945_v35, %v2607_v41 }
 0x3b6   : > { %v3354_v51 = vpop.f32.mrf.mxu0 }
 0x3b7   : > { %v3419_v58 = vadd.f32 %v3351_v45, %v3013_v62 }
 0x3b9   : > { %v3471_v28 = vadd.f32 %v5801_v7, %v3419_v58 }
 0x3ba   : > { %v2542_v17 = vpop.f32.mrf.mxu2 }
 0x3bb   : > { %v2948_v40 = vpop.f32.mrf.mxu3  ;;  %3519 = vst [vmem:[%s5512_s29 + $0x130] sm:$0xff] %v3471_v28  ;;  %v2608_v15 = vadd.f32 %v2542_v17, %v2386_v14  ;;  %v2323_v12 = vpop.f32.mrf.mxu1 }
 0x3bc   : > { %v2387_v9 = vadd.f32 %v2323_v12, %v5990_v1 }
 0x3bd   : > { %v3014_v49 = vadd.f32 %v2948_v40, %v2608_v15 }
 0x3be   : > { %v3357_v34 = vpop.f32.mrf.mxu0 }
 0x3bf   : > { %v3420_v46 = vadd.f32 %v3354_v51, %v3014_v49  ;;  %v5995_v51 = vld [vmem:[#allocation17_spill] sm:$0xff] }
 0x3c1   : > { %v3472_v37 = vadd.f32 %v5801_v7, %v3420_v46 }
 0x3c2   : > { %v2545_v53 = vpop.f32.mrf.mxu2 }
 0x3c3   : > { %v2951_v56 = vpop.f32.mrf.mxu3  ;;  %3520 = vst [vmem:[%s5512_s29 + $0x138] sm:$0xff] %v3472_v37  ;;  %v2609_v43 = vadd.f32 %v2545_v53, %v2387_v9  ;;  %v2326_v26 = vpop.f32.mrf.mxu1 }
 0x3c4   : > { %v2388_v4 = vadd.f32 %v2326_v26, %v5991_v33 }
 0x3c5   : > { %v3015_v6 = vadd.f32 %v2951_v56, %v2609_v43 }
 0x3c6   : > { %v3360_v42 = vpop.f32.mrf.mxu0 }
 0x3c7   : > { %v3421_v19 = vadd.f32 %v3357_v34, %v3015_v6 }
 0x3c9   : > { %v3473_v22 = vadd.f32 %v5801_v7, %v3421_v19 }
 0x3ca   : > { %v2548_v55 = vpop.f32.mrf.mxu2 }
 0x3cb   : > { %v2954_v13 = vpop.f32.mrf.mxu3  ;;  %3521 = vst [vmem:[%s5512_s29 + $0x140] sm:$0xff] %v3473_v22  ;;  %v2610_v16 = vadd.f32 %v2548_v55, %v2388_v4  ;;  %v2329_v25 = vpop.f32.mrf.mxu1 }
 0x3cc   : > { %v2389_v48 = vadd.f32 %v2329_v25, %v5992_v2 }
 0x3cd   : > { %v3016_v47 = vadd.f32 %v2954_v13, %v2610_v16 }
 0x3ce   : > { %v3363_v54 = vpop.f32.mrf.mxu0 }
 0x3cf   : > { %v3422_v10 = vadd.f32 %v3360_v42, %v3016_v47 }
 0x3d1   : > { %v3474_v11 = vadd.f32 %v5801_v7, %v3422_v10 }
 0x3d2   : > { %v2551_v44 = vpop.f32.mrf.mxu2 }
 0x3d3   : > { %v2957_v8 = vpop.f32.mrf.mxu3  ;;  %3522 = vst [vmem:[%s5512_s29 + $0x148] sm:$0xff] %v3474_v11  ;;  %v2611_v52 = vadd.f32 %v2551_v44, %v2389_v48  ;;  %v2332_v59 = vpop.f32.mrf.mxu1 }
 0x3d4   : > { %v2390_v32 = vadd.f32 %v2332_v59, %v5993_v23 }
 0x3d5   : > { %v3017_v57 = vadd.f32 %v2957_v8, %v2611_v52 }
 0x3d6   : > { %v3366_v5 = vpop.f32.mrf.mxu0 }
 0x3d7   : > { %v3423_v29 = vadd.f32 %v3363_v54, %v3017_v57 }
 0x3d9   : > { %v3475_v20 = vadd.f32 %v5801_v7, %v3423_v29 }
 0x3da   : > { %v2554_v24 = vpop.f32.mrf.mxu2 }
 0x3db   : > { %v2960_v63 = vpop.f32.mrf.mxu3  ;;  %3523 = vst [vmem:[%s5512_s29 + $0x150] sm:$0xff] %v3475_v20  ;;  %v2612_v39 = vadd.f32 %v2554_v24, %v2390_v32  ;;  %v2335_v60 = vpop.f32.mrf.mxu1 }
 0x3dc   : > { %v2391_v45 = vadd.f32 %v2335_v60, %v5994_v31 }
 0x3dd   : > { %v3018_v3 = vadd.f32 %v2960_v63, %v2612_v39 }
 0x3de   : > { %v3369_v30 = vpop.f32.mrf.mxu0 }
 0x3df   : > { %v3424_v21 = vadd.f32 %v3366_v5, %v3018_v3 }
 0x3e1   : > { %v3476_v36 = vadd.f32 %v5801_v7, %v3424_v21 }
 0x3e2   : > { %v2557_v18 = vpop.f32.mrf.mxu2 }
 0x3e3   : > { %v2963_v0 = vpop.f32.mrf.mxu3  ;;  %3524 = vst [vmem:[%s5512_s29 + $0x158] sm:$0xff] %v3476_v36  ;;  %v2613_v61 = vadd.f32 %v2557_v18, %v2391_v45  ;;  %v2338_v35 = vpop.f32.mrf.mxu1 }
 0x3e4   : > { %v2392_v58 = vadd.f32 %v2338_v35, %v5995_v51 }
 0x3e5   : > { %v3019_v41 = vadd.f32 %v2963_v0, %v2613_v61 }
 0x3e6   : > { %v3372_v62 = vpop.f32.mrf.mxu0 }
 0x3e7   : > { %v3425_v38 = vadd.f32 %v3369_v30, %v3019_v41 }
 0x3e9   : > { %v3477_v14 = vadd.f32 %v5801_v7, %v3425_v38 }
 0x3ea   : > { %v2560_v28 = vpop.f32.mrf.mxu2 }
 0x3eb   : > { %v2966_v17 = vpop.f32.mrf.mxu3  ;;  %3525 = vst [vmem:[%s5512_s29 + $0x160] sm:$0xff] %v3477_v14  ;;  %v2614_v40 = vadd.f32 %v2560_v28, %v2392_v58  ;;  %v2341_v15 = vpop.f32.mrf.mxu1 }
 0x3ec   : > { %v2393_v34 = vadd.f32 %v2341_v15, %v5476_v27 }
 0x3ed   : > { %v3020_v12 = vadd.f32 %v2966_v17, %v2614_v40 }
 0x3ee   : > { %v3375_v1 = vpop.f32.mrf.mxu0 }
 0x3ef   : > { %v3426_v49 = vadd.f32 %v3372_v62, %v3020_v12 }
 0x3f1   : > { %v3478_v46 = vadd.f32 %v5801_v7, %v3426_v49 }
 0x3f2   : > { %v2563_v9 = vpop.f32.mrf.mxu2 }
 0x3f3   : > { %v2969_v37 = vpop.f32.mrf.mxu3  ;;  %3526 = vst [vmem:[%s5512_s29 + $0x168] sm:$0xff] %v3478_v46  ;;  %v2615_v53 = vadd.f32 %v2563_v9, %v2393_v34  ;;  %v2344_v43 = vpop.f32.mrf.mxu1 }
 0x3f4   : > { %v2394_v6 = vadd.f32 %v2344_v43, %v5487_v50 }
 0x3f5   : > { %v3021_v56 = vadd.f32 %v2969_v37, %v2615_v53 }
 0x3f6   : > { %v3378_v4 = vpop.f32.mrf.mxu0 }
 0x3f7   : > { %v3427_v26 = vadd.f32 %v3375_v1, %v3021_v56 }
 0x3f9   : > { %v3479_v42 = vadd.f32 %v5801_v7, %v3427_v26 }
 0x3fa   : > { %v2566_v27 = vpop.f32.mrf.mxu2 }
 0x3fb   : > { %v2972_v19 = vpop.f32.mrf.mxu3  ;;  %3527 = vst [vmem:[%s5512_s29 + $0x170] sm:$0xff] %v3479_v42  ;;  %v2616_v33 = vadd.f32 %v2566_v27, %v2394_v6 }
 0x3fd   : > { %v3022_v22 = vadd.f32 %v2972_v19, %v2616_v33 }
 0x3ff   : > { %v3428_v55 = vadd.f32 %v3378_v4, %v3022_v22 }
 0x401   : > { %v3480_v50 = vadd.f32 %v5801_v7, %v3428_v55 }
 0x403   : > { %3528 = vst [vmem:[%s5512_s29 + $0x178] sm:$0xff] %v3480_v50 }
 0x404   : > { %4229 = shalt.err (!%p4226_p4)
}
 0x405   : > { %s4266_s20 = smov 128   ;;  %s4267_s29 = smov 8  }
 0x406   : > { %4085 = dma.vmem_to_hbm [thread:$0]  (%p4331_p5), %s3543_s9, 6144, %s3545_s19, %s3530_s10, %s4266_s20, %s4266_s20, %s4267_s29  }
 0x407 PF: > { %p4091_p7 = scmp.ge.s32.totalorder %s4264_s18, 2  ;;  %s3559_s23 = sand.u32 1, %s4252_s15  }
 0x408   : > { %s3560_s30 = scalar_lea.sflag [#allocation3], %s3559_s23 }
 0x409   : > { %p4088_p8 = pnand %p4091_p7, %p4335_p6 }
 0x40b   : > { %p4089_p9 = pneg %p4088_p8 }
 0x40d   : > { %4247 = dma.done.wait (%p4089_p9), %s3560_s30, 6144  }
 0x40e   : > { %4249 = vsyncadd (%p4089_p9), %s3560_s30, 4294961152  ;;  %p14_p10 = scmp.ge.s32.totalorder %s4318_s21, 4   ;;  %s5996_s15 = smov %s4256_s16 }
 0x40f   : > { %s5997_s16 = smov %s4260_s17  ;;  %s5998_s17 = smov %s4329_s24 }
 0x410   : > { %s5999_s18 = smov %s4318_s21  ;;  %16 = sbr.rel (!%p14_p10) target bundleno = 3 (0x3), region = 82 }
 0x415   :  { %3566 = vsyncpa [#allocation3], 1 }
 0x416   :  { %3568 = vsyncpa [#allocation3 + $0x1], 1 }

</bundles_post_ra>
